<compile_context>
chip_gen: v5e
topology: v5e:2x2
jax: 0.10.0
libtpu: 0.0.40
codegen_flags: <defaults>
</compile_context>

<pallas_src>
import math

import jax
import jax.numpy as jnp
from jax.experimental import pallas as pl
from jax.experimental.pallas import tpu as pltpu

d_model = 512
n_heads = 8
d_k = d_v = d_model // n_heads  # 64
LN_EPS = 1e-5


def mha_kernel(q_ref, k_ref, v_ref,
               wq_ref, bq_ref, wk_ref, bk_ref, wv_ref, bv_ref,
               wo_ref, bo_ref, gamma_ref, beta_ref,
               o_ref,
               ctx_ref):
    # Block shapes:
    #   q/k/v_ref       : (Bt, S, D)  bf16   (Q also supplies the residual)
    #   wq/wk/wv/wo_ref : (D, D)      bf16   (1/sqrt(d_k) folded into wq)
    #   bq/bk/bv/bo     : (1, D)      f32
    #   gamma/beta      : (1, D)      f32
    #   o_ref           : (Bt, S, D)  f32
    #   ctx_ref         : (Bt*S, D)   bf16 VMEM scratch (head-concat buffer)
    Bt, S, D = q_ref.shape
    H = n_heads
    dk = D // H
    rows = Bt * S

    q_bf = q_ref[...].reshape(rows, D)
    k_bf = k_ref[...].reshape(rows, D)
    v_bf = v_ref[...].reshape(rows, D)

    # Full-width projections: M = Bt*S, K = N = 512 -> full MXU columns/depth,
    # f32 accumulation.  (Previously: 8 per-head N=64 dots, ~75% MXU waste.)
    qp = jnp.dot(q_bf, wq_ref[...], preferred_element_type=jnp.float32) + bq_ref[...]
    kp = jnp.dot(k_bf, wk_ref[...], preferred_element_type=jnp.float32) + bk_ref[...]
    vp = jnp.dot(v_bf, wv_ref[...], preferred_element_type=jnp.float32) + bv_ref[...]

    # Per-head attention.  Static Python unroll (H = 8) so the lane slices are
    # static 64-wide slices at offsets h*64 and the ctx writes are static
    # masked stores into the head-concat scratch.
    for h in range(H):
        lo = h * dk
        # NOTE: the (rows, dk) -> (Bt, S, dk) split is a sublane-only re-tiling;
        # it is free when S is a multiple of 8 (f32 layout).  Pad S otherwise.
        qh = qp[:, lo:lo + dk].reshape(Bt, S, dk).astype(jnp.bfloat16)
        kh = kp[:, lo:lo + dk].reshape(Bt, S, dk).astype(jnp.bfloat16)
        vh = vp[:, lo:lo + dk].reshape(Bt, S, dk).astype(jnp.bfloat16)

        # Scores: contraction over d_k without an explicit transpose
        # (1/sqrt(d_k) already folded into wq/bq on the host).
        # TODO(synk): attn_mask path (masked_fill -inf) not implemented.
        scores = jnp.einsum("bqd,bkd->bqk", qh, kh,
                            preferred_element_type=jnp.float32)       # (Bt,S,S)
        scores = scores - jnp.max(scores, axis=-1, keepdims=True)
        e = jnp.exp(scores)
        denom = jnp.sum(e, axis=-1, keepdims=True)
        attn = (e * pl.reciprocal(denom, approx=True)).astype(jnp.bfloat16)

        ctx = jnp.einsum("bqk,bkd->bqd", attn, vh,
                         preferred_element_type=jnp.float32)          # (Bt,S,dk)
        # Head concat: 64-lane store at lane offset h*64 of the bf16 scratch.
        ctx_ref[:, lo:lo + dk] = ctx.reshape(rows, dk).astype(jnp.bfloat16)

    # One full-depth output projection: (rows, 512) @ (512, 512) on the MXU
    # (replaces 8 accumulating K=64 dots + f32 loop-carried accumulator).
    out2d = jnp.dot(ctx_ref[...], wo_ref[...],
                    preferred_element_type=jnp.float32) + bo_ref[...]

    # Residual add (dropout p=0.0 -> identity) + LayerNorm, all in f32.
    x = out2d + q_bf.astype(jnp.float32)
    mean = jnp.mean(x, axis=-1, keepdims=True)
    xc = x - mean
    var = jnp.mean(xc * xc, axis=-1, keepdims=True)
    y = xc * jax.lax.rsqrt(var + LN_EPS) * gamma_ref[...] + beta_ref[...]

    o_ref[...] = y.reshape(Bt, S, D).astype(o_ref.dtype)


def _physical_vmem_bytes():
    """Per-core VMEM capacity (v5e/v6e: 128 MiB, v7x: 64 MiB)."""
    try:
        return int(pltpu.get_tpu_info().vmem_capacity_bytes)
    except Exception:
        return 64 * 1024 * 1024   # conservative fallback (v7x per-TC)


def _estimate_kernel_vmem(Bt, S, D, H):
    """Rough per-grid-step VMEM live set, counting double-buffered I/O blocks,
    single-copy weights (x2 for Pallas' default double buffer), the f32
    projections, the head-concat scratch and the per-head score/exp/attn tiles."""
    rows = Bt * S
    blk = rows * D
    dk = D // H
    io = 2 * (3 * blk * 2 + blk * 4)            # dbl-buffered bf16 Q/K/V in + f32 out
    weights = 2 * (4 * D * D * 2 + 6 * D * 4)   # dbl-buffered bf16 Wq/Wk/Wv/Wo + f32 vectors
    proj = 3 * blk * 4                          # qp / kp / vp in f32
    misc = blk * 2 + 2 * blk * 4                # ctx scratch bf16 + out2d/x f32
    per_head = 4 * Bt * S * S * 4 + 3 * rows * dk * (4 + 2)   # scores/e/attn + head slices
    return io + weights + proj + misc + per_head


def _pick_block_batch(B, S, vmem_limit):
    """Largest divisor of B whose block fits ~70% of the scoped VMEM budget,
    targeting Bt*S of a few hundred rows (MXU M).  Keeps >= 2 grid steps when
    possible so v7x's two TensorCores both get work."""
    budget = int(vmem_limit * 0.7)
    divisors = [d for d in range(1, B + 1) if B % d == 0]
    best = 1
    for bt in divisors:
        if _estimate_kernel_vmem(bt, S, d_model, n_heads) > budget:
            break
        best = bt
        if bt * S >= 1024:        # plenty of MXU M rows; stop growing the block
            break
    # v7x: 2 TCs per chip, dimension_semantics=("parallel",) shards the grid.
    # Per-step overhead (~0.35 us) is negligible, so prefer >= 2 steps unless
    # that would starve the MXU M dimension of a block that was already large.
    if B > 1 and B // best < 2:
        for d in reversed(divisors):
            if B // d >= 2 and (d * S >= 128 or best * S < 256):
                best = d
                break
    return best


@jax.jit
def multi_head_attention(Q, K, V, params):
    B, S, D = Q.shape
    assert D == d_model

    phys_vmem = _physical_vmem_bytes()
    # ~48 MiB on v7x (64 MiB physical), ~96 MiB on v5e/v6e (128 MiB physical).
    vmem_limit = int(min(96 * 1024 * 1024, (phys_vmem * 3) // 4))

    Bt = _pick_block_batch(B, S, vmem_limit)
    grid = (B // Bt,)

    scale = 1.0 / math.sqrt(d_k)   # == 1/8, exact in bf16

    # Host-side one-time weight prep: full (D, D) bf16 slabs, scale folded.
    wq = (params["wq"] * scale).astype(jnp.bfloat16)
    wk = params["wk"].astype(jnp.bfloat16)
    wv = params["wv"].astype(jnp.bfloat16)
    wo = params["wo"].astype(jnp.bfloat16)
    bq = params["bq"] * scale

    # TODO(synk): have upstream produce bf16 activations directly to avoid the
    #             extra HBM round-trip of these converts.
    Q_bf = Q.astype(jnp.bfloat16)
    K_bf = K.astype(jnp.bfloat16)
    V_bf = V.astype(jnp.bfloat16)

    act_spec = pl.BlockSpec((Bt, S, D), lambda b: (b, 0, 0))
    w_spec = pl.BlockSpec((D, D), lambda b: (0, 0))        # grid-invariant weights
    vec_spec = pl.BlockSpec((1, D), lambda b: (0, 0))      # biases / LN vectors

    return pl.pallas_call(
        mha_kernel,
        out_shape=jax.ShapeDtypeStruct((B, S, D), Q.dtype),
        grid_spec=pltpu.PrefetchScalarGridSpec(
            num_scalar_prefetch=0,
            grid=grid,
            in_specs=[
                act_spec, act_spec, act_spec,    # Q, K, V (bf16)
                w_spec, vec_spec,                # Wq, bq   (scale folded)
                w_spec, vec_spec,                # Wk, bk
                w_spec, vec_spec,                # Wv, bv
                w_spec, vec_spec,                # Wo, bo
                vec_spec, vec_spec,              # gamma, beta
            ],
            out_specs=act_spec,
            scratch_shapes=[pltpu.VMEM((Bt * S, D), jnp.bfloat16)],   # head concat
        ),
        compiler_params=pltpu.CompilerParams(
            dimension_semantics=("parallel",),
            vmem_limit_bytes=vmem_limit,
        ),
    )(Q_bf, K_bf, V_bf,
      wq, bq, wk, params["bk"], wv, params["bv"],
      wo, params["bo"],
      params["gamma"], params["beta"])


def reference_mha(Q, K, V, params):
    """Pure-JAX f32 reference mirroring the PyTorch forward (eval mode)."""
    B, S, D = Q.shape
    qp = Q @ params["wq"] + params["bq"]
    kp = K @ params["wk"] + params["bk"]
    vp = V @ params["wv"] + params["bv"]

    def split(x):
        return x.reshape(B, S, n_heads, d_k).transpose(0, 2, 1, 3)   # (B,H,S,dk)

    qh, kh, vh = split(qp), split(kp), split(vp)
    scores = jnp.einsum("bhqd,bhkd->bhqk", qh, kh) / math.sqrt(d_k)
    attn = jax.nn.softmax(scores, axis=-1)
    ctx = jnp.einsum("bhqk,bhkd->bhqd", attn, vh)
    ctx = ctx.transpose(0, 2, 1, 3).reshape(B, S, n_heads * d_v)
    out = ctx @ params["wo"] + params["bo"]
    x = out + Q
    mean = jnp.mean(x, axis=-1, keepdims=True)
    var = jnp.mean((x - mean) ** 2, axis=-1, keepdims=True)
    return (x - mean) / jnp.sqrt(var + LN_EPS) * params["gamma"] + params["beta"]


def init_params(key):
    ks = jax.random.split(key, 8)
    s = 1.0 / math.sqrt(d_model)
    return {
        "wq": jax.random.uniform(ks[0], (d_model, d_model), jnp.float32, -s, s),
        "bq": jax.random.uniform(ks[1], (1, d_model), jnp.float32, -s, s),
        "wk": jax.random.uniform(ks[2], (d_model, d_model), jnp.float32, -s, s),
        "bk": jax.random.uniform(ks[3], (1, d_model), jnp.float32, -s, s),
        "wv": jax.random.uniform(ks[4], (d_model, d_model), jnp.float32, -s, s),
        "bv": jax.random.uniform(ks[5], (1, d_model), jnp.float32, -s, s),
        "wo": jax.random.uniform(ks[6], (d_model, d_model), jnp.float32, -s, s),
        "bo": jax.random.uniform(ks[7], (1, d_model), jnp.float32, -s, s),
        "gamma": jnp.ones((1, d_model), jnp.float32),
        "beta": jnp.zeros((1, d_model), jnp.float32),
    }


if __name__ == "__main__":
    key = jax.random.PRNGKey(0)
    kq, kk, kv, kp = jax.random.split(key, 4)

    B, S = 2, 8
    Q = jax.random.normal(kq, (B, S, d_model), jnp.float32)
    K = jax.random.normal(kk, (B, S, d_model), jnp.float32)
    V = jax.random.normal(kv, (B, S, d_model), jnp.float32)
    params = init_params(kp)

    out = multi_head_attention(Q, K, V, params)
    out = jax.block_until_ready(out)

    ref = reference_mha(Q, K, V, params)
    assert out.shape == (B, S, d_model)
    # Tolerance loosened vs. the f32 reference because MXU inputs (and the
    # residual Q stream) are bf16; f32 accumulation is kept throughout.
    assert jnp.allclose(out, ref, atol=5e-2, rtol=5e-2), "mismatch vs reference"

    print("KERNEL_OK")
</pallas_src>

<mosaic_0001>
module attributes {stable_mosaic.version = 11 : i64} {
  func.func @mha_kernel(%arg0: i32, %arg1: memref<1x8x512xbf16, #tpu.memory_space<vmem>>, %arg2: memref<1x8x512xbf16, #tpu.memory_space<vmem>>, %arg3: memref<1x8x512xbf16, #tpu.memory_space<vmem>>, %arg4: memref<512x512xbf16, #tpu.memory_space<vmem>>, %arg5: memref<1x512xf32, #tpu.memory_space<vmem>>, %arg6: memref<512x512xbf16, #tpu.memory_space<vmem>>, %arg7: memref<1x512xf32, #tpu.memory_space<vmem>>, %arg8: memref<512x512xbf16, #tpu.memory_space<vmem>>, %arg9: memref<1x512xf32, #tpu.memory_space<vmem>>, %arg10: memref<512x512xbf16, #tpu.memory_space<vmem>>, %arg11: memref<1x512xf32, #tpu.memory_space<vmem>>, %arg12: memref<1x512xf32, #tpu.memory_space<vmem>>, %arg13: memref<1x512xf32, #tpu.memory_space<vmem>>, %arg14: memref<1x8x512xf32, #tpu.memory_space<vmem>>, %arg15: memref<8x512xbf16, #tpu.memory_space<vmem>>) attributes {dimension_semantics = [#tpu.dimension_semantics<parallel>], iteration_bounds = array<i64: 2>, scalar_prefetch = 0 : i64, scratch_operands = 1 : i64, tpu.core_type = #tpu.core_type<tc>, window_params = [{transform_indices = @transform_0, window_bounds = array<i64: 1, 8, 512>}, {transform_indices = @transform_1, window_bounds = array<i64: 1, 8, 512>}, {transform_indices = @transform_2, window_bounds = array<i64: 1, 8, 512>}, {pipeline_mode = #tpu.pipeline_mode<synchronous>, transform_indices = @transform_3, window_bounds = array<i64: 512, 512>}, {pipeline_mode = #tpu.pipeline_mode<synchronous>, transform_indices = @transform_4, window_bounds = array<i64: 1, 512>}, {pipeline_mode = #tpu.pipeline_mode<synchronous>, transform_indices = @transform_5, window_bounds = array<i64: 512, 512>}, {pipeline_mode = #tpu.pipeline_mode<synchronous>, transform_indices = @transform_6, window_bounds = array<i64: 1, 512>}, {pipeline_mode = #tpu.pipeline_mode<synchronous>, transform_indices = @transform_7, window_bounds = array<i64: 512, 512>}, {pipeline_mode = #tpu.pipeline_mode<synchronous>, transform_indices = @transform_8, window_bounds = array<i64: 1, 512>}, {pipeline_mode = #tpu.pipeline_mode<synchronous>, transform_indices = @transform_9, window_bounds = array<i64: 512, 512>}, {pipeline_mode = #tpu.pipeline_mode<synchronous>, transform_indices = @transform_10, window_bounds = array<i64: 1, 512>}, {pipeline_mode = #tpu.pipeline_mode<synchronous>, transform_indices = @transform_11, window_bounds = array<i64: 1, 512>}, {pipeline_mode = #tpu.pipeline_mode<synchronous>, transform_indices = @transform_12, window_bounds = array<i64: 1, 512>}, {transform_indices = @transform_13, window_bounds = array<i64: 1, 8, 512>}]} {
    %c0 = arith.constant 0 : index
    %c0_0 = arith.constant 0 : index
    %c0_1 = arith.constant 0 : index
    %0 = vector.load %arg1[%c0, %c0_0, %c0_1] : memref<1x8x512xbf16, #tpu.memory_space<vmem>>, vector<1x8x512xbf16>
    %1 = vector.shape_cast %0 : vector<1x8x512xbf16> to vector<8x512xbf16>
    %c0_2 = arith.constant 0 : index
    %c0_3 = arith.constant 0 : index
    %c0_4 = arith.constant 0 : index
    %2 = vector.load %arg2[%c0_2, %c0_3, %c0_4] : memref<1x8x512xbf16, #tpu.memory_space<vmem>>, vector<1x8x512xbf16>
    %3 = vector.shape_cast %2 : vector<1x8x512xbf16> to vector<8x512xbf16>
    %c0_5 = arith.constant 0 : index
    %c0_6 = arith.constant 0 : index
    %c0_7 = arith.constant 0 : index
    %4 = vector.load %arg3[%c0_5, %c0_6, %c0_7] : memref<1x8x512xbf16, #tpu.memory_space<vmem>>, vector<1x8x512xbf16>
    %5 = vector.shape_cast %4 : vector<1x8x512xbf16> to vector<8x512xbf16>
    %c0_8 = arith.constant 0 : index
    %c0_9 = arith.constant 0 : index
    %6 = vector.load %arg4[%c0_8, %c0_9] : memref<512x512xbf16, #tpu.memory_space<vmem>>, vector<512x512xbf16>
    %cst = arith.constant dense<0.000000e+00> : vector<8x512xf32>
    %7 = tpu.matmul %1, %6, %cst {dimension_numbers = #tpu.dot_dimension_numbers<[1], [0], [0], [1], [0, 0, 1, 1], [], []>} : vector<8x512xbf16>, vector<512x512xbf16>, vector<8x512xf32> -> vector<8x512xf32>
    %c0_10 = arith.constant 0 : index
    %c0_11 = arith.constant 0 : index
    %8 = vector.load %arg5[%c0_10, %c0_11] : memref<1x512xf32, #tpu.memory_space<vmem>>, vector<1x512xf32>
    %9 = vector.broadcast %8 : vector<1x512xf32> to vector<8x512xf32>
    %10 = arith.addf %7, %9 : vector<8x512xf32>
    %c0_12 = arith.constant 0 : index
    %c0_13 = arith.constant 0 : index
    %11 = vector.load %arg6[%c0_12, %c0_13] : memref<512x512xbf16, #tpu.memory_space<vmem>>, vector<512x512xbf16>
    %cst_14 = arith.constant dense<0.000000e+00> : vector<8x512xf32>
    %12 = tpu.matmul %3, %11, %cst_14 {dimension_numbers = #tpu.dot_dimension_numbers<[1], [0], [0], [1], [0, 0, 1, 1], [], []>} : vector<8x512xbf16>, vector<512x512xbf16>, vector<8x512xf32> -> vector<8x512xf32>
    %c0_15 = arith.constant 0 : index
    %c0_16 = arith.constant 0 : index
    %13 = vector.load %arg7[%c0_15, %c0_16] : memref<1x512xf32, #tpu.memory_space<vmem>>, vector<1x512xf32>
    %14 = vector.broadcast %13 : vector<1x512xf32> to vector<8x512xf32>
    %15 = arith.addf %12, %14 : vector<8x512xf32>
    %c0_17 = arith.constant 0 : index
    %c0_18 = arith.constant 0 : index
    %16 = vector.load %arg8[%c0_17, %c0_18] : memref<512x512xbf16, #tpu.memory_space<vmem>>, vector<512x512xbf16>
    %cst_19 = arith.constant dense<0.000000e+00> : vector<8x512xf32>
    %17 = tpu.matmul %5, %16, %cst_19 {dimension_numbers = #tpu.dot_dimension_numbers<[1], [0], [0], [1], [0, 0, 1, 1], [], []>} : vector<8x512xbf16>, vector<512x512xbf16>, vector<8x512xf32> -> vector<8x512xf32>
    %c0_20 = arith.constant 0 : index
    %c0_21 = arith.constant 0 : index
    %18 = vector.load %arg9[%c0_20, %c0_21] : memref<1x512xf32, #tpu.memory_space<vmem>>, vector<1x512xf32>
    %19 = vector.broadcast %18 : vector<1x512xf32> to vector<8x512xf32>
    %20 = arith.addf %17, %19 : vector<8x512xf32>
    %21 = vector.extract_strided_slice %10 {offsets = [0, 0], sizes = [8, 64], strides = [1, 1]} : vector<8x512xf32> to vector<8x64xf32>
    %22 = vector.shape_cast %21 : vector<8x64xf32> to vector<1x8x64xf32>
    %23 = arith.truncf %22 : vector<1x8x64xf32> to vector<1x8x64xbf16>
    %24 = vector.extract_strided_slice %15 {offsets = [0, 0], sizes = [8, 64], strides = [1, 1]} : vector<8x512xf32> to vector<8x64xf32>
    %25 = vector.shape_cast %24 : vector<8x64xf32> to vector<1x8x64xf32>
    %26 = arith.truncf %25 : vector<1x8x64xf32> to vector<1x8x64xbf16>
    %27 = vector.extract_strided_slice %20 {offsets = [0, 0], sizes = [8, 64], strides = [1, 1]} : vector<8x512xf32> to vector<8x64xf32>
    %28 = vector.shape_cast %27 : vector<8x64xf32> to vector<1x8x64xf32>
    %29 = arith.truncf %28 : vector<1x8x64xf32> to vector<1x8x64xbf16>
    "tpu.trace_start"() <{level = 10 : i32, message = "bqd,bkd->bqk"}> : () -> ()
    %cst_22 = arith.constant dense<0.000000e+00> : vector<1x8x8xf32>
    %30 = tpu.matmul %23, %26, %cst_22 {dimension_numbers = #tpu.dot_dimension_numbers<[2], [2], [1], [1], [0, 0, 0, 1, 1, 1], [0], [0]>} : vector<1x8x64xbf16>, vector<1x8x64xbf16>, vector<1x8x8xf32> -> vector<1x8x8xf32>
    "tpu.trace_stop"() : () -> ()
    %cst_23 = arith.constant dense<0xFF800000> : vector<1x8xf32>
    %31 = vector.multi_reduction <maximumf>, %30, %cst_23 [2] : vector<1x8x8xf32> to vector<1x8xf32>
    %32 = vector.shape_cast %31 : vector<1x8xf32> to vector<1x8x1xf32>
    %33 = vector.broadcast %32 : vector<1x8x1xf32> to vector<1x8x8xf32>
    %34 = arith.subf %30, %33 : vector<1x8x8xf32>
    %35 = math.exp %34 : vector<1x8x8xf32>
    %cst_24 = arith.constant dense<0.000000e+00> : vector<1x8xf32>
    %36 = vector.multi_reduction <add>, %35, %cst_24 [2] : vector<1x8x8xf32> to vector<1x8xf32>
    %37 = vector.shape_cast %36 : vector<1x8xf32> to vector<1x8x1xf32>
    %38 = tpu.reciprocal %37 {approx = true} : vector<1x8x1xf32> -> vector<1x8x1xf32>
    %39 = vector.broadcast %38 : vector<1x8x1xf32> to vector<1x8x8xf32>
    %40 = arith.mulf %35, %39 : vector<1x8x8xf32>
    %41 = arith.truncf %40 : vector<1x8x8xf32> to vector<1x8x8xbf16>
    "tpu.trace_start"() <{level = 10 : i32, message = "bqk,bkd->bqd"}> : () -> ()
    %cst_25 = arith.constant dense<0.000000e+00> : vector<1x8x64xf32>
    %42 = tpu.matmul %41, %29, %cst_25 {dimension_numbers = #tpu.dot_dimension_numbers<[2], [1], [1], [2], [0, 0, 0, 1, 1, 2], [0], [0]>} : vector<1x8x8xbf16>, vector<1x8x64xbf16>, vector<1x8x64xf32> -> vector<1x8x64xf32>
    "tpu.trace_stop"() : () -> ()
    %43 = vector.shape_cast %42 : vector<1x8x64xf32> to vector<8x64xf32>
    %44 = arith.truncf %43 : vector<8x64xf32> to vector<8x64xbf16>
    %c0_26 = arith.constant 0 : index
    %c0_27 = arith.constant 0 : index
    %45 = vector.load %arg15[%c0_26, %c0_27] : memref<8x512xbf16, #tpu.memory_space<vmem>>, vector<8x64xbf16>
    tpu.vector_store %arg15[%c0_26, %c0_27], %44 {strides = array<i32>} : memref<8x512xbf16, #tpu.memory_space<vmem>>, vector<8x64xbf16>,
    %46 = vector.extract_strided_slice %10 {offsets = [0, 64], sizes = [8, 64], strides = [1, 1]} : vector<8x512xf32> to vector<8x64xf32>
    %47 = vector.shape_cast %46 : vector<8x64xf32> to vector<1x8x64xf32>
    %48 = arith.truncf %47 : vector<1x8x64xf32> to vector<1x8x64xbf16>
    %49 = vector.extract_strided_slice %15 {offsets = [0, 64], sizes = [8, 64], strides = [1, 1]} : vector<8x512xf32> to vector<8x64xf32>
    %50 = vector.shape_cast %49 : vector<8x64xf32> to vector<1x8x64xf32>
    %51 = arith.truncf %50 : vector<1x8x64xf32> to vector<1x8x64xbf16>
    %52 = vector.extract_strided_slice %20 {offsets = [0, 64], sizes = [8, 64], strides = [1, 1]} : vector<8x512xf32> to vector<8x64xf32>
    %53 = vector.shape_cast %52 : vector<8x64xf32> to vector<1x8x64xf32>
    %54 = arith.truncf %53 : vector<1x8x64xf32> to vector<1x8x64xbf16>
    "tpu.trace_start"() <{level = 10 : i32, message = "bqd,bkd->bqk"}> : () -> ()
    %cst_28 = arith.constant dense<0.000000e+00> : vector<1x8x8xf32>
    %55 = tpu.matmul %48, %51, %cst_28 {dimension_numbers = #tpu.dot_dimension_numbers<[2], [2], [1], [1], [0, 0, 0, 1, 1, 1], [0], [0]>} : vector<1x8x64xbf16>, vector<1x8x64xbf16>, vector<1x8x8xf32> -> vector<1x8x8xf32>
    "tpu.trace_stop"() : () -> ()
    %cst_29 = arith.constant dense<0xFF800000> : vector<1x8xf32>
    %56 = vector.multi_reduction <maximumf>, %55, %cst_29 [2] : vector<1x8x8xf32> to vector<1x8xf32>
    %57 = vector.shape_cast %56 : vector<1x8xf32> to vector<1x8x1xf32>
    %58 = vector.broadcast %57 : vector<1x8x1xf32> to vector<1x8x8xf32>
    %59 = arith.subf %55, %58 : vector<1x8x8xf32>
    %60 = math.exp %59 : vector<1x8x8xf32>
    %cst_30 = arith.constant dense<0.000000e+00> : vector<1x8xf32>
    %61 = vector.multi_reduction <add>, %60, %cst_30 [2] : vector<1x8x8xf32> to vector<1x8xf32>
    %62 = vector.shape_cast %61 : vector<1x8xf32> to vector<1x8x1xf32>
    %63 = tpu.reciprocal %62 {approx = true} : vector<1x8x1xf32> -> vector<1x8x1xf32>
    %64 = vector.broadcast %63 : vector<1x8x1xf32> to vector<1x8x8xf32>
    %65 = arith.mulf %60, %64 : vector<1x8x8xf32>
    %66 = arith.truncf %65 : vector<1x8x8xf32> to vector<1x8x8xbf16>
    "tpu.trace_start"() <{level = 10 : i32, message = "bqk,bkd->bqd"}> : () -> ()
    %cst_31 = arith.constant dense<0.000000e+00> : vector<1x8x64xf32>
    %67 = tpu.matmul %66, %54, %cst_31 {dimension_numbers = #tpu.dot_dimension_numbers<[2], [1], [1], [2], [0, 0, 0, 1, 1, 2], [0], [0]>} : vector<1x8x8xbf16>, vector<1x8x64xbf16>, vector<1x8x64xf32> -> vector<1x8x64xf32>
    "tpu.trace_stop"() : () -> ()
    %68 = vector.shape_cast %67 : vector<1x8x64xf32> to vector<8x64xf32>
    %69 = arith.truncf %68 : vector<8x64xf32> to vector<8x64xbf16>
    %c0_32 = arith.constant 0 : index
    %c64 = arith.constant 64 : index
    %70 = vector.load %arg15[%c0_32, %c64] : memref<8x512xbf16, #tpu.memory_space<vmem>>, vector<8x64xbf16>
    tpu.vector_store %arg15[%c0_32, %c64], %69 {strides = array<i32>} : memref<8x512xbf16, #tpu.memory_space<vmem>>, vector<8x64xbf16>,
    %71 = vector.extract_strided_slice %10 {offsets = [0, 128], sizes = [8, 64], strides = [1, 1]} : vector<8x512xf32> to vector<8x64xf32>
    %72 = vector.shape_cast %71 : vector<8x64xf32> to vector<1x8x64xf32>
    %73 = arith.truncf %72 : vector<1x8x64xf32> to vector<1x8x64xbf16>
    %74 = vector.extract_strided_slice %15 {offsets = [0, 128], sizes = [8, 64], strides = [1, 1]} : vector<8x512xf32> to vector<8x64xf32>
    %75 = vector.shape_cast %74 : vector<8x64xf32> to vector<1x8x64xf32>
    %76 = arith.truncf %75 : vector<1x8x64xf32> to vector<1x8x64xbf16>
    %77 = vector.extract_strided_slice %20 {offsets = [0, 128], sizes = [8, 64], strides = [1, 1]} : vector<8x512xf32> to vector<8x64xf32>
    %78 = vector.shape_cast %77 : vector<8x64xf32> to vector<1x8x64xf32>
    %79 = arith.truncf %78 : vector<1x8x64xf32> to vector<1x8x64xbf16>
    "tpu.trace_start"() <{level = 10 : i32, message = "bqd,bkd->bqk"}> : () -> ()
    %cst_33 = arith.constant dense<0.000000e+00> : vector<1x8x8xf32>
    %80 = tpu.matmul %73, %76, %cst_33 {dimension_numbers = #tpu.dot_dimension_numbers<[2], [2], [1], [1], [0, 0, 0, 1, 1, 1], [0], [0]>} : vector<1x8x64xbf16>, vector<1x8x64xbf16>, vector<1x8x8xf32> -> vector<1x8x8xf32>
    "tpu.trace_stop"() : () -> ()
    %cst_34 = arith.constant dense<0xFF800000> : vector<1x8xf32>
    %81 = vector.multi_reduction <maximumf>, %80, %cst_34 [2] : vector<1x8x8xf32> to vector<1x8xf32>
    %82 = vector.shape_cast %81 : vector<1x8xf32> to vector<1x8x1xf32>
    %83 = vector.broadcast %82 : vector<1x8x1xf32> to vector<1x8x8xf32>
    %84 = arith.subf %80, %83 : vector<1x8x8xf32>
    %85 = math.exp %84 : vector<1x8x8xf32>
    %cst_35 = arith.constant dense<0.000000e+00> : vector<1x8xf32>
    %86 = vector.multi_reduction <add>, %85, %cst_35 [2] : vector<1x8x8xf32> to vector<1x8xf32>
    %87 = vector.shape_cast %86 : vector<1x8xf32> to vector<1x8x1xf32>
    %88 = tpu.reciprocal %87 {approx = true} : vector<1x8x1xf32> -> vector<1x8x1xf32>
    %89 = vector.broadcast %88 : vector<1x8x1xf32> to vector<1x8x8xf32>
    %90 = arith.mulf %85, %89 : vector<1x8x8xf32>
    %91 = arith.truncf %90 : vector<1x8x8xf32> to vector<1x8x8xbf16>
    "tpu.trace_start"() <{level = 10 : i32, message = "bqk,bkd->bqd"}> : () -> ()
    %cst_36 = arith.constant dense<0.000000e+00> : vector<1x8x64xf32>
    %92 = tpu.matmul %91, %79, %cst_36 {dimension_numbers = #tpu.dot_dimension_numbers<[2], [1], [1], [2], [0, 0, 0, 1, 1, 2], [0], [0]>} : vector<1x8x8xbf16>, vector<1x8x64xbf16>, vector<1x8x64xf32> -> vector<1x8x64xf32>
    "tpu.trace_stop"() : () -> ()
    %93 = vector.shape_cast %92 : vector<1x8x64xf32> to vector<8x64xf32>
    %94 = arith.truncf %93 : vector<8x64xf32> to vector<8x64xbf16>
    %c0_37 = arith.constant 0 : index
    %c128 = arith.constant 128 : index
    %95 = vector.load %arg15[%c0_37, %c128] : memref<8x512xbf16, #tpu.memory_space<vmem>>, vector<8x64xbf16>
    tpu.vector_store %arg15[%c0_37, %c128], %94 {strides = array<i32>} : memref<8x512xbf16, #tpu.memory_space<vmem>>, vector<8x64xbf16>,
    %96 = vector.extract_strided_slice %10 {offsets = [0, 192], sizes = [8, 64], strides = [1, 1]} : vector<8x512xf32> to vector<8x64xf32>
    %97 = vector.shape_cast %96 : vector<8x64xf32> to vector<1x8x64xf32>
    %98 = arith.truncf %97 : vector<1x8x64xf32> to vector<1x8x64xbf16>
    %99 = vector.extract_strided_slice %15 {offsets = [0, 192], sizes = [8, 64], strides = [1, 1]} : vector<8x512xf32> to vector<8x64xf32>
    %100 = vector.shape_cast %99 : vector<8x64xf32> to vector<1x8x64xf32>
    %101 = arith.truncf %100 : vector<1x8x64xf32> to vector<1x8x64xbf16>
    %102 = vector.extract_strided_slice %20 {offsets = [0, 192], sizes = [8, 64], strides = [1, 1]} : vector<8x512xf32> to vector<8x64xf32>
    %103 = vector.shape_cast %102 : vector<8x64xf32> to vector<1x8x64xf32>
    %104 = arith.truncf %103 : vector<1x8x64xf32> to vector<1x8x64xbf16>
    "tpu.trace_start"() <{level = 10 : i32, message = "bqd,bkd->bqk"}> : () -> ()
    %cst_38 = arith.constant dense<0.000000e+00> : vector<1x8x8xf32>
    %105 = tpu.matmul %98, %101, %cst_38 {dimension_numbers = #tpu.dot_dimension_numbers<[2], [2], [1], [1], [0, 0, 0, 1, 1, 1], [0], [0]>} : vector<1x8x64xbf16>, vector<1x8x64xbf16>, vector<1x8x8xf32> -> vector<1x8x8xf32>
    "tpu.trace_stop"() : () -> ()
    %cst_39 = arith.constant dense<0xFF800000> : vector<1x8xf32>
    %106 = vector.multi_reduction <maximumf>, %105, %cst_39 [2] : vector<1x8x8xf32> to vector<1x8xf32>
    %107 = vector.shape_cast %106 : vector<1x8xf32> to vector<1x8x1xf32>
    %108 = vector.broadcast %107 : vector<1x8x1xf32> to vector<1x8x8xf32>
    %109 = arith.subf %105, %108 : vector<1x8x8xf32>
    %110 = math.exp %109 : vector<1x8x8xf32>
    %cst_40 = arith.constant dense<0.000000e+00> : vector<1x8xf32>
    %111 = vector.multi_reduction <add>, %110, %cst_40 [2] : vector<1x8x8xf32> to vector<1x8xf32>
    %112 = vector.shape_cast %111 : vector<1x8xf32> to vector<1x8x1xf32>
    %113 = tpu.reciprocal %112 {approx = true} : vector<1x8x1xf32> -> vector<1x8x1xf32>
    %114 = vector.broadcast %113 : vector<1x8x1xf32> to vector<1x8x8xf32>
    %115 = arith.mulf %110, %114 : vector<1x8x8xf32>
    %116 = arith.truncf %115 : vector<1x8x8xf32> to vector<1x8x8xbf16>
    "tpu.trace_start"() <{level = 10 : i32, message = "bqk,bkd->bqd"}> : () -> ()
    %cst_41 = arith.constant dense<0.000000e+00> : vector<1x8x64xf32>
    %117 = tpu.matmul %116, %104, %cst_41 {dimension_numbers = #tpu.dot_dimension_numbers<[2], [1], [1], [2], [0, 0, 0, 1, 1, 2], [0], [0]>} : vector<1x8x8xbf16>, vector<1x8x64xbf16>, vector<1x8x64xf32> -> vector<1x8x64xf32>
    "tpu.trace_stop"() : () -> ()
    %118 = vector.shape_cast %117 : vector<1x8x64xf32> to vector<8x64xf32>
    %119 = arith.truncf %118 : vector<8x64xf32> to vector<8x64xbf16>
    %c0_42 = arith.constant 0 : index
    %c192 = arith.constant 192 : index
    %120 = vector.load %arg15[%c0_42, %c192] : memref<8x512xbf16, #tpu.memory_space<vmem>>, vector<8x64xbf16>
    tpu.vector_store %arg15[%c0_42, %c192], %119 {strides = array<i32>} : memref<8x512xbf16, #tpu.memory_space<vmem>>, vector<8x64xbf16>,
    %121 = vector.extract_strided_slice %10 {offsets = [0, 256], sizes = [8, 64], strides = [1, 1]} : vector<8x512xf32> to vector<8x64xf32>
    %122 = vector.shape_cast %121 : vector<8x64xf32> to vector<1x8x64xf32>
    %123 = arith.truncf %122 : vector<1x8x64xf32> to vector<1x8x64xbf16>
    %124 = vector.extract_strided_slice %15 {offsets = [0, 256], sizes = [8, 64], strides = [1, 1]} : vector<8x512xf32> to vector<8x64xf32>
    %125 = vector.shape_cast %124 : vector<8x64xf32> to vector<1x8x64xf32>
    %126 = arith.truncf %125 : vector<1x8x64xf32> to vector<1x8x64xbf16>
    %127 = vector.extract_strided_slice %20 {offsets = [0, 256], sizes = [8, 64], strides = [1, 1]} : vector<8x512xf32> to vector<8x64xf32>
    %128 = vector.shape_cast %127 : vector<8x64xf32> to vector<1x8x64xf32>
    %129 = arith.truncf %128 : vector<1x8x64xf32> to vector<1x8x64xbf16>
    "tpu.trace_start"() <{level = 10 : i32, message = "bqd,bkd->bqk"}> : () -> ()
    %cst_43 = arith.constant dense<0.000000e+00> : vector<1x8x8xf32>
    %130 = tpu.matmul %123, %126, %cst_43 {dimension_numbers = #tpu.dot_dimension_numbers<[2], [2], [1], [1], [0, 0, 0, 1, 1, 1], [0], [0]>} : vector<1x8x64xbf16>, vector<1x8x64xbf16>, vector<1x8x8xf32> -> vector<1x8x8xf32>
    "tpu.trace_stop"() : () -> ()
    %cst_44 = arith.constant dense<0xFF800000> : vector<1x8xf32>
    %131 = vector.multi_reduction <maximumf>, %130, %cst_44 [2] : vector<1x8x8xf32> to vector<1x8xf32>
    %132 = vector.shape_cast %131 : vector<1x8xf32> to vector<1x8x1xf32>
    %133 = vector.broadcast %132 : vector<1x8x1xf32> to vector<1x8x8xf32>
    %134 = arith.subf %130, %133 : vector<1x8x8xf32>
    %135 = math.exp %134 : vector<1x8x8xf32>
    %cst_45 = arith.constant dense<0.000000e+00> : vector<1x8xf32>
    %136 = vector.multi_reduction <add>, %135, %cst_45 [2] : vector<1x8x8xf32> to vector<1x8xf32>
    %137 = vector.shape_cast %136 : vector<1x8xf32> to vector<1x8x1xf32>
    %138 = tpu.reciprocal %137 {approx = true} : vector<1x8x1xf32> -> vector<1x8x1xf32>
    %139 = vector.broadcast %138 : vector<1x8x1xf32> to vector<1x8x8xf32>
    %140 = arith.mulf %135, %139 : vector<1x8x8xf32>
    %141 = arith.truncf %140 : vector<1x8x8xf32> to vector<1x8x8xbf16>
    "tpu.trace_start"() <{level = 10 : i32, message = "bqk,bkd->bqd"}> : () -> ()
    %cst_46 = arith.constant dense<0.000000e+00> : vector<1x8x64xf32>
    %142 = tpu.matmul %141, %129, %cst_46 {dimension_numbers = #tpu.dot_dimension_numbers<[2], [1], [1], [2], [0, 0, 0, 1, 1, 2], [0], [0]>} : vector<1x8x8xbf16>, vector<1x8x64xbf16>, vector<1x8x64xf32> -> vector<1x8x64xf32>
    "tpu.trace_stop"() : () -> ()
    %143 = vector.shape_cast %142 : vector<1x8x64xf32> to vector<8x64xf32>
    %144 = arith.truncf %143 : vector<8x64xf32> to vector<8x64xbf16>
    %c0_47 = arith.constant 0 : index
    %c256 = arith.constant 256 : index
    %145 = vector.load %arg15[%c0_47, %c256] : memref<8x512xbf16, #tpu.memory_space<vmem>>, vector<8x64xbf16>
    tpu.vector_store %arg15[%c0_47, %c256], %144 {strides = array<i32>} : memref<8x512xbf16, #tpu.memory_space<vmem>>, vector<8x64xbf16>,
    %146 = vector.extract_strided_slice %10 {offsets = [0, 320], sizes = [8, 64], strides = [1, 1]} : vector<8x512xf32> to vector<8x64xf32>
    %147 = vector.shape_cast %146 : vector<8x64xf32> to vector<1x8x64xf32>
    %148 = arith.truncf %147 : vector<1x8x64xf32> to vector<1x8x64xbf16>
    %149 = vector.extract_strided_slice %15 {offsets = [0, 320], sizes = [8, 64], strides = [1, 1]} : vector<8x512xf32> to vector<8x64xf32>
    %150 = vector.shape_cast %149 : vector<8x64xf32> to vector<1x8x64xf32>
    %151 = arith.truncf %150 : vector<1x8x64xf32> to vector<1x8x64xbf16>
    %152 = vector.extract_strided_slice %20 {offsets = [0, 320], sizes = [8, 64], strides = [1, 1]} : vector<8x512xf32> to vector<8x64xf32>
    %153 = vector.shape_cast %152 : vector<8x64xf32> to vector<1x8x64xf32>
    %154 = arith.truncf %153 : vector<1x8x64xf32> to vector<1x8x64xbf16>
    "tpu.trace_start"() <{level = 10 : i32, message = "bqd,bkd->bqk"}> : () -> ()
    %cst_48 = arith.constant dense<0.000000e+00> : vector<1x8x8xf32>
    %155 = tpu.matmul %148, %151, %cst_48 {dimension_numbers = #tpu.dot_dimension_numbers<[2], [2], [1], [1], [0, 0, 0, 1, 1, 1], [0], [0]>} : vector<1x8x64xbf16>, vector<1x8x64xbf16>, vector<1x8x8xf32> -> vector<1x8x8xf32>
    "tpu.trace_stop"() : () -> ()
    %cst_49 = arith.constant dense<0xFF800000> : vector<1x8xf32>
    %156 = vector.multi_reduction <maximumf>, %155, %cst_49 [2] : vector<1x8x8xf32> to vector<1x8xf32>
    %157 = vector.shape_cast %156 : vector<1x8xf32> to vector<1x8x1xf32>
    %158 = vector.broadcast %157 : vector<1x8x1xf32> to vector<1x8x8xf32>
    %159 = arith.subf %155, %158 : vector<1x8x8xf32>
    %160 = math.exp %159 : vector<1x8x8xf32>
    %cst_50 = arith.constant dense<0.000000e+00> : vector<1x8xf32>
    %161 = vector.multi_reduction <add>, %160, %cst_50 [2] : vector<1x8x8xf32> to vector<1x8xf32>
    %162 = vector.shape_cast %161 : vector<1x8xf32> to vector<1x8x1xf32>
    %163 = tpu.reciprocal %162 {approx = true} : vector<1x8x1xf32> -> vector<1x8x1xf32>
    %164 = vector.broadcast %163 : vector<1x8x1xf32> to vector<1x8x8xf32>
    %165 = arith.mulf %160, %164 : vector<1x8x8xf32>
    %166 = arith.truncf %165 : vector<1x8x8xf32> to vector<1x8x8xbf16>
    "tpu.trace_start"() <{level = 10 : i32, message = "bqk,bkd->bqd"}> : () -> ()
    %cst_51 = arith.constant dense<0.000000e+00> : vector<1x8x64xf32>
    %167 = tpu.matmul %166, %154, %cst_51 {dimension_numbers = #tpu.dot_dimension_numbers<[2], [1], [1], [2], [0, 0, 0, 1, 1, 2], [0], [0]>} : vector<1x8x8xbf16>, vector<1x8x64xbf16>, vector<1x8x64xf32> -> vector<1x8x64xf32>
    "tpu.trace_stop"() : () -> ()
    %168 = vector.shape_cast %167 : vector<1x8x64xf32> to vector<8x64xf32>
    %169 = arith.truncf %168 : vector<8x64xf32> to vector<8x64xbf16>
    %c0_52 = arith.constant 0 : index
    %c320 = arith.constant 320 : index
    %170 = vector.load %arg15[%c0_52, %c320] : memref<8x512xbf16, #tpu.memory_space<vmem>>, vector<8x64xbf16>
    tpu.vector_store %arg15[%c0_52, %c320], %169 {strides = array<i32>} : memref<8x512xbf16, #tpu.memory_space<vmem>>, vector<8x64xbf16>,
    %171 = vector.extract_strided_slice %10 {offsets = [0, 384], sizes = [8, 64], strides = [1, 1]} : vector<8x512xf32> to vector<8x64xf32>
    %172 = vector.shape_cast %171 : vector<8x64xf32> to vector<1x8x64xf32>
    %173 = arith.truncf %172 : vector<1x8x64xf32> to vector<1x8x64xbf16>
    %174 = vector.extract_strided_slice %15 {offsets = [0, 384], sizes = [8, 64], strides = [1, 1]} : vector<8x512xf32> to vector<8x64xf32>
    %175 = vector.shape_cast %174 : vector<8x64xf32> to vector<1x8x64xf32>
    %176 = arith.truncf %175 : vector<1x8x64xf32> to vector<1x8x64xbf16>
    %177 = vector.extract_strided_slice %20 {offsets = [0, 384], sizes = [8, 64], strides = [1, 1]} : vector<8x512xf32> to vector<8x64xf32>
    %178 = vector.shape_cast %177 : vector<8x64xf32> to vector<1x8x64xf32>
    %179 = arith.truncf %178 : vector<1x8x64xf32> to vector<1x8x64xbf16>
    "tpu.trace_start"() <{level = 10 : i32, message = "bqd,bkd->bqk"}> : () -> ()
    %cst_53 = arith.constant dense<0.000000e+00> : vector<1x8x8xf32>
    %180 = tpu.matmul %173, %176, %cst_53 {dimension_numbers = #tpu.dot_dimension_numbers<[2], [2], [1], [1], [0, 0, 0, 1, 1, 1], [0], [0]>} : vector<1x8x64xbf16>, vector<1x8x64xbf16>, vector<1x8x8xf32> -> vector<1x8x8xf32>
    "tpu.trace_stop"() : () -> ()
    %cst_54 = arith.constant dense<0xFF800000> : vector<1x8xf32>
    %181 = vector.multi_reduction <maximumf>, %180, %cst_54 [2] : vector<1x8x8xf32> to vector<1x8xf32>
    %182 = vector.shape_cast %181 : vector<1x8xf32> to vector<1x8x1xf32>
    %183 = vector.broadcast %182 : vector<1x8x1xf32> to vector<1x8x8xf32>
    %184 = arith.subf %180, %183 : vector<1x8x8xf32>
    %185 = math.exp %184 : vector<1x8x8xf32>
    %cst_55 = arith.constant dense<0.000000e+00> : vector<1x8xf32>
    %186 = vector.multi_reduction <add>, %185, %cst_55 [2] : vector<1x8x8xf32> to vector<1x8xf32>
    %187 = vector.shape_cast %186 : vector<1x8xf32> to vector<1x8x1xf32>
    %188 = tpu.reciprocal %187 {approx = true} : vector<1x8x1xf32> -> vector<1x8x1xf32>
    %189 = vector.broadcast %188 : vector<1x8x1xf32> to vector<1x8x8xf32>
    %190 = arith.mulf %185, %189 : vector<1x8x8xf32>
    %191 = arith.truncf %190 : vector<1x8x8xf32> to vector<1x8x8xbf16>
    "tpu.trace_start"() <{level = 10 : i32, message = "bqk,bkd->bqd"}> : () -> ()
    %cst_56 = arith.constant dense<0.000000e+00> : vector<1x8x64xf32>
    %192 = tpu.matmul %191, %179, %cst_56 {dimension_numbers = #tpu.dot_dimension_numbers<[2], [1], [1], [2], [0, 0, 0, 1, 1, 2], [0], [0]>} : vector<1x8x8xbf16>, vector<1x8x64xbf16>, vector<1x8x64xf32> -> vector<1x8x64xf32>
    "tpu.trace_stop"() : () -> ()
    %193 = vector.shape_cast %192 : vector<1x8x64xf32> to vector<8x64xf32>
    %194 = arith.truncf %193 : vector<8x64xf32> to vector<8x64xbf16>
    %c0_57 = arith.constant 0 : index
    %c384 = arith.constant 384 : index
    %195 = vector.load %arg15[%c0_57, %c384] : memref<8x512xbf16, #tpu.memory_space<vmem>>, vector<8x64xbf16>
    tpu.vector_store %arg15[%c0_57, %c384], %194 {strides = array<i32>} : memref<8x512xbf16, #tpu.memory_space<vmem>>, vector<8x64xbf16>,
    %196 = vector.extract_strided_slice %10 {offsets = [0, 448], sizes = [8, 64], strides = [1, 1]} : vector<8x512xf32> to vector<8x64xf32>
    %197 = vector.shape_cast %196 : vector<8x64xf32> to vector<1x8x64xf32>
    %198 = arith.truncf %197 : vector<1x8x64xf32> to vector<1x8x64xbf16>
    %199 = vector.extract_strided_slice %15 {offsets = [0, 448], sizes = [8, 64], strides = [1, 1]} : vector<8x512xf32> to vector<8x64xf32>
    %200 = vector.shape_cast %199 : vector<8x64xf32> to vector<1x8x64xf32>
    %201 = arith.truncf %200 : vector<1x8x64xf32> to vector<1x8x64xbf16>
    %202 = vector.extract_strided_slice %20 {offsets = [0, 448], sizes = [8, 64], strides = [1, 1]} : vector<8x512xf32> to vector<8x64xf32>
    %203 = vector.shape_cast %202 : vector<8x64xf32> to vector<1x8x64xf32>
    %204 = arith.truncf %203 : vector<1x8x64xf32> to vector<1x8x64xbf16>
    "tpu.trace_start"() <{level = 10 : i32, message = "bqd,bkd->bqk"}> : () -> ()
    %cst_58 = arith.constant dense<0.000000e+00> : vector<1x8x8xf32>
    %205 = tpu.matmul %198, %201, %cst_58 {dimension_numbers = #tpu.dot_dimension_numbers<[2], [2], [1], [1], [0, 0, 0, 1, 1, 1], [0], [0]>} : vector<1x8x64xbf16>, vector<1x8x64xbf16>, vector<1x8x8xf32> -> vector<1x8x8xf32>
    "tpu.trace_stop"() : () -> ()
    %cst_59 = arith.constant dense<0xFF800000> : vector<1x8xf32>
    %206 = vector.multi_reduction <maximumf>, %205, %cst_59 [2] : vector<1x8x8xf32> to vector<1x8xf32>
    %207 = vector.shape_cast %206 : vector<1x8xf32> to vector<1x8x1xf32>
    %208 = vector.broadcast %207 : vector<1x8x1xf32> to vector<1x8x8xf32>
    %209 = arith.subf %205, %208 : vector<1x8x8xf32>
    %210 = math.exp %209 : vector<1x8x8xf32>
    %cst_60 = arith.constant dense<0.000000e+00> : vector<1x8xf32>
    %211 = vector.multi_reduction <add>, %210, %cst_60 [2] : vector<1x8x8xf32> to vector<1x8xf32>
    %212 = vector.shape_cast %211 : vector<1x8xf32> to vector<1x8x1xf32>
    %213 = tpu.reciprocal %212 {approx = true} : vector<1x8x1xf32> -> vector<1x8x1xf32>
    %214 = vector.broadcast %213 : vector<1x8x1xf32> to vector<1x8x8xf32>
    %215 = arith.mulf %210, %214 : vector<1x8x8xf32>
    %216 = arith.truncf %215 : vector<1x8x8xf32> to vector<1x8x8xbf16>
    "tpu.trace_start"() <{level = 10 : i32, message = "bqk,bkd->bqd"}> : () -> ()
    %cst_61 = arith.constant dense<0.000000e+00> : vector<1x8x64xf32>
    %217 = tpu.matmul %216, %204, %cst_61 {dimension_numbers = #tpu.dot_dimension_numbers<[2], [1], [1], [2], [0, 0, 0, 1, 1, 2], [0], [0]>} : vector<1x8x8xbf16>, vector<1x8x64xbf16>, vector<1x8x64xf32> -> vector<1x8x64xf32>
    "tpu.trace_stop"() : () -> ()
    %218 = vector.shape_cast %217 : vector<1x8x64xf32> to vector<8x64xf32>
    %219 = arith.truncf %218 : vector<8x64xf32> to vector<8x64xbf16>
    %c0_62 = arith.constant 0 : index
    %c448 = arith.constant 448 : index
    %220 = vector.load %arg15[%c0_62, %c448] : memref<8x512xbf16, #tpu.memory_space<vmem>>, vector<8x64xbf16>
    tpu.vector_store %arg15[%c0_62, %c448], %219 {strides = array<i32>} : memref<8x512xbf16, #tpu.memory_space<vmem>>, vector<8x64xbf16>,
    %c0_63 = arith.constant 0 : index
    %c0_64 = arith.constant 0 : index
    %221 = vector.load %arg15[%c0_63, %c0_64] : memref<8x512xbf16, #tpu.memory_space<vmem>>, vector<8x512xbf16>
    %c0_65 = arith.constant 0 : index
    %c0_66 = arith.constant 0 : index
    %222 = vector.load %arg10[%c0_65, %c0_66] : memref<512x512xbf16, #tpu.memory_space<vmem>>, vector<512x512xbf16>
    %cst_67 = arith.constant dense<0.000000e+00> : vector<8x512xf32>
    %223 = tpu.matmul %221, %222, %cst_67 {dimension_numbers = #tpu.dot_dimension_numbers<[1], [0], [0], [1], [0, 0, 1, 1], [], []>} : vector<8x512xbf16>, vector<512x512xbf16>, vector<8x512xf32> -> vector<8x512xf32>
    %c0_68 = arith.constant 0 : index
    %c0_69 = arith.constant 0 : index
    %224 = vector.load %arg11[%c0_68, %c0_69] : memref<1x512xf32, #tpu.memory_space<vmem>>, vector<1x512xf32>
    %225 = vector.broadcast %224 : vector<1x512xf32> to vector<8x512xf32>
    %226 = arith.addf %223, %225 : vector<8x512xf32>
    %227 = arith.extf %1 : vector<8x512xbf16> to vector<8x512xf32>
    %228 = arith.addf %226, %227 : vector<8x512xf32>
    %cst_70 = arith.constant dense<0.000000e+00> : vector<8xf32>
    %229 = vector.multi_reduction <add>, %228, %cst_70 [1] : vector<8x512xf32> to vector<8xf32>
    %230 = vector.shape_cast %229 : vector<8xf32> to vector<8x1xf32>
    %cst_71 = arith.constant 5.120000e+02 : f32
    %231 = vector.broadcast %cst_71 : f32 to vector<8x1xf32>
    %232 = arith.divf %230, %231 : vector<8x1xf32>
    %233 = vector.broadcast %232 : vector<8x1xf32> to vector<8x512xf32>
    %234 = arith.subf %228, %233 : vector<8x512xf32>
    %235 = arith.mulf %234, %234 : vector<8x512xf32>
    %cst_72 = arith.constant dense<0.000000e+00> : vector<8xf32>
    %236 = vector.multi_reduction <add>, %235, %cst_72 [1] : vector<8x512xf32> to vector<8xf32>
    %237 = vector.shape_cast %236 : vector<8xf32> to vector<8x1xf32>
    %cst_73 = arith.constant 5.120000e+02 : f32
    %238 = vector.broadcast %cst_73 : f32 to vector<8x1xf32>
    %239 = arith.divf %237, %238 : vector<8x1xf32>
    %cst_74 = arith.constant 9.99999974E-6 : f32
    %240 = vector.broadcast %cst_74 : f32 to vector<8x1xf32>
    %241 = arith.addf %239, %240 : vector<8x1xf32>
    %242 = math.rsqrt %241 : vector<8x1xf32>
    %243 = vector.broadcast %242 : vector<8x1xf32> to vector<8x512xf32>
    %244 = arith.mulf %234, %243 : vector<8x512xf32>
    %c0_75 = arith.constant 0 : index
    %c0_76 = arith.constant 0 : index
    %245 = vector.load %arg12[%c0_75, %c0_76] : memref<1x512xf32, #tpu.memory_space<vmem>>, vector<1x512xf32>
    %246 = vector.broadcast %245 : vector<1x512xf32> to vector<8x512xf32>
    %247 = arith.mulf %244, %246 : vector<8x512xf32>
    %c0_77 = arith.constant 0 : index
    %c0_78 = arith.constant 0 : index
    %248 = vector.load %arg13[%c0_77, %c0_78] : memref<1x512xf32, #tpu.memory_space<vmem>>, vector<1x512xf32>
    %249 = vector.broadcast %248 : vector<1x512xf32> to vector<8x512xf32>
    %250 = arith.addf %247, %249 : vector<8x512xf32>
    %251 = vector.shape_cast %250 : vector<8x512xf32> to vector<1x8x512xf32>
    %c0_79 = arith.constant 0 : index
    %c0_80 = arith.constant 0 : index
    %c0_81 = arith.constant 0 : index
    %252 = vector.load %arg14[%c0_79, %c0_80, %c0_81] : memref<1x8x512xf32, #tpu.memory_space<vmem>>, vector<1x8x512xf32>
    tpu.vector_store %arg14[%c0_79, %c0_80, %c0_81], %251 {strides = array<i32>} : memref<1x8x512xf32, #tpu.memory_space<vmem>>, vector<1x8x512xf32>,
    return
  }
  func.func @transform_0(%arg0: i32) -> (i32, i32, i32) {
    %c0_i32 = arith.constant 0 : i32
    %c0_i32_0 = arith.constant 0 : i32
    %c0_i32_1 = arith.constant 0 : i32
    return %arg0, %c0_i32, %c0_i32_0 : i32, i32, i32
  }
  func.func @transform_1(%arg0: i32) -> (i32, i32, i32) {
    %c0_i32 = arith.constant 0 : i32
    %c0_i32_0 = arith.constant 0 : i32
    %c0_i32_1 = arith.constant 0 : i32
    return %arg0, %c0_i32, %c0_i32_0 : i32, i32, i32
  }
  func.func @transform_2(%arg0: i32) -> (i32, i32, i32) {
    %c0_i32 = arith.constant 0 : i32
    %c0_i32_0 = arith.constant 0 : i32
    %c0_i32_1 = arith.constant 0 : i32
    return %arg0, %c0_i32, %c0_i32_0 : i32, i32, i32
  }
  func.func @transform_3(%arg0: i32) -> (i32, i32) {
    %c0_i32 = arith.constant 0 : i32
    %c0_i32_0 = arith.constant 0 : i32
    %c0_i32_1 = arith.constant 0 : i32
    return %c0_i32, %c0_i32_0 : i32, i32
  }
  func.func @transform_4(%arg0: i32) -> (i32, i32) {
    %c0_i32 = arith.constant 0 : i32
    %c0_i32_0 = arith.constant 0 : i32
    %c0_i32_1 = arith.constant 0 : i32
    return %c0_i32, %c0_i32_0 : i32, i32
  }
  func.func @transform_5(%arg0: i32) -> (i32, i32) {
    %c0_i32 = arith.constant 0 : i32
    %c0_i32_0 = arith.constant 0 : i32
    %c0_i32_1 = arith.constant 0 : i32
    return %c0_i32, %c0_i32_0 : i32, i32
  }
  func.func @transform_6(%arg0: i32) -> (i32, i32) {
    %c0_i32 = arith.constant 0 : i32
    %c0_i32_0 = arith.constant 0 : i32
    %c0_i32_1 = arith.constant 0 : i32
    return %c0_i32, %c0_i32_0 : i32, i32
  }
  func.func @transform_7(%arg0: i32) -> (i32, i32) {
    %c0_i32 = arith.constant 0 : i32
    %c0_i32_0 = arith.constant 0 : i32
    %c0_i32_1 = arith.constant 0 : i32
    return %c0_i32, %c0_i32_0 : i32, i32
  }
  func.func @transform_8(%arg0: i32) -> (i32, i32) {
    %c0_i32 = arith.constant 0 : i32
    %c0_i32_0 = arith.constant 0 : i32
    %c0_i32_1 = arith.constant 0 : i32
    return %c0_i32, %c0_i32_0 : i32, i32
  }
  func.func @transform_9(%arg0: i32) -> (i32, i32) {
    %c0_i32 = arith.constant 0 : i32
    %c0_i32_0 = arith.constant 0 : i32
    %c0_i32_1 = arith.constant 0 : i32
    return %c0_i32, %c0_i32_0 : i32, i32
  }
  func.func @transform_10(%arg0: i32) -> (i32, i32) {
    %c0_i32 = arith.constant 0 : i32
    %c0_i32_0 = arith.constant 0 : i32
    %c0_i32_1 = arith.constant 0 : i32
    return %c0_i32, %c0_i32_0 : i32, i32
  }
  func.func @transform_11(%arg0: i32) -> (i32, i32) {
    %c0_i32 = arith.constant 0 : i32
    %c0_i32_0 = arith.constant 0 : i32
    %c0_i32_1 = arith.constant 0 : i32
    return %c0_i32, %c0_i32_0 : i32, i32
  }
  func.func @transform_12(%arg0: i32) -> (i32, i32) {
    %c0_i32 = arith.constant 0 : i32
    %c0_i32_0 = arith.constant 0 : i32
    %c0_i32_1 = arith.constant 0 : i32
    return %c0_i32, %c0_i32_0 : i32, i32
  }
  func.func @transform_13(%arg0: i32) -> (i32, i32, i32) {
    %c0_i32 = arith.constant 0 : i32
    %c0_i32_0 = arith.constant 0 : i32
    %c0_i32_1 = arith.constant 0 : i32
    return %arg0, %c0_i32, %c0_i32_0 : i32, i32, i32
  }
}

</mosaic_0001>

<bundles_post_ra>
// kernel: multi_head_attention.1
= control target key start
LH: loop header
LB: loop body
LE: loop exit
PB: predicated region body
PF: predicated region fallthrough
CT: control target
= control target key end

     0   :  { %s11470_s0 = inlined_call_operand.vmem [shape: bf16[2,8,512], index: 0, kind: input, shape index: {}]   ;;  %s11471_s1 = inlined_call_operand.vmem [shape: bf16[2,8,512], index: 1, kind: input, shape index: {}]   ;;  %s11472_s2 = inlined_call_operand.vmem [shape: bf16[2,8,512], index: 2, kind: input, shape index: {}]   ;;  %s11473_s3 = inlined_call_operand.vmem [shape: bf16[512,512], index: 3, kind: input, shape index: {}]   ;;  %s11474_s4 = inlined_call_operand.vmem [shape: f32[1,512], index: 4, kind: input, shape index: {}]   ;;  %s11475_s5 = inlined_call_operand.vmem [shape: bf16[512,512], index: 5, kind: input, shape index: {}]   ;;  %s11476_s6 = inlined_call_operand.vmem [shape: f32[1,512], index: 6, kind: input, shape index: {}]   ;;  %s11477_s7 = inlined_call_operand.vmem [shape: bf16[512,512], index: 7, kind: input, shape index: {}]   ;;  %s11478_s8 = inlined_call_operand.vmem [shape: f32[1,512], index: 8, kind: input, shape index: {}]   ;;  %s11479_s9 = inlined_call_operand.vmem [shape: bf16[512,512], index: 9, kind: input, shape index: {}]   ;;  %s11480_s10 = inlined_call_operand.vmem [shape: f32[1,512], index: 10, kind: input, shape index: {}]   ;;  %s11481_s11 = inlined_call_operand.vmem [shape: f32[1,512], index: 11, kind: input, shape index: {}]   ;;  %s11482_s12 = inlined_call_operand.vmem [shape: f32[1,512], index: 12, kind: input, shape index: {}]   ;;  %s11483_s13 = inlined_call_operand.hbm [shape: f32[2,8,512], index: 13, kind: output, shape index: {}]  }
   0x1   :  { %11489 = sst [smem:[#allocation11_spill]] %s11470_s0 }
   0x2   :  { %11490 = sst [smem:[#allocation12_spill]] %s11473_s3 }
   0x3   :  { %18 = vsyncpa [#allocation4], 0 }
   0x4   :  { %20 = vsyncpa [#allocation4 + $0x1], 0  ;;  %s7990_s25 = smov 0   ;;  %s7992_s26 = smov 0  }
   0x5   :  { %s7994_s27 = smov 0   ;;  %s7996_s28 = smov 0  }
   0x6 LB: > { %11491 = sst [smem:[#allocation6_spill]] %s7904_s25  ;;  %s8011_s29 = sadd.s32 4294967295, %s7916_s28   ;;  %s7916_s28 = sphi %s7996_s28, %s11502_s28   ;;  %s7912_s27 = sphi %s7994_s27, %s11504_s27   ;;  %s7908_s26 = sphi %s7992_s26, %s11506_s26   ;;  %s7904_s25 = sphi %s7990_s25, %s11505_s25  }
   0x7   : > { %11492 = sst [smem:[#allocation7_spill]] %s7912_s27  ;;  %s5179_s30 = sadd.s32 4294967294, %s7916_s28  }
   0x8   : > { %s8015_s14 = sadd.s32 1, %s7916_s28   ;;  %s321_s15 = sadd.s32 1, %s7912_s27 }
   0x9   : > { %11493 = sst [smem:[#allocation8_spill]] %s8015_s14  ;;  %s318_s16 = ssub.s32 %s7916_s28, %s8015_s14 }
   0xa   : > { %p331_p0 = scmp.ne.s32.totalorder %s7912_s27, %s7908_s26  ;;  %p319_p1 = scmp.eq.s32.totalorder %s318_s16, 0 }
   0xb   : > { %p332_p2 = scmp.eq.s32.totalorder %s8011_s29, 1  ;;  %p337_p3 = scmp.ne.s32.totalorder %s7908_s26, %s7904_s25 }
   0xc   : > { %p338_p4 = scmp.eq.s32.totalorder %s5179_s30, 1  ;;  %p5182_p7 = scmp.ge.s32.totalorder %s7916_s28, 1 }
   0xd   : > { %s8026_s17 = scalar_select %p319_p1, %s7912_s27, %s321_s15  }
   0xe   : > { %p8028_p5 = por %p332_p2, %p331_p0  ;;  %p8032_p6 = por %p338_p4, %p337_p3 }
   0xf   : > { %11494 = sst [smem:[#allocation9_spill]] %s8026_s17  ;;  %p410_p8 = scmp.lt.s32.totalorder %s7916_s28, 3 }
  0x10   : > { %s11496_s19 = scalar_select %p8032_p6, 1, 0 }
  0x11   : > { %p411_p9 = pnand %p5182_p7, %p410_p8 }
  0x12   : > { %11497 = sst [smem:[#allocation10_spill]] %s11496_s19  ;;  %p464_p10 = scmp.lt.s32.totalorder (!%p411_p9), %s8011_s29, 1 }
  0x13   : > { %414 = sbr.rel (%p411_p9) target bundleno = 1657 (0x679), region = 72  ;;  %s11498_s3 = sld [smem:[#allocation12_spill]] (!%p411_p9) }
  0x14   : > { %s11499_s0 = sld [smem:[#allocation11_spill]] (!%p411_p9)  ;;  %s7774_s17 = sshll.u32 (!%p411_p9), %s8011_s29, 5 }
  0x15   : > { %s7874_s25 = scalar_lea.hbm (!%p411_p9), %s11483_s13, 64 }
  0x18   : > { %s465_s19 = scalar_select %p464_p10, %s8011_s29, 1  ;;  %vm3489_vm0 = vcmask 523264   ;;  %vm3525_vm1 = vcmask 1043456   ;;  %vm3509_vm2 = vcmask 64512   ;;  %vm3543_vm3 = vcmask 519168  }
  0x19   : > { %v5304_v0 = vld [vmem:[%s11498_s3 + $0xe0] sm:$0xf]  ;;  %v7292_v1 = vld [vmem:[%s11498_s3 + $0xec] sm:$0xf0]  ;;  %vm3615_vm4 = vcmask 1043968  }
  0x1a   : > { %v5432_v2 = vld [vmem:[%s11498_s3 + $0x1e0] sm:$0xf]  ;;  %v5305_v3 = vor.u32 %v7292_v1, %v5304_v0  ;;  %v7324_v4 = vld [vmem:[%s11498_s3 + $0x1ec] sm:$0xf0]  ;;  %s8337_s15 = sshll.u32 %s465_s19, 4 }
  0x1b   : > { %v5560_v5 = vld [vmem:[%s11498_s3 + $0x2e0] sm:$0xf]  ;;  %v7356_v6 = vld [vmem:[%s11498_s3 + $0x2ec] sm:$0xf0]  ;;  %v5433_v7 = vor.u32 %v7324_v4, %v5432_v2  ;;  %s8352_s23 = scalar_lea.vmem %s11499_s0, %s8337_s15  ;;  %s473_s20 = scalar_lea.vmem %s11471_s1, %s8337_s15 }
  0x1c   : > { %v5561_v8 = vor.u32 %v7356_v6, %v5560_v5  ;;  %v5688_v9 = vld [vmem:[%s11498_s3 + $0x3e0] sm:$0xf]  ;;  %v7388_v10 = vld [vmem:[%s11498_s3 + $0x3ec] sm:$0xf0]  ;;  %1278 = vmatpush.bf16.msra.mxu0 %v5305_v3  ;;  %s9713_s24 = scalar_lea.vmem %s11472_s2, %s8337_s15  ;;  %s7918_s15 = smov 64  }
  0x1d   : > { %v5288_v11 = vld [vmem:[%s11498_s3 + $0xc0] sm:$0xf]  ;;  %v5689_v12 = vor.u32 %v7388_v10, %v5688_v9  ;;  %v7288_v13 = vld [vmem:[%s11498_s3 + $0xcc] sm:$0xf0]  ;;  %1291 = vmatpush.bf16.msra.mxu1 %v5433_v7  ;;  %s461_s0 = sand.u32 1, %s7908_s26  }
  0x1e   : > { %v5416_v14 = vld [vmem:[%s11498_s3 + $0x1c0] sm:$0xf]  ;;  %v7320_v15 = vld [vmem:[%s11498_s3 + $0x1cc] sm:$0xf0]  ;;  %1304 = vmatpush.bf16.msra.mxu2 %v5561_v8  ;;  %v5289_v16 = vor.u32 %v7288_v13, %v5288_v11  ;;  %s5183_s27 = sshll.u32 %s461_s0, 5  ;;  %s5080_s19 = scalar_lea.sflag [#allocation4], %s461_s0 }
  0x1f   : > { %v5417_v17 = vor.u32 %v7320_v15, %v5416_v14  ;;  %v5544_v18 = vld [vmem:[%s11498_s3 + $0x2c0] sm:$0xf]  ;;  %v7352_v19 = vld [vmem:[%s11498_s3 + $0x2cc] sm:$0xf0]  ;;  %1317 = vmatpush.bf16.msra.mxu3 %v5689_v12  ;;  %s463_s29 = scalar_lea.vmem [#allocation3], %s5183_s27 }
  0x20   : > { %v5672_v20 = vld [vmem:[%s11498_s3 + $0x3c0] sm:$0xf]  ;;  %v5545_v21 = vor.u32 %v7352_v19, %v5544_v18  ;;  %v7384_v22 = vld [vmem:[%s11498_s3 + $0x3cc] sm:$0xf0]  ;;  %1279 = vmatpush.bf16.msra.mxu0 %v5289_v16  ;;  %s5093_s21 = sshll.u32 %s463_s29, 4  ;;  %s5094_s21 = int_to_ptr.vmem [resolvable:$true] %s5093_s21 }
  0x21   : > { %v5272_v23 = vld [vmem:[%s11498_s3 + $0xa0] sm:$0xf]  ;;  %v7284_v24 = vld [vmem:[%s11498_s3 + $0xac] sm:$0xf0]  ;;  %v5673_v25 = vor.u32 %v7384_v22, %v5672_v20  ;;  %1292 = vmatpush.bf16.msra.mxu1 %v5417_v17 }
  0x22   : > { %v5400_v26 = vld [vmem:[%s11498_s3 + $0x1a0] sm:$0xf]  ;;  %v7316_v27 = vld [vmem:[%s11498_s3 + $0x1ac] sm:$0xf0]  ;;  %v5273_v29 = vor.u32 %v7284_v24, %v5272_v23  ;;  %1305 = vmatpush.bf16.msra.mxu2 %v5545_v21 }
  0x23   : > { %v5528_v28 = vld [vmem:[%s11498_s3 + $0x2a0] sm:$0xf]  ;;  %v7348_v30 = vld [vmem:[%s11498_s3 + $0x2ac] sm:$0xf0]  ;;  %v5401_v33 = vor.u32 %v7316_v27, %v5400_v26  ;;  %1318 = vmatpush.bf16.msra.mxu3 %v5673_v25 }
  0x24   : > { %v5656_v31 = vld [vmem:[%s11498_s3 + $0x3a0] sm:$0xf]  ;;  %v7380_v32 = vld [vmem:[%s11498_s3 + $0x3ac] sm:$0xf0]  ;;  %v5529_v34 = vor.u32 %v7348_v30, %v5528_v28  ;;  %1280 = vmatpush.bf16.msra.mxu0 %v5273_v29  ;;  %v7290_v28 = vld [vmem:[%s11498_s3 + $0xe4] sm:$0xf] }
  0x25   : > { %v5256_v35 = vld [vmem:[%s11498_s3 + $0x80] sm:$0xf]  ;;  %v7280_v36 = vld [vmem:[%s11498_s3 + $0x8c] sm:$0xf0]  ;;  %v5657_v38 = vor.u32 %v7380_v32, %v5656_v31  ;;  %1293 = vmatpush.bf16.msra.mxu1 %v5401_v33  ;;  %v5306_v29 = vld [vmem:[%s11498_s3 + $0xf0] sm:$0xf0] }
  0x26   : > { %v5384_v37 = vld [vmem:[%s11498_s3 + $0x180] sm:$0xf]  ;;  %v7312_v39 = vld [vmem:[%s11498_s3 + $0x18c] sm:$0xf0]  ;;  %v5257_v44 = vor.u32 %v7280_v36, %v5256_v35  ;;  %1306 = vmatpush.bf16.msra.mxu2 %v5529_v34  ;;  %v7322_v30 = vld [vmem:[%s11498_s3 + $0x1e4] sm:$0xf] }
  0x27   : > { %v5512_v40 = vld [vmem:[%s11498_s3 + $0x280] sm:$0xf]  ;;  %v7344_v41 = vld [vmem:[%s11498_s3 + $0x28c] sm:$0xf0]  ;;  %v5385_v45 = vor.u32 %v7312_v39, %v5384_v37  ;;  %1319 = vmatpush.bf16.msra.mxu3 %v5657_v38  ;;  %v5434_v32 = vld [vmem:[%s11498_s3 + $0x1f0] sm:$0xf0] }
  0x28   : > { %v5640_v42 = vld [vmem:[%s11498_s3 + $0x380] sm:$0xf]  ;;  %v7376_v43 = vld [vmem:[%s11498_s3 + $0x38c] sm:$0xf0]  ;;  %v5513_v46 = vor.u32 %v7344_v41, %v5512_v40  ;;  %1281 = vmatpush.bf16.msra.mxu0 %v5257_v44  ;;  %v7354_v33 = vld [vmem:[%s11498_s3 + $0x2e4] sm:$0xf]  ;;  %v5309_v40 = vor.u32 %v7290_v28, %v5306_v29  ;;  %v5437_v41 = vor.u32 %v7322_v30, %v5434_v32 }
  0x29   : > { %v5240_v47 = vld [vmem:[%s11498_s3 + $0x60] sm:$0xf]  ;;  %v7276_v48 = vld [vmem:[%s11498_s3 + $0x6c] sm:$0xf0]  ;;  %v5641_v50 = vor.u32 %v7376_v43, %v5640_v42  ;;  %1294 = vmatpush.bf16.msra.mxu1 %v5385_v45  ;;  %v5562_v34 = vld [vmem:[%s11498_s3 + $0x2f0] sm:$0xf0] }
  0x2a   : > { %v5368_v49 = vld [vmem:[%s11498_s3 + $0x160] sm:$0xf]  ;;  %v7308_v51 = vld [vmem:[%s11498_s3 + $0x16c] sm:$0xf0]  ;;  %v5241_v56 = vor.u32 %v7276_v48, %v5240_v47  ;;  %1307 = vmatpush.bf16.msra.mxu2 %v5513_v46  ;;  %v7386_v37 = vld [vmem:[%s11498_s3 + $0x3e4] sm:$0xf]  ;;  %v5565_v42 = vor.u32 %v7354_v33, %v5562_v34 }
  0x2b   : > { %v5496_v52 = vld [vmem:[%s11498_s3 + $0x260] sm:$0xf]  ;;  %v7340_v53 = vld [vmem:[%s11498_s3 + $0x26c] sm:$0xf0]  ;;  %v5369_v57 = vor.u32 %v7308_v51, %v5368_v49  ;;  %1320 = vmatpush.bf16.msra.mxu3 %v5641_v50  ;;  %v5690_v38 = vld [vmem:[%s11498_s3 + $0x3f0] sm:$0xf0] }
  0x2c   : > { %v5624_v54 = vld [vmem:[%s11498_s3 + $0x360] sm:$0xf]  ;;  %v7372_v55 = vld [vmem:[%s11498_s3 + $0x36c] sm:$0xf0]  ;;  %v5497_v58 = vor.u32 %v7340_v53, %v5496_v52  ;;  %1282 = vmatpush.bf16.msra.mxu0 %v5241_v56  ;;  %v7286_v43 = vld [vmem:[%s11498_s3 + $0xc4] sm:$0xf]  ;;  %v5693_v46 = vor.u32 %v7386_v37, %v5690_v38 }
  0x2d   : > { %v5224_v59 = vld [vmem:[%s11498_s3 + $0x40] sm:$0xf]  ;;  %v7272_v60 = vld [vmem:[%s11498_s3 + $0x4c] sm:$0xf0]  ;;  %v5625_v62 = vor.u32 %v7372_v55, %v5624_v54  ;;  %1295 = vmatpush.bf16.msra.mxu1 %v5369_v57  ;;  %v5290_v44 = vld [vmem:[%s11498_s3 + $0xd0] sm:$0xf0] }
  0x2e   : > { %v5352_v61 = vld [vmem:[%s11498_s3 + $0x140] sm:$0xf]  ;;  %v7304_v63 = vld [vmem:[%s11498_s3 + $0x14c] sm:$0xf0]  ;;  %v5225_v4 = vor.u32 %v7272_v60, %v5224_v59  ;;  %1308 = vmatpush.bf16.msra.mxu2 %v5497_v58  ;;  %v7318_v45 = vld [vmem:[%s11498_s3 + $0x1c4] sm:$0xf]  ;;  %v5293_v52 = vor.u32 %v7286_v43, %v5290_v44 }
  0x2f   : > { %v5480_v0 = vld [vmem:[%s11498_s3 + $0x240] sm:$0xf]  ;;  %v7336_v1 = vld [vmem:[%s11498_s3 + $0x24c] sm:$0xf0]  ;;  %v5353_v5 = vor.u32 %v7304_v63, %v5352_v61  ;;  %1321 = vmatpush.bf16.msra.mxu3 %v5625_v62  ;;  %v5418_v47 = vld [vmem:[%s11498_s3 + $0x1d0] sm:$0xf0] }
  0x30   : > { %v5608_v2 = vld [vmem:[%s11498_s3 + $0x340] sm:$0xf]  ;;  %v7368_v3 = vld [vmem:[%s11498_s3 + $0x34c] sm:$0xf0]  ;;  %v5481_v6 = vor.u32 %v7336_v1, %v5480_v0  ;;  %1283 = vmatpush.bf16.msra.mxu0 %v5225_v4  ;;  %v7350_v48 = vld [vmem:[%s11498_s3 + $0x2c4] sm:$0xf]  ;;  %v5421_v53 = vor.u32 %v7318_v45, %v5418_v47 }
  0x31   : > { %v5208_v7 = vld [vmem:[%s11498_s3 + $0x20] sm:$0xf]  ;;  %v7268_v8 = vld [vmem:[%s11498_s3 + $0x2c] sm:$0xf0]  ;;  %v5609_v10 = vor.u32 %v7368_v3, %v5608_v2  ;;  %1296 = vmatpush.bf16.msra.mxu1 %v5353_v5  ;;  %v5546_v49 = vld [vmem:[%s11498_s3 + $0x2d0] sm:$0xf0] }
  0x32   : > { %v5336_v9 = vld [vmem:[%s11498_s3 + $0x120] sm:$0xf]  ;;  %v7300_v11 = vld [vmem:[%s11498_s3 + $0x12c] sm:$0xf0]  ;;  %v5209_v16 = vor.u32 %v7268_v8, %v5208_v7  ;;  %1309 = vmatpush.bf16.msra.mxu2 %v5481_v6  ;;  %v7382_v50 = vld [vmem:[%s11498_s3 + $0x3c4] sm:$0xf]  ;;  %v5549_v54 = vor.u32 %v7350_v48, %v5546_v49 }
  0x33   : > { %v5464_v12 = vld [vmem:[%s11498_s3 + $0x220] sm:$0xf]  ;;  %v7332_v13 = vld [vmem:[%s11498_s3 + $0x22c] sm:$0xf0]  ;;  %v5337_v19 = vor.u32 %v7300_v11, %v5336_v9  ;;  %1322 = vmatpush.bf16.msra.mxu3 %v5609_v10  ;;  %v5674_v51 = vld [vmem:[%s11498_s3 + $0x3d0] sm:$0xf0] }
  0x34   : > { %v5592_v14 = vld [vmem:[%s11498_s3 + $0x320] sm:$0xf]  ;;  %v7364_v15 = vld [vmem:[%s11498_s3 + $0x32c] sm:$0xf0]  ;;  %v5465_v20 = vor.u32 %v7332_v13, %v5464_v12  ;;  %1284 = vmatpush.bf16.msra.mxu0 %v5209_v16  ;;  %v7282_v55 = vld [vmem:[%s11498_s3 + $0xa4] sm:$0xf]  ;;  %v5677_v58 = vor.u32 %v7382_v50, %v5674_v51 }
  0x35   : > { %v5192_v17 = vld [vmem:[%s11498_s3] sm:$0xf]  ;;  %v7264_v18 = vld [vmem:[%s11498_s3 + $0xc] sm:$0xf0]  ;;  %v5593_v24 = vor.u32 %v7364_v15, %v5592_v14  ;;  %1297 = vmatpush.bf16.msra.mxu1 %v5337_v19  ;;  %v5274_v56 = vld [vmem:[%s11498_s3 + $0xb0] sm:$0xf0] }
  0x36   : > { %v5320_v21 = vld [vmem:[%s11498_s3 + $0x100] sm:$0xf]  ;;  %v7296_v22 = vld [vmem:[%s11498_s3 + $0x10c] sm:$0xf0]  ;;  %v5193_v31 = vor.u32 %v7264_v18, %v5192_v17  ;;  %1310 = vmatpush.bf16.msra.mxu2 %v5465_v20  ;;  %v7314_v57 = vld [vmem:[%s11498_s3 + $0x1a4] sm:$0xf]  ;;  %v5277_v0 = vor.u32 %v7282_v55, %v5274_v56 }
  0x37   : > { %v5448_v23 = vld [vmem:[%s11498_s3 + $0x200] sm:$0xf]  ;;  %v7328_v25 = vld [vmem:[%s11498_s3 + $0x20c] sm:$0xf0]  ;;  %v5321_v35 = vor.u32 %v7296_v22, %v5320_v21  ;;  %1323 = vmatpush.bf16.msra.mxu3 %v5593_v24  ;;  %v5402_v59 = vld [vmem:[%s11498_s3 + $0x1b0] sm:$0xf0] }
  0x38   : > { %v5576_v26 = vld [vmem:[%s11498_s3 + $0x300] sm:$0xf]  ;;  %v7360_v27 = vld [vmem:[%s11498_s3 + $0x30c] sm:$0xf0]  ;;  %v5449_v36 = vor.u32 %v7328_v25, %v5448_v23  ;;  %1285 = vmatpush.bf16.msra.mxu0 %v5193_v31  ;;  %v7346_v60 = vld [vmem:[%s11498_s3 + $0x2a4] sm:$0xf]  ;;  %v5405_v2 = vor.u32 %v7314_v57, %v5402_v59 }
  0x39   : > { %v5577_v39 = vor.u32 %v7360_v27, %v5576_v26  ;;  %1298 = vmatpush.bf16.msra.mxu1 %v5321_v35  ;;  %v5530_v61 = vld [vmem:[%s11498_s3 + $0x2b0] sm:$0xf0]  ;;  %v7378_v62 = vld [vmem:[%s11498_s3 + $0x3a4] sm:$0xf]  ;;  %v481_v22 = vld [vmem:[%s8352_s23 + $0x8] sm:$0xff] }
  0x3a   : > { %1311 = vmatpush.bf16.msra.mxu2 %v5449_v36  ;;  %v5658_v63 = vld [vmem:[%s11498_s3 + $0x3b0] sm:$0xf0]  ;;  %v7278_v1 = vld [vmem:[%s11498_s3 + $0x84] sm:$0xf]  ;;  %v5533_v3 = vor.u32 %v7346_v60, %v5530_v61  ;;  %v628_v26 = vunpack.c.l.b16 %v481_v22  ;;  %v629_v28 = vunpack.c.h.b16 %v481_v22  ;;  %v7289_v22 = vld [vmem:[%s11498_s3 + $0xd4] sm:$0xf0] }
  0x3b   : > { %1324 = vmatpush.bf16.msra.mxu3 %v5577_v39  ;;  %v5258_v4 = vld [vmem:[%s11498_s3 + $0x90] sm:$0xf0]  ;;  %v7310_v5 = vld [vmem:[%s11498_s3 + $0x184] sm:$0xf]  ;;  %v5661_v7 = vor.u32 %v7378_v62, %v5658_v63 }
  0x3c   : > { %1330 = vmatpush.bf16.msrb.mxu0 %v5309_v40  ;;  %v5386_v6 = vld [vmem:[%s11498_s3 + $0x190] sm:$0xf0]  ;;  %v7342_v8 = vld [vmem:[%s11498_s3 + $0x284] sm:$0xf]  ;;  %v5261_v13 = vor.u32 %v7278_v1, %v5258_v4  ;;  %v8371_v36 = vpack.c.b16 %v628_v26, %v628_v26  ;;  %v8375_v38 = vpack.c.b16 %v629_v28, %v629_v28  ;;  %v5552_v26 = vld [vmem:[%s11498_s3 + $0x2c8] sm:$0xf] }
  0x3d   : > { %1343 = vmatpush.bf16.msrb.mxu1 %v5437_v41  ;;  %v5514_v9 = vld [vmem:[%s11498_s3 + $0x290] sm:$0xf0]  ;;  %v7374_v10 = vld [vmem:[%s11498_s3 + $0x384] sm:$0xf]  ;;  %v5389_v16 = vor.u32 %v7310_v5, %v5386_v6  ;;  %v5312_v6 = vld [vmem:[%s11498_s3 + $0xe8] sm:$0xf] }
  0x3e   : > { %1356 = vmatpush.bf16.msrb.mxu2 %v5565_v42  ;;  %v5642_v11 = vld [vmem:[%s11498_s3 + $0x390] sm:$0xf0]  ;;  %v7274_v12 = vld [vmem:[%s11498_s3 + $0x64] sm:$0xf]  ;;  %v5517_v17 = vor.u32 %v7342_v8, %v5514_v9  ;;  %1325 = vmatmul.bf16.vlgmr.msra.gmra.mxu3 %v8375_v38  ;;  %v5440_v8 = vld [vmem:[%s11498_s3 + $0x1e8] sm:$0xf] }
  0x3f   : > { %1369 = vmatpush.bf16.msrb.mxu3 %v5693_v46  ;;  %v5242_v14 = vld [vmem:[%s11498_s3 + $0x70] sm:$0xf0]  ;;  %v7306_v15 = vld [vmem:[%s11498_s3 + $0x164] sm:$0xf]  ;;  %v5645_v21 = vor.u32 %v7374_v10, %v5642_v11  ;;  %1312 = vmatmul.bf16.vlgmr.msra.gmra.mxu2 %v8371_v36  ;;  %v7325_v10 = vld [vmem:[%s11498_s3 + $0x1f4] sm:$0xf0] }
  0x40   : > { %1331 = vmatpush.bf16.msrb.mxu0 %v5293_v52  ;;  %v5370_v18 = vld [vmem:[%s11498_s3 + $0x170] sm:$0xf0]  ;;  %v7338_v19 = vld [vmem:[%s11498_s3 + $0x264] sm:$0xf]  ;;  %v5245_v30 = vor.u32 %v7274_v12, %v5242_v14  ;;  %v5568_v11 = vld [vmem:[%s11498_s3 + $0x2e8] sm:$0xf] }
  0x41   : > { %1344 = vmatpush.bf16.msrb.mxu1 %v5421_v53  ;;  %v5498_v20 = vld [vmem:[%s11498_s3 + $0x270] sm:$0xf0]  ;;  %v480_v23 = vld [vmem:[%s8352_s23] sm:$0xff]  ;;  %v5373_v31 = vor.u32 %v7306_v15, %v5370_v18  ;;  %v7357_v12 = vld [vmem:[%s11498_s3 + $0x2f4] sm:$0xf0] }
  0x42   : > { %1357 = vmatpush.bf16.msrb.mxu2 %v5549_v54  ;;  %v7370_v24 = vld [vmem:[%s11498_s3 + $0x364] sm:$0xf]  ;;  %v5626_v25 = vld [vmem:[%s11498_s3 + $0x370] sm:$0xf0]  ;;  %v626_v27 = vunpack.c.l.b16 %v480_v23  ;;  %v627_v29 = vunpack.c.h.b16 %v480_v23  ;;  %v5501_v32 = vor.u32 %v7338_v19, %v5498_v20  ;;  %v5696_v15 = vld [vmem:[%s11498_s3 + $0x3e8] sm:$0xf]  ;;  %v5441_v19 = vor.u32 %v7325_v10, %v5440_v8 }
  0x43   : > { %1370 = vmatpush.bf16.msrb.mxu3 %v5677_v58  ;;  %v7270_v33 = vld [vmem:[%s11498_s3 + $0x44] sm:$0xf]  ;;  %v5226_v34 = vld [vmem:[%s11498_s3 + $0x50] sm:$0xf0]  ;;  %v5629_v39 = vor.u32 %v7370_v24, %v5626_v25  ;;  %v5569_v20 = vor.u32 %v7357_v12, %v5568_v11  ;;  %v5424_v23 = vld [vmem:[%s11498_s3 + $0x1c8] sm:$0xf] }
  0x44   : > { %1332 = vmatpush.bf16.msrb.mxu0 %v5277_v0  ;;  %v7302_v35 = vld [vmem:[%s11498_s3 + $0x144] sm:$0xf]  ;;  %v8373_v37 = vpack.c.b16 %v626_v27, %v626_v27  ;;  %v5354_v40 = vld [vmem:[%s11498_s3 + $0x150] sm:$0xf0]  ;;  %v8386_v43 = vpack.c.b16 %v627_v29, %v627_v29  ;;  %v5229_v46 = vor.u32 %v7270_v33, %v5226_v34  ;;  %v7321_v25 = vld [vmem:[%s11498_s3 + $0x1d4] sm:$0xf0] }
  0x45   : > { %1345 = vmatpush.bf16.msrb.mxu1 %v5405_v2  ;;  %v7334_v41 = vld [vmem:[%s11498_s3 + $0x244] sm:$0xf]  ;;  %v5482_v42 = vld [vmem:[%s11498_s3 + $0x250] sm:$0xf0]  ;;  %v5357_v47 = vor.u32 %v7302_v35, %v5354_v40  ;;  %v7353_v27 = vld [vmem:[%s11498_s3 + $0x2d4] sm:$0xf0] }
  0x46   : > { %1358 = vmatpush.bf16.msrb.mxu2 %v5533_v3  ;;  %v7366_v44 = vld [vmem:[%s11498_s3 + $0x344] sm:$0xf]  ;;  %v5610_v45 = vld [vmem:[%s11498_s3 + $0x350] sm:$0xf0]  ;;  %1286 = vmatmul.bf16.vlgmr.msra.gmra.mxu0 %v8373_v37  ;;  %v5485_v48 = vor.u32 %v7334_v41, %v5482_v42  ;;  %v5680_v28 = vld [vmem:[%s11498_s3 + $0x3c8] sm:$0xf] }
  0x47   : > { %1371 = vmatpush.bf16.msrb.mxu3 %v5661_v7  ;;  %v7266_v49 = vld [vmem:[%s11498_s3 + $0x24] sm:$0xf]  ;;  %v5210_v50 = vld [vmem:[%s11498_s3 + $0x30] sm:$0xf0]  ;;  %v5613_v52 = vor.u32 %v7366_v44, %v5610_v45  ;;  %1299 = vmatmul.bf16.vlgmr.msra.gmra.mxu1 %v8386_v43  ;;  %v7293_v7 = vld [vmem:[%s11498_s3 + $0xf4] sm:$0xf0] }
  0x48   : > { %1333 = vmatpush.bf16.msrb.mxu0 %v5261_v13  ;;  %v7298_v51 = vld [vmem:[%s11498_s3 + $0x124] sm:$0xf]  ;;  %v5338_v53 = vld [vmem:[%s11498_s3 + $0x130] sm:$0xf0]  ;;  %v5213_v58 = vor.u32 %v7266_v49, %v5210_v50  ;;  %v5313_v18 = vor.u32 %v7293_v7, %v5312_v6  ;;  %v7385_v29 = vld [vmem:[%s11498_s3 + $0x3d4] sm:$0xf0] }
  0x49   : > { %1346 = vmatpush.bf16.msrb.mxu1 %v5389_v16  ;;  %v7330_v54 = vld [vmem:[%s11498_s3 + $0x224] sm:$0xf]  ;;  %v5466_v55 = vld [vmem:[%s11498_s3 + $0x230] sm:$0xf0]  ;;  %v5341_v61 = vor.u32 %v7298_v51, %v5338_v53  ;;  %v7389_v16 = vld [vmem:[%s11498_s3 + $0x3f4] sm:$0xf0] }
  0x4a   : > { %1359 = vmatpush.bf16.msrb.mxu2 %v5517_v17  ;;  %v7362_v56 = vld [vmem:[%s11498_s3 + $0x324] sm:$0xf]  ;;  %v5594_v57 = vld [vmem:[%s11498_s3 + $0x330] sm:$0xf0]  ;;  %v5469_v62 = vor.u32 %v7330_v54, %v5466_v55  ;;  %v5697_v24 = vor.u32 %v7389_v16, %v5696_v15  ;;  %v5280_v33 = vld [vmem:[%s11498_s3 + $0xa8] sm:$0xf] }
  0x4b   : > { %1372 = vmatpush.bf16.msrb.mxu3 %v5645_v21  ;;  %v7262_v59 = vld [vmem:[%s11498_s3 + $0x4] sm:$0xf]  ;;  %v5194_v60 = vld [vmem:[%s11498_s3 + $0x10] sm:$0xf0]  ;;  %v5597_v2 = vor.u32 %v7362_v56, %v5594_v57  ;;  %v5296_v21 = vld [vmem:[%s11498_s3 + $0xc8] sm:$0xf] }
  0x4c   : > { %1334 = vmatpush.bf16.msrb.mxu0 %v5245_v30  ;;  %v7294_v63 = vld [vmem:[%s11498_s3 + $0x104] sm:$0xf]  ;;  %v5322_v0 = vld [vmem:[%s11498_s3 + $0x110] sm:$0xf0]  ;;  %v5197_v9 = vor.u32 %v7262_v59, %v5194_v60  ;;  %v5297_v30 = vor.u32 %v7289_v22, %v5296_v21  ;;  %v7285_v34 = vld [vmem:[%s11498_s3 + $0xb4] sm:$0xf0] }
  0x4d   : > { %1347 = vmatpush.bf16.msrb.mxu1 %v5373_v31  ;;  %v7326_v1 = vld [vmem:[%s11498_s3 + $0x204] sm:$0xf]  ;;  %v5450_v3 = vld [vmem:[%s11498_s3 + $0x210] sm:$0xf0]  ;;  %v5325_v13 = vor.u32 %v7294_v63, %v5322_v0  ;;  %v5425_v31 = vor.u32 %v7321_v25, %v5424_v23  ;;  %v5408_v35 = vld [vmem:[%s11498_s3 + $0x1a8] sm:$0xf] }
  0x4e   : > { %1360 = vmatpush.bf16.msrb.mxu2 %v5501_v32  ;;  %v7358_v4 = vld [vmem:[%s11498_s3 + $0x304] sm:$0xf]  ;;  %v5578_v5 = vld [vmem:[%s11498_s3 + $0x310] sm:$0xf0]  ;;  %v5453_v14 = vor.u32 %v7326_v1, %v5450_v3  ;;  %v5553_v32 = vor.u32 %v7353_v27, %v5552_v26  ;;  %v7317_v40 = vld [vmem:[%s11498_s3 + $0x1b4] sm:$0xf0] }
  0x4f   : > { %1373 = vmatpush.bf16.msrb.mxu3 %v5629_v39  ;;  %v5581_v17 = vor.u32 %v7358_v4, %v5578_v5  ;;  %v5681_v39 = vor.u32 %v7385_v29, %v5680_v28  ;;  %v5536_v41 = vld [vmem:[%s11498_s3 + $0x2a8] sm:$0xf]  ;;  %v7349_v42 = vld [vmem:[%s11498_s3 + $0x2b4] sm:$0xf0] }
  0x50   : > { %1335 = vmatpush.bf16.msrb.mxu0 %v5229_v46  ;;  %v5664_v44 = vld [vmem:[%s11498_s3 + $0x3a8] sm:$0xf]  ;;  %v7381_v45 = vld [vmem:[%s11498_s3 + $0x3b4] sm:$0xf0]  ;;  %v5281_v46 = vor.u32 %v7285_v34, %v5280_v33 }
  0x51   : > { %1348 = vmatpush.bf16.msrb.mxu1 %v5357_v47  ;;  %v5409_v47 = vor.u32 %v7317_v40, %v5408_v35  ;;  %v5264_v49 = vld [vmem:[%s11498_s3 + $0x88] sm:$0xf]  ;;  %v7281_v50 = vld [vmem:[%s11498_s3 + $0x94] sm:$0xf0] }
  0x52   : > { %1361 = vmatpush.bf16.msrb.mxu2 %v5485_v48  ;;  %v5537_v48 = vor.u32 %v7349_v42, %v5536_v41  ;;  %v5392_v51 = vld [vmem:[%s11498_s3 + $0x188] sm:$0xf]  ;;  %v7313_v53 = vld [vmem:[%s11498_s3 + $0x194] sm:$0xf0] }
  0x53   : > { %1374 = vmatpush.bf16.msrb.mxu3 %v5613_v52  ;;  %v5665_v52 = vor.u32 %v7381_v45, %v5664_v44  ;;  %v5520_v54 = vld [vmem:[%s11498_s3 + $0x288] sm:$0xf]  ;;  %v7345_v55 = vld [vmem:[%s11498_s3 + $0x294] sm:$0xf0]  ;;  %v5393_v59 = vor.u32 %v7313_v53, %v5392_v51  ;;  %v7355_v51 = vld [vmem:[%s11498_s3 + $0x2ec] sm:$0xf] }
  0x54   : > { %1336 = vmatpush.bf16.msrb.mxu0 %v5213_v58  ;;  %v5648_v56 = vld [vmem:[%s11498_s3 + $0x388] sm:$0xf]  ;;  %v7377_v57 = vld [vmem:[%s11498_s3 + $0x394] sm:$0xf0]  ;;  %v5265_v58 = vor.u32 %v7281_v50, %v5264_v49  ;;  %v5521_v60 = vor.u32 %v7345_v55, %v5520_v54  ;;  %v5442_v50 = vld [vmem:[%s11498_s3 + $0x1f8] sm:$0xf0] }
  0x55   : > { %1349 = vmatpush.bf16.msrb.mxu1 %v5341_v61  ;;  %v5248_v61 = vld [vmem:[%s11498_s3 + $0x68] sm:$0xf]  ;;  %v5649_v0 = vor.u32 %v7377_v57, %v5648_v56  ;;  %v7309_v1 = vld [vmem:[%s11498_s3 + $0x174] sm:$0xf0]  ;;  %v7387_v55 = vld [vmem:[%s11498_s3 + $0x3ec] sm:$0xf] }
  0x56   : > { %1362 = vmatpush.bf16.msrb.mxu2 %v5469_v62  ;;  %v7277_v62 = vld [vmem:[%s11498_s3 + $0x74] sm:$0xf0]  ;;  %v5376_v63 = vld [vmem:[%s11498_s3 + $0x168] sm:$0xf]  ;;  %v5698_v56 = vld [vmem:[%s11498_s3 + $0x3f8] sm:$0xf0] }
  0x57   : > { %1375 = vmatpush.bf16.msrb.mxu3 %v5597_v2  ;;  %v5504_v2 = vld [vmem:[%s11498_s3 + $0x268] sm:$0xf]  ;;  %v7341_v3 = vld [vmem:[%s11498_s3 + $0x274] sm:$0xf0]  ;;  %v5249_v6 = vor.u32 %v7277_v62, %v5248_v61  ;;  %v5377_v7 = vor.u32 %v7309_v1, %v5376_v63  ;;  %v7287_v61 = vld [vmem:[%s11498_s3 + $0xcc] sm:$0xf] }
  0x58   : > { %1337 = vmatpush.bf16.msrb.mxu0 %v5197_v9  ;;  %v5632_v4 = vld [vmem:[%s11498_s3 + $0x368] sm:$0xf]  ;;  %v7373_v5 = vld [vmem:[%s11498_s3 + $0x374] sm:$0xf0]  ;;  %v5505_v8 = vor.u32 %v7341_v3, %v5504_v2  ;;  %v5298_v62 = vld [vmem:[%s11498_s3 + $0xd8] sm:$0xf0] }
  0x59   : > { %1350 = vmatpush.bf16.msrb.mxu1 %v5325_v13  ;;  %v5232_v9 = vld [vmem:[%s11498_s3 + $0x48] sm:$0xf]  ;;  %v7273_v10 = vld [vmem:[%s11498_s3 + $0x54] sm:$0xf0]  ;;  %v5633_v12 = vor.u32 %v7373_v5, %v5632_v4  ;;  %v7319_v63 = vld [vmem:[%s11498_s3 + $0x1cc] sm:$0xf] }
  0x5a   : > { %1363 = vmatpush.bf16.msrb.mxu2 %v5453_v14  ;;  %v5360_v11 = vld [vmem:[%s11498_s3 + $0x148] sm:$0xf]  ;;  %v7305_v13 = vld [vmem:[%s11498_s3 + $0x154] sm:$0xf0]  ;;  %v5426_v1 = vld [vmem:[%s11498_s3 + $0x1d8] sm:$0xf0] }
  0x5b   : > { %1376 = vmatpush.bf16.msrb.mxu3 %v5581_v17  ;;  %1338 = vmatmul.bf16.vlgmr.msrb.gmra.mxu0 %v8373_v37  ;;  %v5488_v14 = vld [vmem:[%s11498_s3 + $0x248] sm:$0xf]  ;;  %v7337_v15 = vld [vmem:[%s11498_s3 + $0x254] sm:$0xf0]  ;;  %v7351_v2 = vld [vmem:[%s11498_s3 + $0x2cc] sm:$0xf] }
  0x5c   : > { %1382 = vmatpush.bf16.msra.mxu0 %v5313_v18  ;;  %1351 = vmatmul.bf16.vlgmr.msrb.gmra.mxu1 %v8386_v43  ;;  %v5616_v16 = vld [vmem:[%s11498_s3 + $0x348] sm:$0xf]  ;;  %v7369_v17 = vld [vmem:[%s11498_s3 + $0x354] sm:$0xf0]  ;;  %v5233_v18 = vor.u32 %v7273_v10, %v5232_v9  ;;  %v5554_v3 = vld [vmem:[%s11498_s3 + $0x2d8] sm:$0xf0] }
  0x5d   : > { %1395 = vmatpush.bf16.msra.mxu1 %v5441_v19  ;;  %1364 = vmatmul.bf16.vlgmr.msrb.gmra.mxu2 %v8371_v36  ;;  %v5361_v19 = vor.u32 %v7305_v13, %v5360_v11  ;;  %v5216_v21 = vld [vmem:[%s11498_s3 + $0x28] sm:$0xf]  ;;  %v7269_v22 = vld [vmem:[%s11498_s3 + $0x34] sm:$0xf0]  ;;  %v7383_v4 = vld [vmem:[%s11498_s3 + $0x3cc] sm:$0xf] }
  0x5e   : > { %1408 = vmatpush.bf16.msra.mxu2 %v5569_v20  ;;  %1377 = vmatmul.bf16.vlgmr.msrb.gmra.mxu3 %v8375_v38  ;;  %v5489_v20 = vor.u32 %v7337_v15, %v5488_v14  ;;  %v5344_v23 = vld [vmem:[%s11498_s3 + $0x128] sm:$0xf]  ;;  %v7301_v25 = vld [vmem:[%s11498_s3 + $0x134] sm:$0xf0]  ;;  %v5682_v5 = vld [vmem:[%s11498_s3 + $0x3d8] sm:$0xf0] }
  0x5f   : > { %1421 = vmatpush.bf16.msra.mxu3 %v5697_v24  ;;  %v5617_v24 = vor.u32 %v7369_v17, %v5616_v16  ;;  %v5472_v26 = vld [vmem:[%s11498_s3 + $0x228] sm:$0xf]  ;;  %v7333_v27 = vld [vmem:[%s11498_s3 + $0x234] sm:$0xf0]  ;;  %v5345_v33 = vor.u32 %v7301_v25, %v5344_v23  ;;  %v7283_v9 = vld [vmem:[%s11498_s3 + $0xac] sm:$0xf] }
  0x60   : > { %1383 = vmatpush.bf16.msra.mxu0 %v5297_v30  ;;  %v5600_v28 = vld [vmem:[%s11498_s3 + $0x328] sm:$0xf]  ;;  %v7365_v29 = vld [vmem:[%s11498_s3 + $0x334] sm:$0xf0]  ;;  %v5217_v30 = vor.u32 %v7269_v22, %v5216_v21  ;;  %v5473_v34 = vor.u32 %v7333_v27, %v5472_v26  ;;  %v5282_v10 = vld [vmem:[%s11498_s3 + $0xb8] sm:$0xf0] }
  0x61   : > { %1396 = vmatpush.bf16.msra.mxu1 %v5425_v31  ;;  %v5200_v31 = vld [vmem:[%s11498_s3 + $0x8] sm:$0xf]  ;;  %v5601_v41 = vor.u32 %v7365_v29, %v5600_v28  ;;  %v7329_v42 = vld [vmem:[%s11498_s3 + $0x214] sm:$0xf0]  ;;  %v7315_v11 = vld [vmem:[%s11498_s3 + $0x1ac] sm:$0xf] }
  0x62   : > { %1409 = vmatpush.bf16.msra.mxu2 %v5553_v32  ;;  %v7265_v32 = vld [vmem:[%s11498_s3 + $0x14] sm:$0xf0]  ;;  %v5328_v35 = vld [vmem:[%s11498_s3 + $0x108] sm:$0xf]  ;;  %v5410_v13 = vld [vmem:[%s11498_s3 + $0x1b8] sm:$0xf0] }
  0x63   : > { %1422 = vmatpush.bf16.msra.mxu3 %v5681_v39  ;;  %v7297_v39 = vld [vmem:[%s11498_s3 + $0x114] sm:$0xf0]  ;;  %v5456_v40 = vld [vmem:[%s11498_s3 + $0x208] sm:$0xf]  ;;  %v5201_v49 = vor.u32 %v7265_v32, %v5200_v31  ;;  %v7347_v14 = vld [vmem:[%s11498_s3 + $0x2ac] sm:$0xf] }
  0x64   : > { %1384 = vmatpush.bf16.msra.mxu0 %v5281_v46  ;;  %v5584_v44 = vld [vmem:[%s11498_s3 + $0x308] sm:$0xf]  ;;  %v7361_v45 = vld [vmem:[%s11498_s3 + $0x314] sm:$0xf0]  ;;  %v7291_v46 = vld [vmem:[%s11498_s3 + $0xec] sm:$0xf]  ;;  %v5329_v53 = vor.u32 %v7297_v39, %v5328_v35  ;;  %v5457_v54 = vor.u32 %v7329_v42, %v5456_v40 }
  0x65   : > { %1397 = vmatpush.bf16.msra.mxu1 %v5409_v47  ;;  %v5314_v47 = vld [vmem:[%s11498_s3 + $0xf8] sm:$0xf0]  ;;  %v5585_v57 = vor.u32 %v7361_v45, %v5584_v44  ;;  %v7379_v16 = vld [vmem:[%s11498_s3 + $0x3ac] sm:$0xf] }
  0x66   : > { %1410 = vmatpush.bf16.msra.mxu2 %v5537_v48  ;;  %v7323_v48 = vld [vmem:[%s11498_s3 + $0x1ec] sm:$0xf]  ;;  %v5538_v15 = vld [vmem:[%s11498_s3 + $0x2b8] sm:$0xf0] }
  0x67   : > { %1423 = vmatpush.bf16.msra.mxu3 %v5665_v52  ;;  %v5570_v52 = vld [vmem:[%s11498_s3 + $0x2f8] sm:$0xf0]  ;;  %v7279_v21 = vld [vmem:[%s11498_s3 + $0x8c] sm:$0xf] }
  0x68   : > { %1385 = vmatpush.bf16.msra.mxu0 %v5265_v58  ;;  %v5317_v58 = vor.u32 %v7291_v46, %v5314_v47  ;;  %v5666_v17 = vld [vmem:[%s11498_s3 + $0x3b8] sm:$0xf0]  ;;  %v7311_v23 = vld [vmem:[%s11498_s3 + $0x18c] sm:$0xf] }
  0x69   : > { %1398 = vmatpush.bf16.msra.mxu1 %v5393_v59  ;;  %v5445_v59 = vor.u32 %v7323_v48, %v5442_v50  ;;  %v5266_v22 = vld [vmem:[%s11498_s3 + $0x98] sm:$0xf0]  ;;  %v7343_v26 = vld [vmem:[%s11498_s3 + $0x28c] sm:$0xf] }
  0x6a   : > { %1411 = vmatpush.bf16.msra.mxu2 %v5521_v60  ;;  %v5573_v60 = vor.u32 %v7355_v51, %v5570_v52  ;;  %v5394_v25 = vld [vmem:[%s11498_s3 + $0x198] sm:$0xf0]  ;;  %v7375_v28 = vld [vmem:[%s11498_s3 + $0x38c] sm:$0xf] }
  0x6b   : > { %1424 = vmatpush.bf16.msra.mxu3 %v5649_v0  ;;  %v5701_v0 = vor.u32 %v7387_v55, %v5698_v56  ;;  %v5522_v27 = vld [vmem:[%s11498_s3 + $0x298] sm:$0xf0]  ;;  %v5397_v31 = vor.u32 %v7311_v23, %v5394_v25  ;;  %v7307_v35 = vld [vmem:[%s11498_s3 + $0x16c] sm:$0xf]  ;;  %v6072_v23 = vld [vmem:[%s11475_s5 + $0x2e0] sm:$0xf] }
  0x6c   : > { %1386 = vmatpush.bf16.msra.mxu0 %v5249_v6  ;;  %v5301_v6 = vor.u32 %v7287_v61, %v5298_v62  ;;  %v5650_v29 = vld [vmem:[%s11498_s3 + $0x398] sm:$0xf0]  ;;  %v5525_v32 = vor.u32 %v7343_v26, %v5522_v27  ;;  %v7371_v44 = vld [vmem:[%s11498_s3 + $0x36c] sm:$0xf]  ;;  %v6200_v27 = vld [vmem:[%s11475_s5 + $0x3e0] sm:$0xf] }
  0x6d   : > { %1399 = vmatpush.bf16.msra.mxu1 %v5377_v7  ;;  %v5429_v7 = vor.u32 %v7319_v63, %v5426_v1  ;;  %v5653_v39 = vor.u32 %v7375_v28, %v5650_v29  ;;  %v5378_v40 = vld [vmem:[%s11498_s3 + $0x178] sm:$0xf0]  ;;  %v7303_v51 = vld [vmem:[%s11498_s3 + $0x14c] sm:$0xf]  ;;  %v7516_v28 = vld [vmem:[%s11475_s5 + $0x3ec] sm:$0xf0] }
  0x6e   : > { %1412 = vmatpush.bf16.msra.mxu2 %v5505_v8  ;;  %v5557_v8 = vor.u32 %v7351_v2, %v5554_v3  ;;  %v5506_v42 = vld [vmem:[%s11498_s3 + $0x278] sm:$0xf0]  ;;  %v5381_v47 = vor.u32 %v7307_v35, %v5378_v40  ;;  %v7367_v56 = vld [vmem:[%s11498_s3 + $0x34c] sm:$0xf]  ;;  %v5928_v35 = vld [vmem:[%s11475_s5 + $0x1c0] sm:$0xf] }
  0x6f   : > { %1425 = vmatpush.bf16.msra.mxu3 %v5633_v12  ;;  %v5685_v12 = vor.u32 %v7383_v4, %v5682_v5  ;;  %v5634_v45 = vld [vmem:[%s11498_s3 + $0x378] sm:$0xf0]  ;;  %v7267_v61 = vld [vmem:[%s11498_s3 + $0x2c] sm:$0xf]  ;;  %v7448_v40 = vld [vmem:[%s11475_s5 + $0x1cc] sm:$0xf0] }
  0x70   : > { %1387 = vmatpush.bf16.msra.mxu0 %v5233_v18  ;;  %v5285_v18 = vor.u32 %v7283_v9, %v5282_v10  ;;  %v5234_v50 = vld [vmem:[%s11498_s3 + $0x58] sm:$0xf0]  ;;  %v5637_v52 = vor.u32 %v7371_v44, %v5634_v45  ;;  %v7299_v63 = vld [vmem:[%s11498_s3 + $0x12c] sm:$0xf]  ;;  %v6184_v44 = vld [vmem:[%s11475_s5 + $0x3c0] sm:$0xf] }
  0x71   : > { %1400 = vmatpush.bf16.msra.mxu1 %v5361_v19  ;;  %v5413_v19 = vor.u32 %v7315_v11, %v5410_v13  ;;  %v5490_v55 = vld [vmem:[%s11498_s3 + $0x258] sm:$0xf0]  ;;  %v7331_v2 = vld [vmem:[%s11498_s3 + $0x22c] sm:$0xf]  ;;  %v7512_v45 = vld [vmem:[%s11475_s5 + $0x3cc] sm:$0xf0] }
  0x72   : > { %1413 = vmatpush.bf16.msra.mxu2 %v5489_v20  ;;  %v5541_v20 = vor.u32 %v7347_v14, %v5538_v15  ;;  %v5218_v62 = vld [vmem:[%s11498_s3 + $0x38] sm:$0xf0]  ;;  %v7363_v4 = vld [vmem:[%s11498_s3 + $0x32c] sm:$0xf] }
  0x73   : > { %1426 = vmatpush.bf16.msra.mxu3 %v5617_v24  ;;  %v5669_v24 = vor.u32 %v7379_v16, %v5666_v17  ;;  %v5346_v1 = vld [vmem:[%s11498_s3 + $0x138] sm:$0xf0]  ;;  %v7295_v11 = vld [vmem:[%s11498_s3 + $0x10c] sm:$0xf] }
  0x74   : > { %1388 = vmatpush.bf16.msra.mxu0 %v5217_v30  ;;  %v5269_v30 = vor.u32 %v7279_v21, %v5266_v22  ;;  %v5474_v3 = vld [vmem:[%s11498_s3 + $0x238] sm:$0xf0]  ;;  %v5349_v9 = vor.u32 %v7299_v63, %v5346_v1  ;;  %v7327_v13 = vld [vmem:[%s11498_s3 + $0x20c] sm:$0xf]  ;;  %v7452_v22 = vld [vmem:[%s11475_s5 + $0x1ec] sm:$0xf0] }
  0x75   : > { %1401 = vmatpush.bf16.msra.mxu1 %v5345_v33  ;;  %v7275_v33 = vld [vmem:[%s11498_s3 + $0x6c] sm:$0xf]  ;;  %v5602_v5 = vld [vmem:[%s11498_s3 + $0x338] sm:$0xf0]  ;;  %v5477_v10 = vor.u32 %v7331_v2, %v5474_v3  ;;  %v7472_v63 = vld [vmem:[%s11475_s5 + $0x28c] sm:$0xf0] }
  0x76   : > { %1414 = vmatpush.bf16.msra.mxu2 %v5473_v34  ;;  %v5250_v34 = vld [vmem:[%s11498_s3 + $0x78] sm:$0xf0]  ;;  %v5605_v14 = vor.u32 %v7363_v4, %v5602_v5  ;;  %v7359_v16 = vld [vmem:[%s11498_s3 + $0x30c] sm:$0xf]  ;;  %v7504_v1 = vld [vmem:[%s11475_s5 + $0x38c] sm:$0xf0] }
  0x77   : > { %1427 = vmatpush.bf16.msra.mxu3 %v5601_v41  ;;  %v7339_v41 = vld [vmem:[%s11498_s3 + $0x26c] sm:$0xf]  ;;  %v5253_v46 = vor.u32 %v7275_v33, %v5250_v34  ;;  %v5458_v15 = vld [vmem:[%s11498_s3 + $0x218] sm:$0xf0]  ;;  %v5800_v33 = vld [vmem:[%s11475_s5 + $0xc0] sm:$0xf] }
  0x78   : > { %1389 = vmatpush.bf16.msra.mxu0 %v5201_v49  ;;  %v5509_v48 = vor.u32 %v7339_v41, %v5506_v42  ;;  %v7271_v49 = vld [vmem:[%s11498_s3 + $0x4c] sm:$0xf]  ;;  %v5586_v17 = vld [vmem:[%s11498_s3 + $0x318] sm:$0xf0]  ;;  %v5461_v26 = vor.u32 %v7327_v13, %v5458_v15  ;;  %v7416_v34 = vld [vmem:[%s11475_s5 + $0xcc] sm:$0xf0] }
  0x79   : > { %1402 = vmatpush.bf16.msra.mxu1 %v5329_v53  ;;  %v5362_v53 = vld [vmem:[%s11498_s3 + $0x158] sm:$0xf0]  ;;  %v5589_v29 = vor.u32 %v7359_v16, %v5586_v17  ;;  %v6056_v41 = vld [vmem:[%s11475_s5 + $0x2c0] sm:$0xf]  ;;  %v7480_v42 = vld [vmem:[%s11475_s5 + $0x2cc] sm:$0xf0] }
  0x7a   : > { %1415 = vmatpush.bf16.msra.mxu2 %v5457_v54  ;;  %v7335_v54 = vld [vmem:[%s11498_s3 + $0x24c] sm:$0xf]  ;;  %v5752_v5 = vld [vmem:[%s11475_s5 + $0x60] sm:$0xf]  ;;  %v7500_v13 = vld [vmem:[%s11475_s5 + $0x36c] sm:$0xf0] }
  0x7b   : > { %1428 = vmatpush.bf16.msra.mxu3 %v5585_v57  ;;  %1390 = vmatmul.bf16.vlgmr.msra.gmra.mxu0 %v8373_v37  ;;  %v5618_v57 = vld [vmem:[%s11498_s3 + $0x358] sm:$0xf0]  ;;  %v5736_v17 = vld [vmem:[%s11475_s5 + $0x40] sm:$0xf] }
  0x7c   : > { %1434 = vmatpush.bf16.msrb.mxu0 %v5317_v58  ;;  %1403 = vmatmul.bf16.vlgmr.msra.gmra.mxu1 %v8386_v43  ;;  %v5237_v58 = vor.u32 %v7271_v49, %v5234_v50  ;;  %v5784_v49 = vld [vmem:[%s11475_s5 + $0xa0] sm:$0xf]  ;;  %v7412_v50 = vld [vmem:[%s11475_s5 + $0xac] sm:$0xf0] }
  0x7d   : > { %1447 = vmatpush.bf16.msrb.mxu1 %v5445_v59  ;;  %1416 = vmatmul.bf16.vlgmr.msra.gmra.mxu2 %v8371_v36  ;;  %v5365_v59 = vor.u32 %v7303_v51, %v5362_v53  ;;  %v5912_v51 = vld [vmem:[%s11475_s5 + $0x1a0] sm:$0xf]  ;;  %v7444_v53 = vld [vmem:[%s11475_s5 + $0x1ac] sm:$0xf0] }
  0x7e   : > { %1460 = vmatpush.bf16.msrb.mxu2 %v5573_v60  ;;  %1429 = vmatmul.bf16.vlgmr.msra.gmra.mxu3 %v8375_v38  ;;  %v5493_v60 = vor.u32 %v7335_v54, %v5490_v55  ;;  %v6040_v54 = vld [vmem:[%s11475_s5 + $0x2a0] sm:$0xf]  ;;  %v7476_v55 = vld [vmem:[%s11475_s5 + $0x2ac] sm:$0xf0] }
  0x7f   : > { %1473 = vmatpush.bf16.msrb.mxu3 %v5701_v0  ;;  %v5621_v0 = vor.u32 %v7367_v56, %v5618_v57  ;;  %v6168_v56 = vld [vmem:[%s11475_s5 + $0x3a0] sm:$0xf]  ;;  %v7508_v57 = vld [vmem:[%s11475_s5 + $0x3ac] sm:$0xf0] }
  0x80   : > { %1435 = vmatpush.bf16.msrb.mxu0 %v5301_v6  ;;  %v5221_v6 = vor.u32 %v7267_v61, %v5218_v62  ;;  %v7408_v61 = vld [vmem:[%s11475_s5 + $0x8c] sm:$0xf0]  ;;  %v6024_v62 = vld [vmem:[%s11475_s5 + $0x280] sm:$0xf] }
  0x81   : > { %1448 = vmatpush.bf16.msrb.mxu1 %v5429_v7  ;;  %v7263_v7 = vld [vmem:[%s11498_s3 + $0xc] sm:$0xf]  ;;  %v6025_v4 = vor.u32 %v7472_v63, %v6024_v62  ;;  %v7514_v62 = vld [vmem:[%s11475_s5 + $0x3e4] sm:$0xf]  ;;  %v6202_v63 = vld [vmem:[%s11475_s5 + $0x3f0] sm:$0xf0] }
  0x82   : > { %1461 = vmatpush.bf16.msrb.mxu2 %v5557_v8  ;;  %v5202_v8 = vld [vmem:[%s11498_s3 + $0x18] sm:$0xf0] }
  0x83   : > { %1474 = vmatpush.bf16.msrb.mxu3 %v5685_v12  ;;  %v5330_v12 = vld [vmem:[%s11498_s3 + $0x118] sm:$0xf0]  ;;  %v5205_v21 = vor.u32 %v7263_v7, %v5202_v8  ;;  %v5880_v7 = vld [vmem:[%s11475_s5 + $0x160] sm:$0xf]  ;;  %s5091_s3 = scalar_lea.hbm %s11483_s13, %s7774_s17 }
  0x84   : > { %1436 = vmatpush.bf16.msrb.mxu0 %v5285_v18  ;;  %v5816_v18 = vld [vmem:[%s11475_s5 + $0xe0] sm:$0xf]  ;;  %v5333_v25 = vor.u32 %v7295_v11, %v5330_v12  ;;  %v7468_v11 = vld [vmem:[%s11475_s5 + $0x26c] sm:$0xf0]  ;;  %s5095_s22 = sshll.u32 %s5091_s3, 4  ;;  %s5096_s22 = int_to_ptr.hbm [resolvable:$true] %s5095_s22 }
  0x85   : > { %1449 = vmatpush.bf16.msrb.mxu1 %v5413_v19  ;;  %v7420_v19 = vld [vmem:[%s11475_s5 + $0xec] sm:$0xf0]  ;;  %v6136_v12 = vld [vmem:[%s11475_s5 + $0x360] sm:$0xf] }
  0x86   : > { %1462 = vmatpush.bf16.msrb.mxu2 %v5541_v20  ;;  %v5944_v20 = vld [vmem:[%s11475_s5 + $0x1e0] sm:$0xf] }
  0x87   : > { %1475 = vmatpush.bf16.msrb.mxu3 %v5669_v24  ;;  %v7484_v24 = vld [vmem:[%s11475_s5 + $0x2ec] sm:$0xf0] }
  0x88   : > { %1437 = vmatpush.bf16.msrb.mxu0 %v5269_v30  ;;  %v5817_v30 = vor.u32 %v7420_v19, %v5816_v18  ;;  %v7400_v18 = vld [vmem:[%s11475_s5 + $0x4c] sm:$0xf0]  ;;  %v5864_v19 = vld [vmem:[%s11475_s5 + $0x140] sm:$0xf] }
  0x89   : > { %1450 = vmatpush.bf16.msrb.mxu1 %v5397_v31  ;;  %v5945_v31 = vor.u32 %v7452_v22, %v5944_v20  ;;  %v6137_v20 = vor.u32 %v7500_v13, %v6136_v12  ;;  %v5992_v22 = vld [vmem:[%s11475_s5 + $0x240] sm:$0xf]  ;;  %v5930_v12 = vld [vmem:[%s11475_s5 + $0x1d0] sm:$0xf0]  ;;  %v7478_v13 = vld [vmem:[%s11475_s5 + $0x2c4] sm:$0xf] }
  0x8a   : > { %1463 = vmatpush.bf16.msrb.mxu2 %v5525_v32  ;;  %v6073_v32 = vor.u32 %v7484_v24, %v6072_v23  ;;  %v7464_v23 = vld [vmem:[%s11475_s5 + $0x24c] sm:$0xf0]  ;;  %v6120_v24 = vld [vmem:[%s11475_s5 + $0x340] sm:$0xf] }
  0x8b   : > { %1476 = vmatpush.bf16.msrb.mxu3 %v5653_v39  ;;  %v6201_v39 = vor.u32 %v7516_v28, %v6200_v27  ;;  %v5993_v28 = vor.u32 %v7464_v23, %v5992_v22  ;;  %v7410_v23 = vld [vmem:[%s11475_s5 + $0xa4] sm:$0xf] }
  0x8c   : > { %1438 = vmatpush.bf16.msrb.mxu0 %v5253_v46  ;;  %v5801_v46 = vor.u32 %v7416_v34, %v5800_v33  ;;  %v7428_v33 = vld [vmem:[%s11475_s5 + $0x12c] sm:$0xf0]  ;;  %v5976_v34 = vld [vmem:[%s11475_s5 + $0x220] sm:$0xf] }
  0x8d   : > { %1451 = vmatpush.bf16.msrb.mxu1 %v5381_v47  ;;  %v5929_v47 = vor.u32 %v7448_v40, %v5928_v35  ;;  %v7460_v35 = vld [vmem:[%s11475_s5 + $0x22c] sm:$0xf0] }
  0x8e   : > { %1464 = vmatpush.bf16.msrb.mxu2 %v5509_v48  ;;  %v6057_v48 = vor.u32 %v7480_v42, %v6056_v41  ;;  %v7492_v40 = vld [vmem:[%s11475_s5 + $0x32c] sm:$0xf0]  ;;  %v5704_v41 = vld [vmem:[%s11475_s5] sm:$0xf] }
  0x8f   : > { %1477 = vmatpush.bf16.msrb.mxu3 %v5637_v52  ;;  %v6185_v52 = vor.u32 %v7512_v45, %v6184_v44  ;;  %v7392_v44 = vld [vmem:[%s11475_s5 + $0xc] sm:$0xf0]  ;;  %v5832_v45 = vld [vmem:[%s11475_s5 + $0x100] sm:$0xf] }
  0x90   : > { %1439 = vmatpush.bf16.msrb.mxu0 %v5237_v58  ;;  %v5785_v58 = vor.u32 %v7412_v50, %v5784_v49  ;;  %v5960_v49 = vld [vmem:[%s11475_s5 + $0x200] sm:$0xf]  ;;  %v7456_v50 = vld [vmem:[%s11475_s5 + $0x20c] sm:$0xf0] }
  0x91   : > { %1452 = vmatpush.bf16.msrb.mxu1 %v5365_v59  ;;  %v5913_v59 = vor.u32 %v7444_v53, %v5912_v51  ;;  %v483_v51 = vld [vmem:[%s473_s20 + $0x8] sm:$0xff]  ;;  %v6088_v53 = vld [vmem:[%s11475_s5 + $0x300] sm:$0xf] }
  0x92   : > { %1465 = vmatpush.bf16.msrb.mxu2 %v5493_v60  ;;  %v5768_v60 = vld [vmem:[%s11475_s5 + $0x80] sm:$0xf] }
  0x93   : > { %1478 = vmatpush.bf16.msrb.mxu3 %v5621_v0  ;;  %v6152_v0 = vld [vmem:[%s11475_s5 + $0x380] sm:$0xf]  ;;  %v5769_v2 = vor.u32 %v7408_v61, %v5768_v60  ;;  %v7482_v60 = vld [vmem:[%s11475_s5 + $0x2e4] sm:$0xf]  ;;  %v6074_v61 = vld [vmem:[%s11475_s5 + $0x2f0] sm:$0xf0] }
  0x94   : > { %1440 = vmatpush.bf16.msrb.mxu0 %v5221_v6  ;;  %v7404_v6 = vld [vmem:[%s11475_s5 + $0x6c] sm:$0xf0]  ;;  %v6153_v8 = vor.u32 %v7504_v1, %v6152_v0  ;;  %v1629_v1 = vunpack.c.h.b16 %v483_v51 }
  0x95   : > { %1453 = vmatpush.bf16.msrb.mxu1 %v5349_v9  ;;  %v7436_v9 = vld [vmem:[%s11475_s5 + $0x16c] sm:$0xf0] }
  0x96   : > { %1466 = vmatpush.bf16.msrb.mxu2 %v5477_v10  ;;  %v6008_v10 = vld [vmem:[%s11475_s5 + $0x260] sm:$0xf]  ;;  %v5881_v15 = vor.u32 %v7436_v9, %v5880_v7  ;;  %v7414_v7 = vld [vmem:[%s11475_s5 + $0xc4] sm:$0xf] }
  0x97   : > { %1479 = vmatpush.bf16.msrb.mxu3 %v5605_v14  ;;  %v5753_v14 = vor.u32 %v7404_v6, %v5752_v5  ;;  %v6009_v16 = vor.u32 %v7468_v11, %v6008_v10  ;;  %v6077_v6 = vor.u32 %v7482_v60, %v6074_v61  ;;  %v7446_v9 = vld [vmem:[%s11475_s5 + $0x1c4] sm:$0xf]  ;;  %v6205_v10 = vor.u32 %v7514_v62, %v6202_v63  ;;  %v5866_v62 = vld [vmem:[%s11475_s5 + $0x150] sm:$0xf0] }
  0x98   : > { %1441 = vmatpush.bf16.msrb.mxu0 %v5205_v21  ;;  %v7432_v21 = vld [vmem:[%s11475_s5 + $0x14c] sm:$0xf0]  ;;  %v7398_v60 = vld [vmem:[%s11475_s5 + $0x44] sm:$0xf] }
  0x99   : > { %1454 = vmatpush.bf16.msrb.mxu1 %v5333_v25  ;;  %v7496_v25 = vld [vmem:[%s11475_s5 + $0x34c] sm:$0xf0]  ;;  %v5865_v27 = vor.u32 %v7432_v21, %v5864_v19  ;;  %v5933_v21 = vor.u32 %v7446_v9, %v5930_v12  ;;  %v5722_v9 = vld [vmem:[%s11475_s5 + $0x30] sm:$0xf0] }
  0x9a   : > { %1467 = vmatpush.bf16.msrb.mxu2 %v5461_v26  ;;  %v5737_v26 = vor.u32 %v7400_v18, %v5736_v17  ;;  %v7510_v17 = vld [vmem:[%s11475_s5 + $0x3c4] sm:$0xf]  ;;  %v6186_v18 = vld [vmem:[%s11475_s5 + $0x3d0] sm:$0xf0] }
  0x9b   : > { %1480 = vmatpush.bf16.msrb.mxu3 %v5589_v29  ;;  %1442 = vmatmul.bf16.vlgmr.msrb.gmra.mxu0 %v8373_v37  ;;  %v5896_v37 = vld [vmem:[%s11475_s5 + $0x180] sm:$0xf] }
  0x9c   : > { %2278 = vmatpush.bf16.msra.mxu0 %v5817_v30  ;;  %1455 = vmatmul.bf16.vlgmr.msrb.gmra.mxu1 %v8386_v43  ;;  %v7440_v43 = vld [vmem:[%s11475_s5 + $0x18c] sm:$0xf0]  ;;  %v5720_v29 = vld [vmem:[%s11475_s5 + $0x20] sm:$0xf] }
  0x9d   : > { %2291 = vmatpush.bf16.msra.mxu1 %v5945_v31  ;;  %1468 = vmatmul.bf16.vlgmr.msrb.gmra.mxu2 %v8371_v36  ;;  %v6041_v36 = vor.u32 %v7476_v55, %v6040_v54  ;;  %v5897_v3 = vor.u32 %v7440_v43, %v5896_v37  ;;  %v7396_v30 = vld [vmem:[%s11475_s5 + $0x2c] sm:$0xf0]  ;;  %v5848_v31 = vld [vmem:[%s11475_s5 + $0x120] sm:$0xf]  ;;  %v1628_v37 = vunpack.c.l.b16 %v483_v51  ;;  %v5961_v43 = vor.u32 %v7456_v50, %v5960_v49  ;;  %v7402_v51 = vld [vmem:[%s11475_s5 + $0x64] sm:$0xf] }
  0x9e   : > { %2304 = vmatpush.bf16.msra.mxu2 %v6073_v32  ;;  %1481 = vmatmul.bf16.vlgmr.msrb.gmra.mxu3 %v8375_v38  ;;  %v6169_v38 = vor.u32 %v7508_v57, %v6168_v56  ;;  %v6121_v32 = vor.u32 %v7496_v25, %v6120_v24  ;;  %v5721_v42 = vor.u32 %v7396_v30, %v5720_v29  ;;  %v7488_v54 = vld [vmem:[%s11475_s5 + $0x30c] sm:$0xf0]  ;;  %v482_v55 = vld [vmem:[%s473_s20] sm:$0xff]  ;;  %v5818_v57 = vld [vmem:[%s11475_s5 + $0xf0] sm:$0xf0]  ;;  %s7868_s20 = sshra.s32 %s5096_s22, 4  ;;  %s7869_s20 = int_to_ptr.hbm [resolvable:$true] %s7868_s20 }
  0x9f   : > { %2317 = vmatpush.bf16.msra.mxu3 %v6201_v39  ;;  %v6104_v39 = vld [vmem:[%s11475_s5 + $0x320] sm:$0xf]  ;;  %v7418_v56 = vld [vmem:[%s11475_s5 + $0xe4] sm:$0xf]  ;;  %v1626_v0 = vunpack.c.l.b16 %v482_v55  ;;  %v9071_v11 = vpack.c.b16 %v1628_v37, %v1628_v37  ;;  %v5786_v24 = vld [vmem:[%s11475_s5 + $0xb0] sm:$0xf0]  ;;  %p7875_p0 = scmp.lt.s32.totalorder %s7869_s20, %s11483_s13 }
  0xa0   : > { %2279 = vmatpush.bf16.msra.mxu0 %v5801_v46  ;;  %v7424_v46 = vld [vmem:[%s11475_s5 + $0x10c] sm:$0xf0]  ;;  %v7442_v25 = vld [vmem:[%s11475_s5 + $0x1a4] sm:$0xf]  ;;  %v6042_v29 = vld [vmem:[%s11475_s5 + $0x2b0] sm:$0xf0] }
  0xa1   : > { %2292 = vmatpush.bf16.msra.mxu1 %v5929_v47  ;;  %v5849_v47 = vor.u32 %v7428_v33, %v5848_v31  ;;  %v7506_v30 = vld [vmem:[%s11475_s5 + $0x3a4] sm:$0xf]  ;;  %v6170_v31 = vld [vmem:[%s11475_s5 + $0x3b0] sm:$0xf0]  ;;  %s7870_s30 = scalar_lea.hbm %s7869_s20, 32 }
  0xa2   : > { %2305 = vmatpush.bf16.msra.mxu2 %v6057_v48  ;;  %v5977_v48 = vor.u32 %v7460_v35, %v5976_v34  ;;  %v7406_v35 = vld [vmem:[%s11475_s5 + $0x84] sm:$0xf]  ;;  %p7871_p11 = scmp.ne.s32.totalorder %s7869_s20, %s7870_s30  ;;  %p7876_p1 = scmp.lt.s32.totalorder %s7874_s25, %s7870_s30 }
  0xa3   : > { %2318 = vmatpush.bf16.msra.mxu3 %v6185_v52  ;;  %v6105_v52 = vor.u32 %v7492_v40, %v6104_v39  ;;  %v5770_v39 = vld [vmem:[%s11475_s5 + $0x90] sm:$0xf0]  ;;  %v7438_v40 = vld [vmem:[%s11475_s5 + $0x184] sm:$0xf] }
  0xa4   : > { %2280 = vmatpush.bf16.msra.mxu0 %v5785_v58  ;;  %v7450_v58 = vld [vmem:[%s11475_s5 + $0x1e4] sm:$0xf]  ;;  %p7872_p12 = pnand %p7871_p11, %p8028_p5  ;;  %p7877_p2 = por %p7876_p1, %p7875_p0 }
  0xa5   : > { %2293 = vmatpush.bf16.msra.mxu1 %v5913_v59  ;;  %v5705_v59 = vor.u32 %v7392_v44, %v5704_v41  ;;  %v6173_v41 = vor.u32 %v7506_v30, %v6170_v31  ;;  %v7470_v44 = vld [vmem:[%s11475_s5 + $0x284] sm:$0xf] }
  0xa6   : > { %2306 = vmatpush.bf16.msra.mxu2 %v6041_v36  ;;  %v5946_v36 = vld [vmem:[%s11475_s5 + $0x1f0] sm:$0xf0]  ;;  %v7454_v30 = vld [vmem:[%s11475_s5 + $0x204] sm:$0xf]  ;;  %p7873_p13 = pneg %p7872_p12 }
  0xa7   : > { %2319 = vmatpush.bf16.msra.mxu3 %v6169_v38  ;;  %v5833_v38 = vor.u32 %v7424_v46, %v5832_v45  ;;  %v5949_v5 = vor.u32 %v7450_v58, %v5946_v36  ;;  %v6026_v45 = vld [vmem:[%s11475_s5 + $0x290] sm:$0xf0]  ;;  %v7502_v46 = vld [vmem:[%s11475_s5 + $0x384] sm:$0xf] }
  0xa8   : > { %2281 = vmatpush.bf16.msra.mxu0 %v5769_v2  ;;  %v6089_v2 = vor.u32 %v7488_v54, %v6088_v53  ;;  %v6029_v50 = vor.u32 %v7470_v44, %v6026_v45  ;;  %v7434_v53 = vld [vmem:[%s11475_s5 + $0x164] sm:$0xf]  ;;  %v7453_v45 = vld [vmem:[%s11475_s5 + $0x1f4] sm:$0xf0]  ;;  %p7878_p3 = pnand %p7877_p2, %p7873_p13 }
  0xa9   : > { %2294 = vmatpush.bf16.msra.mxu1 %v5897_v3  ;;  %v5821_v3 = vor.u32 %v7418_v56, %v5818_v57  ;;  %v7466_v56 = vld [vmem:[%s11475_s5 + $0x264] sm:$0xf]  ;;  %v6010_v57 = vld [vmem:[%s11475_s5 + $0x270] sm:$0xf0] }
  0xaa   : > { %2307 = vmatpush.bf16.msra.mxu2 %v6025_v4  ;;  %v1627_v4 = vunpack.c.h.b16 %v482_v55  ;;  %v5882_v55 = vld [vmem:[%s11475_s5 + $0x170] sm:$0xf0]  ;;  %v7498_v58 = vld [vmem:[%s11475_s5 + $0x364] sm:$0xf]  ;;  %v6013_v37 = vor.u32 %v7466_v56, %v6010_v57 }
  0xab   : > { %2320 = vmatpush.bf16.msra.mxu3 %v6153_v8  ;;  %v5802_v8 = vld [vmem:[%s11475_s5 + $0xd0] sm:$0xf0]  ;;  %v5885_v61 = vor.u32 %v7434_v53, %v5882_v55 }
  0xac   : > { %2282 = vmatpush.bf16.msra.mxu0 %v5753_v14  ;;  %v6058_v14 = vld [vmem:[%s11475_s5 + $0x2d0] sm:$0xf0]  ;;  %v5805_v19 = vor.u32 %v7414_v7, %v5802_v8 }
  0xad   : > { %2295 = vmatpush.bf16.msra.mxu1 %v5881_v15  ;;  %v9082_v15 = vpack.c.b16 %v1626_v0, %v1626_v0  ;;  %v6061_v22 = vor.u32 %v7478_v13, %v6058_v14  ;;  %v7462_v0 = vld [vmem:[%s11475_s5 + $0x244] sm:$0xf]  ;;  %v5850_v14 = vld [vmem:[%s11475_s5 + $0x130] sm:$0xf0] }
  0xae   : > { %2308 = vmatpush.bf16.msra.mxu2 %v6009_v16  ;;  %v9084_v16 = vpack.c.b16 %v1629_v1, %v1629_v1  ;;  %v5994_v1 = vld [vmem:[%s11475_s5 + $0x250] sm:$0xf0] }
  0xaf   : > { %2321 = vmatpush.bf16.msra.mxu3 %v6137_v20  ;;  %v9092_v20 = vpack.c.b16 %v1627_v4, %v1627_v4  ;;  %v6122_v4 = vld [vmem:[%s11475_s5 + $0x350] sm:$0xf0]  ;;  %v5997_v8 = vor.u32 %v7462_v0, %v5994_v1  ;;  %v6192_v0 = vld [vmem:[%s11475_s5 + $0x3c8] sm:$0xf]  ;;  %v7513_v1 = vld [vmem:[%s11475_s5 + $0x3d4] sm:$0xf0] }
  0xb0   : > { %2283 = vmatpush.bf16.msra.mxu0 %v5737_v26  ;;  %v6189_v26 = vor.u32 %v7510_v17, %v6186_v18  ;;  %v7458_v17 = vld [vmem:[%s11475_s5 + $0x224] sm:$0xf]  ;;  %v5978_v18 = vld [vmem:[%s11475_s5 + $0x230] sm:$0xf0] }
  0xb1   : > { %2296 = vmatpush.bf16.msra.mxu1 %v5865_v27  ;;  %v5914_v27 = vld [vmem:[%s11475_s5 + $0x1b0] sm:$0xf0] }
  0xb2   : > { %2309 = vmatpush.bf16.msra.mxu2 %v5993_v28  ;;  %v7474_v28 = vld [vmem:[%s11475_s5 + $0x2a4] sm:$0xf]  ;;  %v5917_v33 = vor.u32 %v7442_v25, %v5914_v27  ;;  %v5981_v27 = vor.u32 %v7458_v17, %v5978_v18  ;;  %v7477_v17 = vld [vmem:[%s11475_s5 + $0x2b4] sm:$0xf0]  ;;  %v6176_v18 = vld [vmem:[%s11475_s5 + $0x3a8] sm:$0xf] }
  0xb3   : > { %2322 = vmatpush.bf16.msra.mxu3 %v6121_v32  ;;  %v5789_v32 = vor.u32 %v7410_v23, %v5786_v24  ;;  %v6045_v34 = vor.u32 %v7474_v28, %v6042_v29  ;;  %v7390_v23 = vld [vmem:[%s11475_s5 + $0x4] sm:$0xf]  ;;  %v5706_v24 = vld [vmem:[%s11475_s5 + $0x10] sm:$0xf0] }
  0xb4   : > { %2284 = vmatpush.bf16.msra.mxu0 %v5721_v42  ;;  %v5898_v42 = vld [vmem:[%s11475_s5 + $0x190] sm:$0xf0]  ;;  %v7422_v28 = vld [vmem:[%s11475_s5 + $0x104] sm:$0xf]  ;;  %v5709_v44 = vor.u32 %v7390_v23, %v5706_v24 }
  0xb5   : > { %2297 = vmatpush.bf16.msra.mxu1 %v5849_v47  ;;  %v6154_v47 = vld [vmem:[%s11475_s5 + $0x390] sm:$0xf0]  ;;  %v5901_v49 = vor.u32 %v7438_v40, %v5898_v42  ;;  %v7421_v40 = vld [vmem:[%s11475_s5 + $0xf4] sm:$0xf0] }
  0xb6   : > { %2310 = vmatpush.bf16.msra.mxu2 %v5977_v48  ;;  %v5773_v48 = vor.u32 %v7406_v35, %v5770_v39  ;;  %v6157_v54 = vor.u32 %v7502_v46, %v6154_v47  ;;  %v5834_v29 = vld [vmem:[%s11475_s5 + $0x110] sm:$0xf0]  ;;  %v5824_v39 = vld [vmem:[%s11475_s5 + $0xe8] sm:$0xf]  ;;  %v7485_v47 = vld [vmem:[%s11475_s5 + $0x2f4] sm:$0xf0] }
  0xb7   : > { %2323 = vmatpush.bf16.msra.mxu3 %v6105_v52  ;;  %v5754_v52 = vld [vmem:[%s11475_s5 + $0x70] sm:$0xf0]  ;;  %v6080_v46 = vld [vmem:[%s11475_s5 + $0x2e8] sm:$0xf] }
  0xb8   : > { %2285 = vmatpush.bf16.msra.mxu0 %v5705_v59  ;;  %v6138_v59 = vld [vmem:[%s11475_s5 + $0x370] sm:$0xf0]  ;;  %v5757_v36 = vor.u32 %v7402_v51, %v5754_v52  ;;  %v6208_v51 = vld [vmem:[%s11475_s5 + $0x3e8] sm:$0xf]  ;;  %v7517_v52 = vld [vmem:[%s11475_s5 + $0x3f4] sm:$0xf0]  ;;  %v6081_v57 = vor.u32 %v7485_v47, %v6080_v46 }
  0xb9   : > { %2298 = vmatpush.bf16.msra.mxu1 %v5833_v38  ;;  %v5738_v38 = vld [vmem:[%s11475_s5 + $0x50] sm:$0xf0]  ;;  %v6141_v63 = vor.u32 %v7498_v58, %v6138_v59  ;;  %v5808_v58 = vld [vmem:[%s11475_s5 + $0xc8] sm:$0xf]  ;;  %v7417_v59 = vld [vmem:[%s11475_s5 + $0xd4] sm:$0xf0] }
  0xba   : > { %2311 = vmatpush.bf16.msra.mxu2 %v5961_v43  ;;  %v7430_v43 = vld [vmem:[%s11475_s5 + $0x144] sm:$0xf]  ;;  %v6090_v35 = vld [vmem:[%s11475_s5 + $0x310] sm:$0xf0]  ;;  %v5888_v46 = vld [vmem:[%s11475_s5 + $0x168] sm:$0xf] }
  0xbb   : > { %2324 = vmatpush.bf16.msra.mxu3 %v6089_v2  ;;  %2286 = vmatmul.bf16.vlgmr.msra.gmra.mxu0 %v9082_v15  ;;  %v9191_v2 = vld [vmem:[%s11474_s4] sm:$0xf]  ;;  %v5869_v7 = vor.u32 %v7430_v43, %v5866_v62  ;;  %v6064_v43 = vld [vmem:[%s11475_s5 + $0x2c8] sm:$0xf]  ;;  %v7481_v62 = vld [vmem:[%s11475_s5 + $0x2d4] sm:$0xf0] }
  0xbc   : > { %2330 = vmatpush.bf16.msrb.mxu0 %v5821_v3  ;;  %2299 = vmatmul.bf16.vlgmr.msra.gmra.mxu1 %v9092_v20  ;;  %v7494_v3 = vld [vmem:[%s11475_s5 + $0x344] sm:$0xf]  ;;  %v616_v12 = vperm.slane %v9191_v2, 0 }
  0xbd   : > { %2343 = vmatpush.bf16.msrb.mxu1 %v5949_v5  ;;  %2312 = vmatmul.bf16.vlgmr.msra.gmra.mxu2 %v9071_v11  ;;  %v5741_v5 = vor.u32 %v7398_v60, %v5738_v38  ;;  %v6125_v13 = vor.u32 %v7494_v3, %v6122_v4  ;;  %v7449_v38 = vld [vmem:[%s11475_s5 + $0x1d4] sm:$0xf0]  ;;  %v5809_v4 = vor.u32 %v7417_v59, %v5808_v58  ;;  %v5744_v59 = vld [vmem:[%s11475_s5 + $0x48] sm:$0xf] }
  0xbe   : > { %2356 = vmatpush.bf16.msrb.mxu2 %v6077_v6  ;;  %2325 = vmatmul.bf16.vlgmr.msra.gmra.mxu3 %v9084_v16  ;;  %v7394_v6 = vld [vmem:[%s11475_s5 + $0x24] sm:$0xf] }
  0xbf   : > { %2369 = vmatpush.bf16.msrb.mxu3 %v6205_v10  ;;  %v7426_v10 = vld [vmem:[%s11475_s5 + $0x124] sm:$0xf] }
  0xc0   : > { %2331 = vmatpush.bf16.msrb.mxu0 %v5805_v19  ;;  %v7490_v19 = vld [vmem:[%s11475_s5 + $0x324] sm:$0xf] }
  0xc1   : > { %2344 = vmatpush.bf16.msrb.mxu1 %v5933_v21  ;;  %v6106_v21 = vld [vmem:[%s11475_s5 + $0x330] sm:$0xf0] }
  0xc2   : > { %2357 = vmatpush.bf16.msrb.mxu2 %v6061_v22  ;;  %v5725_v22 = vor.u32 %v7394_v6, %v5722_v9  ;;  %v1313_v55 = vpop.f32.mrf.mxu2  ;;  %v6065_v6 = vor.u32 %v7481_v62, %v6064_v43  ;;  %v5920_v9 = vld [vmem:[%s11475_s5 + $0x1a8] sm:$0xf]  ;;  %v7465_v62 = vld [vmem:[%s11475_s5 + $0x254] sm:$0xf0] }
  0xc3   : > { %2370 = vmatpush.bf16.msrb.mxu3 %v6189_v26  ;;  %v1287_v25 = vpop.f32.mrf.mxu0  ;;  %v5853_v26 = vor.u32 %v7426_v10, %v5850_v14  ;;  %v6048_v14 = vld [vmem:[%s11475_s5 + $0x2a8] sm:$0xf] }
  0xc4   : > { %2332 = vmatpush.bf16.msrb.mxu0 %v5789_v32  ;;  %v1288_v31 = vadd.f32 %v1287_v25, %v616_v12  ;;  %v6109_v32 = vor.u32 %v7490_v19, %v6106_v21  ;;  %v1300_v42 = vpop.f32.mrf.mxu1  ;;  %v6193_v12 = vor.u32 %v7513_v1, %v6192_v0  ;;  %v7509_v19 = vld [vmem:[%s11475_s5 + $0x3b4] sm:$0xf0]  ;;  %v6049_v25 = vor.u32 %v7477_v17, %v6048_v14  ;;  %v6000_v43 = vld [vmem:[%s11475_s5 + $0x248] sm:$0xf] }
  0xc5   : > { %2345 = vmatpush.bf16.msrb.mxu1 %v5917_v33  ;;  %v5962_v33 = vld [vmem:[%s11475_s5 + $0x210] sm:$0xf0]  ;;  %v6128_v1 = vld [vmem:[%s11475_s5 + $0x348] sm:$0xf] }
  0xc6   : > { %2358 = vmatpush.bf16.msrb.mxu2 %v6045_v34  ;;  %v7486_v34 = vld [vmem:[%s11475_s5 + $0x304] sm:$0xf] }
  0xc7   : > { %2371 = vmatpush.bf16.msrb.mxu3 %v6173_v41  ;;  %v5952_v41 = vld [vmem:[%s11475_s5 + $0x1e8] sm:$0xf]  ;;  %v6093_v53 = vor.u32 %v7486_v34, %v6090_v35  ;;  %v7505_v35 = vld [vmem:[%s11475_s5 + $0x394] sm:$0xf0] }
  0xc8   : > { %2333 = vmatpush.bf16.msrb.mxu0 %v5773_v48  ;;  %v1301_v48 = vadd.f32 %v1300_v42, %v1288_v31  ;;  %v5953_v56 = vor.u32 %v7453_v45, %v5952_v41  ;;  %v7441_v31 = vld [vmem:[%s11475_s5 + $0x194] sm:$0xf0]  ;;  %v6160_v34 = vld [vmem:[%s11475_s5 + $0x388] sm:$0xf] }
  0xc9   : > { %2346 = vmatpush.bf16.msrb.mxu1 %v5901_v49  ;;  %v5837_v49 = vor.u32 %v7422_v28, %v5834_v29  ;;  %v617_v29 = vperm.slane %v9191_v2, 1  ;;  %v7405_v45 = vld [vmem:[%s11475_s5 + $0x74] sm:$0xf0] }
  0xca   : > { %2359 = vmatpush.bf16.msrb.mxu2 %v6029_v50  ;;  %v5965_v50 = vor.u32 %v7454_v30, %v5962_v33  ;;  %v1314_v60 = vadd.f32 %v1313_v55, %v1301_v48  ;;  %v1315_v23 = vpop.f32.mrf.mxu2  ;;  %v6177_v30 = vor.u32 %v7509_v19, %v6176_v18  ;;  %v7473_v33 = vld [vmem:[%s11475_s5 + $0x294] sm:$0xf0]  ;;  %v5984_v19 = vld [vmem:[%s11475_s5 + $0x228] sm:$0xf] }
  0xcb   : > { %2372 = vmatpush.bf16.msrb.mxu3 %v6157_v54  ;;  %v5825_v54 = vor.u32 %v7421_v40, %v5824_v39  ;;  %v7429_v18 = vld [vmem:[%s11475_s5 + $0x134] sm:$0xf0] }
  0xcc   : > { %2334 = vmatpush.bf16.msrb.mxu0 %v5757_v36  ;;  %v5936_v36 = vld [vmem:[%s11475_s5 + $0x1c8] sm:$0xf]  ;;  %v1302_v10 = vpop.f32.mrf.mxu1  ;;  %v7493_v23 = vld [vmem:[%s11475_s5 + $0x334] sm:$0xf0] }
  0xcd   : > { %2347 = vmatpush.bf16.msrb.mxu1 %v5885_v61  ;;  %v1326_v61 = vpop.f32.mrf.mxu3  ;;  %v5728_v10 = vld [vmem:[%s11475_s5 + $0x28] sm:$0xf] }
  0xce   : > { %2360 = vmatpush.bf16.msrb.mxu2 %v6013_v37  ;;  %v6209_v37 = vor.u32 %v7517_v52, %v6208_v51  ;;  %v9296_v3 = vadd.f32 %v1326_v61, %v1314_v60  ;;  %v6016_v51 = vld [vmem:[%s11475_s5 + $0x268] sm:$0xf]  ;;  %v7469_v52 = vld [vmem:[%s11475_s5 + $0x274] sm:$0xf0] }
  0xcf   : > { %2373 = vmatpush.bf16.msrb.mxu3 %v6141_v63  ;;  %v1289_v63 = vpop.f32.mrf.mxu0  ;;  %v6017_v58 = vor.u32 %v7469_v52, %v6016_v51  ;;  %v5872_v60 = vld [vmem:[%s11475_s5 + $0x148] sm:$0xf]  ;;  %v7515_v51 = vld [vmem:[%s11475_s5 + $0x3ec] sm:$0xf]  ;;  %v6210_v52 = vld [vmem:[%s11475_s5 + $0x3f8] sm:$0xf0] }
  0xd0   : > { %2335 = vmatpush.bf16.msrb.mxu0 %v5741_v5  ;;  %v5937_v5 = vor.u32 %v7449_v38, %v5936_v36  ;;  %v7401_v36 = vld [vmem:[%s11475_s5 + $0x54] sm:$0xf0] }
  0xd1   : > { %2348 = vmatpush.bf16.msrb.mxu1 %v5869_v7  ;;  %v5792_v7 = vld [vmem:[%s11475_s5 + $0xa8] sm:$0xf]  ;;  %v7433_v38 = vld [vmem:[%s11475_s5 + $0x154] sm:$0xf0] }
  0xd2   : > { %2361 = vmatpush.bf16.msrb.mxu2 %v5997_v8  ;;  %v7413_v8 = vld [vmem:[%s11475_s5 + $0xb4] sm:$0xf0] }
  0xd3   : > { %2374 = vmatpush.bf16.msrb.mxu3 %v6125_v13  ;;  %v7445_v13 = vld [vmem:[%s11475_s5 + $0x1b4] sm:$0xf0]  ;;  %v5793_v21 = vor.u32 %v7413_v8, %v5792_v7  ;;  %v5873_v8 = vor.u32 %v7433_v38, %v5872_v60  ;;  %v5938_v60 = vld [vmem:[%s11475_s5 + $0x1d8] sm:$0xf0]  ;;  %v7511_v38 = vld [vmem:[%s11475_s5 + $0x3cc] sm:$0xf] }
  0xd4   : > { %2336 = vmatpush.bf16.msrb.mxu0 %v5725_v22  ;;  %v5776_v22 = vld [vmem:[%s11475_s5 + $0x88] sm:$0xf]  ;;  %v5921_v24 = vor.u32 %v7445_v13, %v5920_v9  ;;  %v6001_v9 = vor.u32 %v7465_v62, %v6000_v43  ;;  %v6194_v43 = vld [vmem:[%s11475_s5 + $0x3d8] sm:$0xf0] }
  0xd5   : > { %2349 = vmatpush.bf16.msrb.mxu1 %v5853_v26  ;;  %v7409_v26 = vld [vmem:[%s11475_s5 + $0x94] sm:$0xf0]  ;;  %v1328_v28 = vpop.f32.mrf.mxu3  ;;  %v5856_v13 = vld [vmem:[%s11475_s5 + $0x128] sm:$0xf] }
  0xd6   : > { %2362 = vmatpush.bf16.msrb.mxu2 %v5981_v27  ;;  %v5904_v27 = vld [vmem:[%s11475_s5 + $0x188] sm:$0xf]  ;;  %v5777_v39 = vor.u32 %v7409_v26, %v5776_v22  ;;  %v7393_v26 = vld [vmem:[%s11475_s5 + $0x14] sm:$0xf0] }
  0xd7   : > { %2375 = vmatpush.bf16.msrb.mxu3 %v6109_v32  ;;  %v6032_v32 = vld [vmem:[%s11475_s5 + $0x288] sm:$0xf]  ;;  %v5905_v41 = vor.u32 %v7441_v31, %v5904_v27  ;;  %v5857_v27 = vor.u32 %v7429_v18, %v5856_v13  ;;  %v6178_v13 = vld [vmem:[%s11475_s5 + $0x3b8] sm:$0xf0] }
  0xd8   : > { %2337 = vmatpush.bf16.msrb.mxu0 %v5709_v44  ;;  %v1339_v40 = vpop.f32.mrf.mxu0  ;;  %v6033_v42 = vor.u32 %v7473_v33, %v6032_v32  ;;  %v5760_v44 = vld [vmem:[%s11475_s5 + $0x68] sm:$0xf] }
  0xd9   : > { %2350 = vmatpush.bf16.msrb.mxu1 %v5837_v49  ;;  %v1340_v47 = vadd.f32 %v1339_v40, %v617_v29  ;;  %v1352_v48 = vpop.f32.mrf.mxu1  ;;  %v6161_v49 = vor.u32 %v7505_v35, %v6160_v34  ;;  %v6112_v22 = vld [vmem:[%s11475_s5 + $0x328] sm:$0xf]  ;;  %v7457_v34 = vld [vmem:[%s11475_s5 + $0x214] sm:$0xf0] }
  0xda   : > { %2363 = vmatpush.bf16.msrb.mxu2 %v5965_v50  ;;  %v7437_v50 = vld [vmem:[%s11475_s5 + $0x174] sm:$0xf0]  ;;  %v5840_v29 = vld [vmem:[%s11475_s5 + $0x108] sm:$0xf]  ;;  %v6113_v33 = vor.u32 %v7493_v23, %v6112_v22  ;;  %v7439_v22 = vld [vmem:[%s11475_s5 + $0x18c] sm:$0xf] }
  0xdb   : > { %2376 = vmatpush.bf16.msrb.mxu3 %v6093_v53  ;;  %2338 = vmatmul.bf16.vlgmr.msrb.gmra.mxu0 %v9082_v15  ;;  %v6144_v53 = vld [vmem:[%s11475_s5 + $0x368] sm:$0xf]  ;;  %v1353_v55 = vadd.f32 %v1352_v48, %v1340_v47  ;;  %v7483_v47 = vld [vmem:[%s11475_s5 + $0x2ec] sm:$0xf]  ;;  %v6082_v48 = vld [vmem:[%s11475_s5 + $0x2f8] sm:$0xf0] }
  0xdc   : > { %2382 = vmatpush.bf16.msra.mxu0 %v5825_v54  ;;  %2351 = vmatmul.bf16.vlgmr.msrb.gmra.mxu1 %v9092_v20  ;;  %v7501_v54 = vld [vmem:[%s11475_s5 + $0x374] sm:$0xf0]  ;;  %v5968_v31 = vld [vmem:[%s11475_s5 + $0x208] sm:$0xf]  ;;  %v618_v23 = vperm.slane %v9191_v2, 2 }
  0xdd   : > { %2395 = vmatpush.bf16.msra.mxu1 %v5953_v56  ;;  %2364 = vmatmul.bf16.vlgmr.msrb.gmra.mxu2 %v9071_v11  ;;  %v5761_v56 = vor.u32 %v7405_v45, %v5760_v44  ;;  %v6096_v35 = vld [vmem:[%s11475_s5 + $0x308] sm:$0xf]  ;;  %v7451_v44 = vld [vmem:[%s11475_s5 + $0x1ec] sm:$0xf] }
  0xde   : > { %2408 = vmatpush.bf16.msra.mxu2 %v6081_v57  ;;  %2377 = vmatmul.bf16.vlgmr.msrb.gmra.mxu3 %v9084_v16  ;;  %v5889_v57 = vor.u32 %v7437_v50, %v5888_v46  ;;  %v5954_v46 = vld [vmem:[%s11475_s5 + $0x1f8] sm:$0xf0]  ;;  %v5969_v50 = vor.u32 %v7457_v34, %v5968_v31  ;;  %v7403_v34 = vld [vmem:[%s11475_s5 + $0x6c] sm:$0xf] }
  0xdf   : > { %2421 = vmatpush.bf16.msra.mxu3 %v6209_v37  ;;  %v6145_v37 = vor.u32 %v7501_v54, %v6144_v53 }
  0xe0   : > { %2383 = vmatpush.bf16.msra.mxu0 %v5809_v4  ;;  %v1365_v61 = vpop.f32.mrf.mxu2  ;;  %v7497_v4 = vld [vmem:[%s11475_s5 + $0x354] sm:$0xf0]  ;;  %v1341_v7 = vpop.f32.mrf.mxu0 }
  0xe1   : > { %2396 = vmatpush.bf16.msra.mxu1 %v5937_v5  ;;  %v1366_v63 = vadd.f32 %v1365_v61, %v1353_v55  ;;  %v1378_v0 = vpop.f32.mrf.mxu3  ;;  %v5745_v5 = vor.u32 %v7401_v36, %v5744_v59  ;;  %v1354_v14 = vpop.f32.mrf.mxu1  ;;  %v6129_v17 = vor.u32 %v7497_v4, %v6128_v1  ;;  %v5957_v55 = vor.u32 %v7451_v44, %v5954_v46  ;;  %v7447_v59 = vld [vmem:[%s11475_s5 + $0x1cc] sm:$0xf]  ;;  %v5794_v4 = vld [vmem:[%s11475_s5 + $0xb8] sm:$0xf0] }
  0xe2   : > { %2409 = vmatpush.bf16.msra.mxu2 %v6065_v6  ;;  %v6213_v36 = vor.u32 %v7515_v51, %v6210_v52  ;;  %v7479_v61 = vld [vmem:[%s11475_s5 + $0x2cc] sm:$0xf]  ;;  %v6197_v7 = vor.u32 %v7511_v38, %v6194_v43  ;;  %v5890_v44 = vld [vmem:[%s11475_s5 + $0x178] sm:$0xf0] }
  0xe3   : > { %2422 = vmatpush.bf16.msra.mxu3 %v6193_v12  ;;  %v9399_v6 = vadd.f32 %v1378_v0, %v1366_v63  ;;  %v7397_v12 = vld [vmem:[%s11475_s5 + $0x34] sm:$0xf0]  ;;  %v5941_v63 = vor.u32 %v7447_v59, %v5938_v60  ;;  %v7411_v1 = vld [vmem:[%s11475_s5 + $0xac] sm:$0xf]  ;;  %v6018_v46 = vld [vmem:[%s11475_s5 + $0x278] sm:$0xf0] }
  0xe4   : > { %2384 = vmatpush.bf16.msra.mxu0 %v5793_v21  ;;  %v7461_v21 = vld [vmem:[%s11475_s5 + $0x234] sm:$0xf0]  ;;  %v5797_v14 = vor.u32 %v7411_v1, %v5794_v4  ;;  %v7463_v59 = vld [vmem:[%s11475_s5 + $0x24c] sm:$0xf]  ;;  %v6130_v38 = vld [vmem:[%s11475_s5 + $0x358] sm:$0xf0] }
  0xe5   : > { %2397 = vmatpush.bf16.msra.mxu1 %v5921_v24  ;;  %v5729_v24 = vor.u32 %v7397_v12, %v5728_v10  ;;  %v5985_v28 = vor.u32 %v7461_v21, %v5984_v19  ;;  %v6050_v10 = vld [vmem:[%s11475_s5 + $0x2b8] sm:$0xf0]  ;;  %v7507_v12 = vld [vmem:[%s11475_s5 + $0x3ac] sm:$0xf] }
  0xe6   : > { %2410 = vmatpush.bf16.msra.mxu2 %v6049_v25  ;;  %v5712_v25 = vld [vmem:[%s11475_s5 + $0x8] sm:$0xf]  ;;  %v5778_v21 = vld [vmem:[%s11475_s5 + $0x98] sm:$0xf0]  ;;  %v7395_v4 = vld [vmem:[%s11475_s5 + $0x2c] sm:$0xf] }
  0xe7   : > { %2423 = vmatpush.bf16.msra.mxu3 %v6177_v30  ;;  %v7425_v30 = vld [vmem:[%s11475_s5 + $0x114] sm:$0xf0]  ;;  %v5713_v45 = vor.u32 %v7393_v26, %v5712_v25  ;;  %v5906_v25 = vld [vmem:[%s11475_s5 + $0x198] sm:$0xf0]  ;;  %v7471_v26 = vld [vmem:[%s11475_s5 + $0x28c] sm:$0xf] }
  0xe8   : > { %2385 = vmatpush.bf16.msra.mxu0 %v5777_v39  ;;  %v1367_v32 = vpop.f32.mrf.mxu2  ;;  %v7489_v39 = vld [vmem:[%s11475_s5 + $0x314] sm:$0xf0] }
  0xe9   : > { %2398 = vmatpush.bf16.msra.mxu1 %v5905_v41  ;;  %v1380_v40 = vpop.f32.mrf.mxu3  ;;  %v7419_v41 = vld [vmem:[%s11475_s5 + $0xec] sm:$0xf]  ;;  %v6097_v53 = vor.u32 %v7489_v39, %v6096_v35  ;;  %v5909_v32 = vor.u32 %v7439_v22, %v5906_v25  ;;  %v5762_v35 = vld [vmem:[%s11475_s5 + $0x78] sm:$0xf0] }
  0xea   : > { %2411 = vmatpush.bf16.msra.mxu2 %v6033_v42  ;;  %v5826_v42 = vld [vmem:[%s11475_s5 + $0xf8] sm:$0xf0]  ;;  %v7435_v39 = vld [vmem:[%s11475_s5 + $0x16c] sm:$0xf] }
  0xeb   : > { %2424 = vmatpush.bf16.msra.mxu3 %v6161_v49  ;;  %v5841_v49 = vor.u32 %v7425_v30, %v5840_v29  ;;  %v5829_v54 = vor.u32 %v7419_v41, %v5826_v42  ;;  %v6162_v29 = vld [vmem:[%s11475_s5 + $0x398] sm:$0xf0]  ;;  %v5893_v51 = vor.u32 %v7435_v39, %v5890_v44  ;;  %v6312_v44 = vld [vmem:[%s11477_s7 + $0xc0] sm:$0xf] }
  0xec   : > { %2386 = vmatpush.bf16.msra.mxu0 %v5761_v56  ;;  %v6085_v56 = vor.u32 %v7483_v47, %v6082_v48  ;;  %v7499_v47 = vld [vmem:[%s11475_s5 + $0x36c] sm:$0xf]  ;;  %v6146_v48 = vld [vmem:[%s11475_s5 + $0x378] sm:$0xf0] }
  0xed   : > { %2399 = vmatpush.bf16.msra.mxu1 %v5889_v57  ;;  %v7415_v57 = vld [vmem:[%s11475_s5 + $0xcc] sm:$0xf]  ;;  %v5842_v25 = vld [vmem:[%s11475_s5 + $0x118] sm:$0xf0] }
  0xee   : > { %2412 = vmatpush.bf16.msra.mxu2 %v6017_v58  ;;  %v5810_v58 = vld [vmem:[%s11475_s5 + $0xd8] sm:$0xf0] }
  0xef   : > { %2425 = vmatpush.bf16.msra.mxu3 %v6145_v37  ;;  %v6066_v37 = vld [vmem:[%s11475_s5 + $0x2d8] sm:$0xf0]  ;;  %v5813_v62 = vor.u32 %v7415_v57, %v5810_v58  ;;  %v6149_v57 = vor.u32 %v7499_v47, %v6146_v48  ;;  %v6296_v47 = vld [vmem:[%s11477_s7 + $0xa0] sm:$0xf]  ;;  %v7540_v48 = vld [vmem:[%s11477_s7 + $0xac] sm:$0xf0] }
  0xf0   : > { %2387 = vmatpush.bf16.msra.mxu0 %v5745_v5  ;;  %v6069_v0 = vor.u32 %v7479_v61, %v6066_v37  ;;  %v7443_v5 = vld [vmem:[%s11475_s5 + $0x1ac] sm:$0xf]  ;;  %v5874_v58 = vld [vmem:[%s11475_s5 + $0x158] sm:$0xf0] }
  0xf1   : > { %2400 = vmatpush.bf16.msra.mxu1 %v5873_v8  ;;  %v5922_v8 = vld [vmem:[%s11475_s5 + $0x1b8] sm:$0xf0]  ;;  %v7495_v37 = vld [vmem:[%s11475_s5 + $0x34c] sm:$0xf] }
  0xf2   : > { %2413 = vmatpush.bf16.msra.mxu2 %v6001_v9  ;;  %v7475_v9 = vld [vmem:[%s11475_s5 + $0x2ac] sm:$0xf]  ;;  %v5925_v18 = vor.u32 %v7443_v5, %v5922_v8  ;;  %v5730_v5 = vld [vmem:[%s11475_s5 + $0x38] sm:$0xf0] }
  0xf3   : > { %2426 = vmatpush.bf16.msra.mxu3 %v6129_v17  ;;  %v7407_v17 = vld [vmem:[%s11475_s5 + $0x8c] sm:$0xf]  ;;  %v6053_v19 = vor.u32 %v7475_v9, %v6050_v10  ;;  %v6133_v9 = vor.u32 %v7495_v37, %v6130_v38  ;;  %v5858_v10 = vld [vmem:[%s11475_s5 + $0x138] sm:$0xf0] }
  0xf4   : > { %2388 = vmatpush.bf16.msra.mxu0 %v5729_v24  ;;  %v6181_v24 = vor.u32 %v7507_v12, %v6178_v13  ;;  %v5781_v30 = vor.u32 %v7407_v17, %v5778_v21  ;;  %v7459_v12 = vld [vmem:[%s11475_s5 + $0x22c] sm:$0xf]  ;;  %v5986_v13 = vld [vmem:[%s11475_s5 + $0x238] sm:$0xf0] }
  0xf5   : > { %2401 = vmatpush.bf16.msra.mxu1 %v5857_v27  ;;  %v6034_v27 = vld [vmem:[%s11475_s5 + $0x298] sm:$0xf0]  ;;  %v5989_v22 = vor.u32 %v7459_v12, %v5986_v13  ;;  %v7604_v12 = vld [vmem:[%s11477_s7 + $0x2ac] sm:$0xf0]  ;;  %v6216_v13 = vld [vmem:[%s11477_s7] sm:$0xf] }
  0xf6   : > { %2414 = vmatpush.bf16.msra.mxu2 %v5985_v28  ;;  %v7503_v28 = vld [vmem:[%s11475_s5 + $0x38c] sm:$0xf]  ;;  %v6114_v17 = vld [vmem:[%s11475_s5 + $0x338] sm:$0xf0] }
  0xf7   : > { %2427 = vmatpush.bf16.msra.mxu3 %v6113_v33  ;;  %v6037_v33 = vor.u32 %v7471_v26, %v6034_v27  ;;  %v6165_v42 = vor.u32 %v7503_v28, %v6162_v29  ;;  %v7455_v28 = vld [vmem:[%s11475_s5 + $0x20c] sm:$0xf]  ;;  %v5970_v29 = vld [vmem:[%s11475_s5 + $0x218] sm:$0xf0] }
  0xf8   : > { %2389 = vmatpush.bf16.msra.mxu0 %v5713_v45  ;;  %v1391_v31 = vpop.f32.mrf.mxu0  ;;  %v7467_v45 = vld [vmem:[%s11475_s5 + $0x26c] sm:$0xf] }
  0xf9   : > { %2402 = vmatpush.bf16.msra.mxu1 %v5841_v49  ;;  %v1392_v40 = vadd.f32 %v1391_v31, %v618_v23  ;;  %v1404_v41 = vpop.f32.mrf.mxu1  ;;  %v6021_v52 = vor.u32 %v7467_v45, %v6018_v46  ;;  %v5714_v23 = vld [vmem:[%s11475_s5 + $0x18] sm:$0xf0]  ;;  %v7544_v45 = vld [vmem:[%s11477_s7 + $0xcc] sm:$0xf0] }
  0xfa   : > { %2415 = vmatpush.bf16.msra.mxu2 %v5969_v50  ;;  %v5765_v50 = vor.u32 %v7403_v34, %v5762_v35  ;;  %v7548_v34 = vld [vmem:[%s11477_s7 + $0xec] sm:$0xf0]  ;;  %v6313_v46 = vor.u32 %v7544_v45, %v6312_v44 }
  0xfb   : > { %2428 = vmatpush.bf16.msra.mxu3 %v6097_v53  ;;  %2390 = vmatmul.bf16.vlgmr.msra.gmra.mxu0 %v9082_v15  ;;  %v1405_v49 = vadd.f32 %v1404_v41, %v1392_v40  ;;  %v7399_v53 = vld [vmem:[%s11475_s5 + $0x4c] sm:$0xf]  ;;  %v5973_v40 = vor.u32 %v7455_v28, %v5970_v29  ;;  %v7542_v29 = vld [vmem:[%s11477_s7 + $0xc4] sm:$0xf]  ;;  %v7592_v44 = vld [vmem:[%s11477_s7 + $0x24c] sm:$0xf0] }
  0xfc   : > { %2434 = vmatpush.bf16.msrb.mxu0 %v5829_v54  ;;  %2403 = vmatmul.bf16.vlgmr.msra.gmra.mxu1 %v9092_v20  ;;  %v5746_v54 = vld [vmem:[%s11475_s5 + $0x58] sm:$0xf0] }
  0xfd   : > { %2447 = vmatpush.bf16.msrb.mxu1 %v5957_v55  ;;  %2416 = vmatmul.bf16.vlgmr.msra.gmra.mxu2 %v9071_v11  ;;  %v7431_v55 = vld [vmem:[%s11475_s5 + $0x14c] sm:$0xf]  ;;  %v5749_v43 = vor.u32 %v7399_v53, %v5746_v54 }
  0xfe   : > { %2460 = vmatpush.bf16.msrb.mxu2 %v6085_v56  ;;  %2429 = vmatmul.bf16.vlgmr.msra.gmra.mxu3 %v9084_v16 }
  0xff   : > { %2473 = vmatpush.bf16.msrb.mxu3 %v6213_v36  ;;  %v6002_v36 = vld [vmem:[%s11475_s5 + $0x258] sm:$0xf0] }
 0x100   : > { %2435 = vmatpush.bf16.msrb.mxu0 %v5813_v62  ;;  %v1417_v56 = vpop.f32.mrf.mxu2  ;;  %v6005_v1 = vor.u32 %v7463_v59, %v6002_v36  ;;  %v7528_v59 = vld [vmem:[%s11477_s7 + $0x4c] sm:$0xf0] }
 0x101   : > { %2448 = vmatpush.bf16.msrb.mxu1 %v5941_v63  ;;  %v1418_v60 = vadd.f32 %v1417_v56, %v1405_v49  ;;  %v1430_v61 = vpop.f32.mrf.mxu3  ;;  %v1393_v63 = vpop.f32.mrf.mxu0  ;;  %v6297_v49 = vor.u32 %v7540_v48, %v6296_v47  ;;  %v7534_v48 = vld [vmem:[%s11477_s7 + $0x84] sm:$0xf] }
 0x102   : > { %2461 = vmatpush.bf16.msrb.mxu2 %v6069_v0  ;;  %v5877_v0 = vor.u32 %v7431_v55, %v5874_v58  ;;  %v1406_v8 = vpop.f32.mrf.mxu1  ;;  %v6248_v58 = vld [vmem:[%s11477_s7 + $0x40] sm:$0xf] }
 0x103   : > { %2474 = vmatpush.bf16.msrb.mxu3 %v6197_v7  ;;  %v9598_v62 = vadd.f32 %v1430_v61, %v1418_v60  ;;  %v7427_v7 = vld [vmem:[%s11475_s5 + $0x12c] sm:$0xf]  ;;  %v6249_v38 = vor.u32 %v7528_v59, %v6248_v58  ;;  %v7584_v59 = vld [vmem:[%s11477_s7 + $0x20c] sm:$0xf0] }
 0x104   : > { %2436 = vmatpush.bf16.msrb.mxu0 %v5797_v14  ;;  %v7491_v14 = vld [vmem:[%s11475_s5 + $0x32c] sm:$0xf]  ;;  %v5861_v21 = vor.u32 %v7427_v7, %v5858_v10  ;;  %v6552_v10 = vld [vmem:[%s11477_s7 + $0x2a0] sm:$0xf] }
 0x105   : > { %2449 = vmatpush.bf16.msrb.mxu1 %v5925_v18  ;;  %v5733_v18 = vor.u32 %v7395_v4, %v5730_v5  ;;  %v6117_v27 = vor.u32 %v7491_v14, %v6114_v17  ;;  %v6232_v4 = vld [vmem:[%s11477_s7 + $0x20] sm:$0xf]  ;;  %v7524_v5 = vld [vmem:[%s11477_s7 + $0x2c] sm:$0xf0] }
 0x106   : > { %2462 = vmatpush.bf16.msrb.mxu2 %v6053_v19  ;;  %v7391_v19 = vld [vmem:[%s11475_s5 + $0xc] sm:$0xf]  ;;  %v7520_v14 = vld [vmem:[%s11477_s7 + $0xc] sm:$0xf0] }
 0x107   : > { %2475 = vmatpush.bf16.msrb.mxu3 %v6181_v24  ;;  %v7423_v24 = vld [vmem:[%s11475_s5 + $0x10c] sm:$0xf]  ;;  %v5717_v35 = vor.u32 %v7391_v19, %v5714_v23  ;;  %v7546_v19 = vld [vmem:[%s11477_s7 + $0xe4] sm:$0xf] }
 0x108   : > { %2437 = vmatpush.bf16.msrb.mxu0 %v5781_v30  ;;  %v1419_v26 = vpop.f32.mrf.mxu2  ;;  %v7487_v30 = vld [vmem:[%s11475_s5 + $0x30c] sm:$0xf]  ;;  %v5845_v39 = vor.u32 %v7423_v24, %v5842_v25  ;;  %v9734_v23 = vld [vmem:[%s9713_s24] sm:$0xff]  ;;  %v6217_v25 = vor.u32 %v7520_v14, %v6216_v13 }
 0x109   : > { %2450 = vmatpush.bf16.msrb.mxu1 %v5909_v32  ;;  %v1432_v31 = vpop.f32.mrf.mxu3  ;;  %v6098_v32 = vld [vmem:[%s11475_s5 + $0x318] sm:$0xf0]  ;;  %v2626_v24 = vunpack.c.l.b16 %v9734_v23  ;;  %v6536_v26 = vld [vmem:[%s11477_s7 + $0x280] sm:$0xf] }
 0x10a   : > { %2463 = vmatpush.bf16.msrb.mxu2 %v6037_v33  ;;  %v6328_v33 = vld [vmem:[%s11477_s7 + $0xe0] sm:$0xf]  ;;  %v6101_v41 = vor.u32 %v7487_v30, %v6098_v32  ;;  %v6314_v31 = vld [vmem:[%s11477_s7 + $0xd0] sm:$0xf0] }
 0x10b   : > { %2476 = vmatpush.bf16.msrb.mxu3 %v6165_v42  ;;  %v6329_v42 = vor.u32 %v7548_v34, %v6328_v33  ;;  %v6520_v32 = vld [vmem:[%s11477_s7 + $0x260] sm:$0xf]  ;;  %v7596_v33 = vld [vmem:[%s11477_s7 + $0x26c] sm:$0xf0]  ;;  %v9755_v34 = vpack.c.b16 %v2626_v24, %v2626_v24  ;;  %v7522_v24 = vld [vmem:[%s11477_s7 + $0x24] sm:$0xf] }
 0x10c   : > { %2438 = vmatpush.bf16.msrb.mxu0 %v5765_v50  ;;  %v7536_v50 = vld [vmem:[%s11477_s7 + $0x8c] sm:$0xf0] }
 0x10d   : > { %2451 = vmatpush.bf16.msrb.mxu1 %v5893_v51  ;;  %v619_v51 = vperm.slane %v9191_v2, 3  ;;  %v6584_v2 = vld [vmem:[%s11477_s7 + $0x2e0] sm:$0xf] }
 0x10e   : > { %2464 = vmatpush.bf16.msrb.mxu2 %v6021_v52 }
 0x10f   : > { %2477 = vmatpush.bf16.msrb.mxu3 %v6149_v57  ;;  %v7612_v57 = vld [vmem:[%s11477_s7 + $0x2ec] sm:$0xf0] }
 0x110   : > { %2439 = vmatpush.bf16.msrb.mxu0 %v5749_v43  ;;  %v6585_v60 = vor.u32 %v7612_v57, %v6584_v2  ;;  %v7644_v2 = vld [vmem:[%s11477_s7 + $0x3ec] sm:$0xf0]  ;;  %v6472_v57 = vld [vmem:[%s11477_s7 + $0x200] sm:$0xf] }
 0x111   : > { %2452 = vmatpush.bf16.msrb.mxu1 %v5877_v0  ;;  %v6568_v0 = vld [vmem:[%s11477_s7 + $0x2c0] sm:$0xf] }
 0x112   : > { %2465 = vmatpush.bf16.msrb.mxu2 %v6005_v1  ;;  %v7608_v1 = vld [vmem:[%s11477_s7 + $0x2cc] sm:$0xf0] }
 0x113   : > { %2478 = vmatpush.bf16.msrb.mxu3 %v6133_v9  ;;  %v6569_v8 = vor.u32 %v7608_v1, %v6568_v0  ;;  %v6233_v9 = vor.u32 %v7524_v5, %v6232_v4  ;;  %v7526_v0 = vld [vmem:[%s11477_s7 + $0x44] sm:$0xf]  ;;  %v6250_v1 = vld [vmem:[%s11477_s7 + $0x50] sm:$0xf0] }
 0x114   : > { %2440 = vmatpush.bf16.msrb.mxu0 %v5733_v18  ;;  %v6553_v18 = vor.u32 %v7604_v12, %v6552_v10  ;;  %v6586_v5 = vld [vmem:[%s11477_s7 + $0x2f0] sm:$0xf0]  ;;  %v7640_v10 = vld [vmem:[%s11477_s7 + $0x3cc] sm:$0xf0] }
 0x115   : > { %2453 = vmatpush.bf16.msrb.mxu1 %v5861_v21  ;;  %v6330_v21 = vld [vmem:[%s11477_s7 + $0xf0] sm:$0xf0] }
 0x116   : > { %2466 = vmatpush.bf16.msrb.mxu2 %v5989_v22  ;;  %v6333_v28 = vor.u32 %v7546_v19, %v6330_v21  ;;  %v7576_v19 = vld [vmem:[%s11477_s7 + $0x1cc] sm:$0xf0]  ;;  %v7606_v21 = vld [vmem:[%s11477_s7 + $0x2c4] sm:$0xf] }
 0x117   : > { %2479 = vmatpush.bf16.msrb.mxu3 %v6117_v27  ;;  %v7600_v27 = vld [vmem:[%s11477_s7 + $0x28c] sm:$0xf0] }
 0x118   : > { %2441 = vmatpush.bf16.msrb.mxu0 %v5717_v35  ;;  %v1443_v53 = vpop.f32.mrf.mxu0  ;;  %v6537_v30 = vor.u32 %v7600_v27, %v6536_v26  ;;  %v6521_v35 = vor.u32 %v7596_v33, %v6520_v32  ;;  %v7636_v32 = vld [vmem:[%s11477_s7 + $0x3ac] sm:$0xf0] }
 0x119   : > { %2454 = vmatpush.bf16.msrb.mxu1 %v5845_v39  ;;  %v1456_v54 = vpop.f32.mrf.mxu1  ;;  %v6317_v39 = vor.u32 %v7542_v29, %v6314_v31  ;;  %v6680_v31 = vld [vmem:[%s11477_s7 + $0x3a0] sm:$0xf] }
 0x11a   : > { %2467 = vmatpush.bf16.msrb.mxu2 %v5973_v40  ;;  %v7538_v40 = vld [vmem:[%s11477_s7 + $0xa4] sm:$0xf] }
 0x11b   : > { %2480 = vmatpush.bf16.msrb.mxu3 %v6101_v41  ;;  %2442 = vmatmul.bf16.vlgmr.msrb.gmra.mxu0 %v9082_v15  ;;  %v6280_v15 = vld [vmem:[%s11477_s7 + $0x80] sm:$0xf]  ;;  %v6298_v41 = vld [vmem:[%s11477_s7 + $0xb0] sm:$0xf0] }
 0x11c   : > { %3278 = vmatpush.bf16.msra.mxu0 %v6329_v42  ;;  %2455 = vmatmul.bf16.vlgmr.msrb.gmra.mxu1 %v9092_v20  ;;  %v6281_v52 = vor.u32 %v7536_v50, %v6280_v15  ;;  %v1444_v20 = vadd.f32 %v1443_v53, %v619_v51  ;;  %v6504_v42 = vld [vmem:[%s11477_s7 + $0x240] sm:$0xf]  ;;  %v6301_v47 = vor.u32 %v7538_v40, %v6298_v41  ;;  %v7588_v50 = vld [vmem:[%s11477_s7 + $0x22c] sm:$0xf0] }
 0x11d   : > { %2468 = vmatmul.bf16.vlgmr.msrb.gmra.mxu2 %v9071_v11  ;;  %v6264_v11 = vld [vmem:[%s11477_s7 + $0x60] sm:$0xf]  ;;  %v6505_v45 = vor.u32 %v7592_v44, %v6504_v42  ;;  %v7572_v42 = vld [vmem:[%s11477_s7 + $0x1ac] sm:$0xf0]  ;;  %v7602_v44 = vld [vmem:[%s11477_s7 + $0x2a4] sm:$0xf] }
 0x11e   : > { %2481 = vmatmul.bf16.vlgmr.msrb.gmra.mxu3 %v9084_v16  ;;  %v7532_v16 = vld [vmem:[%s11477_s7 + $0x6c] sm:$0xf0]  ;;  %v1457_v55 = vadd.f32 %v1456_v54, %v1444_v20  ;;  %3304 = vmatpush.bf16.msra.mxu2 %v6585_v60  ;;  %v6488_v15 = vld [vmem:[%s11477_s7 + $0x220] sm:$0xf]  ;;  %v6266_v20 = vld [vmem:[%s11477_s7 + $0x70] sm:$0xf0] }
 0x11f   : > { %v6265_v56 = vor.u32 %v7532_v16, %v6264_v11  ;;  %v7530_v16 = vld [vmem:[%s11477_s7 + $0x64] sm:$0xf]  ;;  %v6424_v41 = vld [vmem:[%s11477_s7 + $0x1a0] sm:$0xf] }
 0x120   : > { %3279 = vmatpush.bf16.msra.mxu0 %v6313_v46  ;;  %v1469_v36 = vpop.f32.mrf.mxu2  ;;  %v1445_v63 = vpop.f32.mrf.mxu0  ;;  %v9773_v46 = vld [vmem:[%s11476_s6] sm:$0xf]  ;;  %v6269_v60 = vor.u32 %v7530_v16, %v6266_v20  ;;  %v9889_v16 = vpack.c.bf16 %v9296_v3, %v9296_v3  ;;  %v7598_v3 = vld [vmem:[%s11477_s7 + $0x284] sm:$0xf] }
 0x121   : > { %v1470_v61 = vadd.f32 %v1469_v36, %v1457_v55  ;;  %v1482_v37 = vpop.f32.mrf.mxu3  ;;  %v1458_v7 = vpop.f32.mrf.mxu1  ;;  %v1616_v51 = vperm.slane %v9773_v46, 0  ;;  %v7610_v63 = vld [vmem:[%s11477_s7 + $0x2e4] sm:$0xf] }
 0x122   : > { %3305 = vmatpush.bf16.msra.mxu2 %v6569_v8  ;;  %v6589_v8 = vor.u32 %v7610_v63, %v6586_v5  ;;  %v7628_v63 = vld [vmem:[%s11477_s7 + $0x36c] sm:$0xf0] }
 0x123   : > { %v9695_v43 = vadd.f32 %v1482_v37, %v1470_v61  ;;  %v6473_v61 = vor.u32 %v7584_v59, %v6472_v57  ;;  %v6456_v37 = vld [vmem:[%s11477_s7 + $0x1e0] sm:$0xf]  ;;  %v7568_v57 = vld [vmem:[%s11477_s7 + $0x18c] sm:$0xf0]  ;;  %v6320_v59 = vld [vmem:[%s11477_s7 + $0xc8] sm:$0xf] }
 0x124   : > { %3280 = vmatpush.bf16.msra.mxu0 %v6297_v49  ;;  %v6282_v49 = vld [vmem:[%s11477_s7 + $0x90] sm:$0xf0]  ;;  %v7564_v5 = vld [vmem:[%s11477_s7 + $0x16c] sm:$0xf0] }
 0x125   : > { %v6285_v53 = vor.u32 %v7534_v48, %v6282_v49  ;;  %v6425_v48 = vor.u32 %v7572_v42, %v6424_v41  ;;  %v6554_v49 = vld [vmem:[%s11477_s7 + $0x2b0] sm:$0xf0]  ;;  %v7556_v41 = vld [vmem:[%s11477_s7 + $0x12c] sm:$0xf0]  ;;  %v7586_v42 = vld [vmem:[%s11477_s7 + $0x224] sm:$0xf] }
 0x126   : > { %3306 = vmatpush.bf16.msra.mxu2 %v6553_v18  ;;  %v6440_v18 = vld [vmem:[%s11477_s7 + $0x1c0] sm:$0xf] }
 0x127   : > { %v6441_v27 = vor.u32 %v7576_v19, %v6440_v18  ;;  %v7624_v18 = vld [vmem:[%s11477_s7 + $0x34c] sm:$0xf0] }
 0x128   : > { %3281 = vmatpush.bf16.msra.mxu0 %v6281_v52  ;;  %v1471_v17 = vpop.f32.mrf.mxu2  ;;  %v6489_v52 = vor.u32 %v7588_v50, %v6488_v15  ;;  %v6664_v15 = vld [vmem:[%s11477_s7 + $0x380] sm:$0xf]  ;;  %v6336_v50 = vld [vmem:[%s11477_s7 + $0xe8] sm:$0xf] }
 0x129   : > { %v1484_v22 = vpop.f32.mrf.mxu3  ;;  %v6253_v17 = vor.u32 %v7526_v0, %v6250_v1  ;;  %v6392_v0 = vld [vmem:[%s11477_s7 + $0x160] sm:$0xf]  ;;  %v3546_v1 = vunpack.c.l.b16 %v9889_v16 }
 0x12a   : > { %3307 = vmatpush.bf16.msra.mxu2 %v6537_v30 }
 0x12b   : > { %v3547_v19 = vpack.c.b16 %v3546_v1, %v3546_v1 }
 0x12c   : > { %3282 = vmatpush.bf16.msra.mxu0 %v6265_v56  ;;  %v6712_v56 = vld [vmem:[%s11477_s7 + $0x3e0] sm:$0xf] }
 0x12d   : > { %v6713_v58 = vor.u32 %v7644_v2, %v6712_v56  ;;  %v6408_v2 = vld [vmem:[%s11477_s7 + $0x180] sm:$0xf] }
 0x12e   : > { %3308 = vmatpush.bf16.msra.mxu2 %v6521_v35  ;;  %v7518_v35 = vld [vmem:[%s11477_s7 + $0x4] sm:$0xf] }
 0x12f   : > { %3317 = vmatpush.bf16.msra.mxu3 %v6713_v58 }
 0x130   : > { %3283 = vmatpush.bf16.msra.mxu0 %v6249_v38  ;;  %v7580_v38 = vld [vmem:[%s11477_s7 + $0x1ec] sm:$0xf0] }
 0x131   : > { %v6457_v4 = vor.u32 %v7580_v38, %v6456_v37  ;;  %v6648_v38 = vld [vmem:[%s11477_s7 + $0x360] sm:$0xf] }
 0x132   : > { %3309 = vmatpush.bf16.msra.mxu2 %v6505_v45  ;;  %v6218_v45 = vld [vmem:[%s11477_s7 + $0x10] sm:$0xf0] }
 0x133   : > { %3291 = vmatpush.bf16.msra.mxu1 %v6457_v4  ;;  %v6221_v56 = vor.u32 %v7518_v35, %v6218_v45  ;;  %v6649_v4 = vor.u32 %v7628_v63, %v6648_v38  ;;  %v7620_v35 = vld [vmem:[%s11477_s7 + $0x32c] sm:$0xf0]  ;;  %v1617_v45 = vperm.slane %v9773_v46, 1  ;;  %v6474_v63 = vld [vmem:[%s11477_s7 + $0x210] sm:$0xf0] }
 0x134   : > { %3284 = vmatpush.bf16.msra.mxu0 %v6233_v9  ;;  %v6696_v9 = vld [vmem:[%s11477_s7 + $0x3c0] sm:$0xf] }
 0x135   : > { %v6697_v14 = vor.u32 %v7640_v10, %v6696_v9  ;;  %v6393_v9 = vor.u32 %v7564_v5, %v6392_v0  ;;  %v7578_v5 = vld [vmem:[%s11477_s7 + $0x1e4] sm:$0xf] }
 0x136   : > { %3310 = vmatpush.bf16.msra.mxu2 %v6489_v52 }
 0x137   : > { %3318 = vmatpush.bf16.msra.mxu3 %v6697_v14  ;;  %3292 = vmatpush.bf16.msra.mxu1 %v6441_v27  ;;  %v7541_v14 = vld [vmem:[%s11477_s7 + $0xb4] sm:$0xf0]  ;;  %v6506_v27 = vld [vmem:[%s11477_s7 + $0x250] sm:$0xf0] }
 0x138   : > { %3285 = vmatpush.bf16.msra.mxu0 %v6217_v25  ;;  %v2287_v11 = vpop.f32.mrf.mxu0  ;;  %v6234_v25 = vld [vmem:[%s11477_s7 + $0x30] sm:$0xf0] }
 0x139   : > { %v2288_v54 = vadd.f32 %v2287_v11, %v1616_v51  ;;  %v2300_v55 = vpop.f32.mrf.mxu1  ;;  %v6237_v40 = vor.u32 %v7522_v24, %v6234_v25  ;;  %v7549_v51 = vld [vmem:[%s11477_s7 + $0xf4] sm:$0xf0]  ;;  %v7632_v11 = vld [vmem:[%s11477_s7 + $0x38c] sm:$0xf0]  ;;  %v7590_v25 = vld [vmem:[%s11477_s7 + $0x244] sm:$0xf] }
 0x13a   : > { %3311 = vmatpush.bf16.msra.mxu2 %v6473_v61  ;;  %v6337_v58 = vor.u32 %v7549_v51, %v6336_v50  ;;  %v6538_v61 = vld [vmem:[%s11477_s7 + $0x290] sm:$0xf0]  ;;  %v7560_v24 = vld [vmem:[%s11477_s7 + $0x14c] sm:$0xf0]  ;;  %v7533_v50 = vld [vmem:[%s11477_s7 + $0x74] sm:$0xf0] }
 0x13b   : > { %3286 = vmatmul.bf16.vlgmr.msra.gmra.mxu0 %v9755_v34  ;;  %v2301_v36 = vadd.f32 %v2300_v55, %v2288_v54  ;;  %3293 = vmatpush.bf16.msra.mxu1 %v6425_v48  ;;  %v6665_v55 = vor.u32 %v7632_v11, %v6664_v15  ;;  %v6541_v37 = vor.u32 %v7598_v3, %v6538_v61  ;;  %v6272_v15 = vld [vmem:[%s11477_s7 + $0x68] sm:$0xf]  ;;  %v6600_v51 = vld [vmem:[%s11477_s7 + $0x300] sm:$0xf] }
 0x13c   : > { %3330 = vmatpush.bf16.msrb.mxu0 %v6333_v28  ;;  %v6570_v28 = vld [vmem:[%s11477_s7 + $0x2d0] sm:$0xf0]  ;;  %v6344_v3 = vld [vmem:[%s11477_s7 + $0x100] sm:$0xf]  ;;  %v6256_v61 = vld [vmem:[%s11477_s7 + $0x48] sm:$0xf] }
 0x13d   : > { %v6573_v30 = vor.u32 %v7606_v21, %v6570_v28 }
 0x13e   : > { %3356 = vmatpush.bf16.msrb.mxu2 %v6589_v8  ;;  %v6522_v8 = vld [vmem:[%s11477_s7 + $0x270] sm:$0xf0] }
 0x140   : > { %3331 = vmatpush.bf16.msrb.mxu0 %v6317_v39  ;;  %v2313_v7 = vpop.f32.mrf.mxu2  ;;  %v2289_v26 = vpop.f32.mrf.mxu0  ;;  %v6681_v39 = vor.u32 %v7636_v32, %v6680_v31  ;;  %v6509_v31 = vor.u32 %v7590_v25, %v6506_v27  ;;  %v6616_v32 = vld [vmem:[%s11477_s7 + $0x320] sm:$0xf]  ;;  %v6442_v25 = vld [vmem:[%s11477_s7 + $0x1d0] sm:$0xf0]  ;;  %v6240_v27 = vld [vmem:[%s11477_s7 + $0x28] sm:$0xf] }
 0x141   : > { %v2314_v12 = vadd.f32 %v2313_v7, %v2301_v36  ;;  %v2326_v13 = vpop.f32.mrf.mxu3  ;;  %v2302_v29 = vpop.f32.mrf.mxu1  ;;  %v7545_v36 = vld [vmem:[%s11477_s7 + $0xd4] sm:$0xf0]  ;;  %v7594_v7 = vld [vmem:[%s11477_s7 + $0x264] sm:$0xf] }
 0x142   : > { %3357 = vmatpush.bf16.msrb.mxu2 %v6573_v30  ;;  %3319 = vmatpush.bf16.msra.mxu3 %v6681_v39  ;;  %v6525_v10 = vor.u32 %v7594_v7, %v6522_v8  ;;  %v6288_v29 = vld [vmem:[%s11477_s7 + $0x88] sm:$0xf]  ;;  %v7537_v30 = vld [vmem:[%s11477_s7 + $0x94] sm:$0xf0]  ;;  %v6360_v39 = vld [vmem:[%s11477_s7 + $0x120] sm:$0xf] }
 0x143   : > { %v2327_v22 = vadd.f32 %v2326_v13, %v2314_v12  ;;  %v6321_v12 = vor.u32 %v7545_v36, %v6320_v59  ;;  %v6304_v13 = vld [vmem:[%s11477_s7 + $0xa8] sm:$0xf]  ;;  %v7582_v59 = vld [vmem:[%s11477_s7 + $0x204] sm:$0xf]  ;;  %v6458_v7 = vld [vmem:[%s11477_s7 + $0x1f0] sm:$0xf0] }
 0x144   : > { %3332 = vmatpush.bf16.msrb.mxu0 %v6301_v47  ;;  %v6305_v28 = vor.u32 %v7541_v14, %v6304_v13  ;;  %v6477_v1 = vor.u32 %v7582_v59, %v6474_v63  ;;  %v6592_v8 = vld [vmem:[%s11477_s7 + $0x2e8] sm:$0xf]  ;;  %v6698_v13 = vld [vmem:[%s11477_s7 + $0x3d0] sm:$0xf0] }
 0x145   : > { %v9854_v33 = vpack.c.bf16 %v2327_v22, %v2327_v22  ;;  %v6376_v22 = vld [vmem:[%s11477_s7 + $0x140] sm:$0xf] }
 0x146   : > { %3320 = vmatpush.bf16.msra.mxu3 %v6665_v55  ;;  %v6377_v26 = vor.u32 %v7560_v24, %v6376_v22  ;;  %v9999_v55 = vld [vmem:[%s9713_s24 + $0x8] sm:$0xff]  ;;  %v7574_v24 = vld [vmem:[%s11477_s7 + $0x1c4] sm:$0xf] }
 0x147   : > { %v3551_v47 = vunpack.c.l.b16 %v9854_v33  ;;  %v2628_v36 = vunpack.c.l.b16 %v9999_v55 }
 0x148   : > { %3333 = vmatpush.bf16.msrb.mxu0 %v6285_v53  ;;  %v2315_v52 = vpop.f32.mrf.mxu2  ;;  %v6557_v53 = vor.u32 %v7602_v44, %v6554_v49  ;;  %v6490_v44 = vld [vmem:[%s11477_s7 + $0x230] sm:$0xf0]  ;;  %v6289_v49 = vor.u32 %v7537_v30, %v6288_v29  ;;  %v6445_v29 = vor.u32 %v7574_v24, %v6442_v25  ;;  %v7609_v30 = vld [vmem:[%s11477_s7 + $0x2d4] sm:$0xf0]  ;;  %v7539_v25 = vld [vmem:[%s11477_s7 + $0xac] sm:$0xf] }
 0x149   : > { %v3552_v20 = vpack.c.b16 %v3551_v47, %v3551_v47  ;;  %v2328_v54 = vpop.f32.mrf.mxu3  ;;  %v6361_v47 = vor.u32 %v7556_v41, %v6360_v39  ;;  %v6493_v48 = vor.u32 %v7586_v42, %v6490_v44  ;;  %v7616_v52 = vld [vmem:[%s11477_s7 + $0x30c] sm:$0xf0]  ;;  %v7634_v39 = vld [vmem:[%s11477_s7 + $0x3a4] sm:$0xf]  ;;  %v6224_v42 = vld [vmem:[%s11477_s7 + $0x8] sm:$0xf] }
 0x14a   : > { %3358 = vmatpush.bf16.msrb.mxu2 %v6557_v53  ;;  %3321 = vmatpush.bf16.msra.mxu3 %v6649_v4  ;;  %v6601_v11 = vor.u32 %v7616_v52, %v6600_v51  ;;  %v6714_v54 = vld [vmem:[%s11477_s7 + $0x3f0] sm:$0xf0]  ;;  %v10020_v4 = vpack.c.b16 %v2628_v36, %v2628_v36  ;;  %v7521_v44 = vld [vmem:[%s11477_s7 + $0x14] sm:$0xf0] }
 0x14b   : > { %3553 = vrot.lane.b32.xlu0 %v3552_v20, %s7918_s15  ;;  %v7642_v20 = vld [vmem:[%s11477_s7 + $0x3e4] sm:$0xf]  ;;  %v7605_v52 = vld [vmem:[%s11477_s7 + $0x2b4] sm:$0xf0]  ;;  %v6225_v59 = vor.u32 %v7521_v44, %v6224_v42  ;;  %v6634_v24 = vld [vmem:[%s11477_s7 + $0x350] sm:$0xf0] }
 0x14c   : > { %3334 = vmatpush.bf16.msrb.mxu0 %v6269_v60  ;;  %v6409_v60 = vor.u32 %v7568_v57, %v6408_v2  ;;  %v6717_v57 = vor.u32 %v7642_v20, %v6714_v54  ;;  %3312 = vmatmul.bf16.vlgmr.msra.gmra.mxu2 %v10020_v4  ;;  %v7547_v54 = vld [vmem:[%s11477_s7 + $0xec] sm:$0xf]  ;;  %v6618_v42 = vld [vmem:[%s11477_s7 + $0x330] sm:$0xf0] }
 0x14d   : > { %v7535_v44 = vld [vmem:[%s11477_s7 + $0x8c] sm:$0xf] }
 0x14e   : > { %3294 = vmatpush.bf16.msra.mxu1 %v6409_v60  ;;  %3359 = vmatpush.bf16.msrb.mxu2 %v6541_v37  ;;  %v6273_v60 = vor.u32 %v7533_v50, %v6272_v15  ;;  %v7529_v37 = vld [vmem:[%s11477_s7 + $0x54] sm:$0xf0]  ;;  %v6426_v15 = vld [vmem:[%s11477_s7 + $0x1b0] sm:$0xf0]  ;;  %v6560_v50 = vld [vmem:[%s11477_s7 + $0x2a8] sm:$0xf] }
 0x14f   : > { %v6257_v22 = vor.u32 %v7529_v37, %v6256_v61  ;;  %v7566_v61 = vld [vmem:[%s11477_s7 + $0x184] sm:$0xf]  ;;  %v6410_v37 = vld [vmem:[%s11477_s7 + $0x190] sm:$0xf0] }
 0x150   : > { %3335 = vmatpush.bf16.msrb.mxu0 %v6253_v17  ;;  %v6632_v17 = vld [vmem:[%s11477_s7 + $0x340] sm:$0xf] }
 0x151   : > { %v6633_v21 = vor.u32 %v7624_v18, %v6632_v17 }
 0x152   : > { %3295 = vmatpush.bf16.msra.mxu1 %v6393_v9  ;;  %3360 = vmatpush.bf16.msrb.mxu2 %v6525_v10  ;;  %v6461_v9 = vor.u32 %v7578_v5, %v6458_v7  ;;  %v7613_v10 = vld [vmem:[%s11477_s7 + $0x2f4] sm:$0xf0]  ;;  %v6322_v5 = vld [vmem:[%s11477_s7 + $0xd8] sm:$0xf0] }
 0x153   : > { %3548 = vrot.lane.b32.xlu0 %v3547_v19, %s7918_s15  ;;  %3322 = vmatpush.bf16.msra.mxu3 %v6633_v21  ;;  %v6593_v17 = vor.u32 %v7613_v10, %v6592_v8  ;;  %v7626_v8 = vld [vmem:[%s11477_s7 + $0x364] sm:$0xf] }
 0x154   : > { %3336 = vmatpush.bf16.msrb.mxu0 %v6237_v40  ;;  %v6617_v40 = vor.u32 %v7620_v35, %v6616_v32 }
 0x156   : > { %3296 = vmatpush.bf16.msra.mxu1 %v6377_v26  ;;  %3361 = vmatpush.bf16.msrb.mxu2 %v6509_v31  ;;  %v6576_v26 = vld [vmem:[%s11477_s7 + $0x2c8] sm:$0xf] }
 0x157   : > { %3323 = vmatpush.bf16.msra.mxu3 %v6617_v40  ;;  %v6577_v35 = vor.u32 %v7609_v30, %v6576_v26  ;;  %v6682_v40 = vld [vmem:[%s11477_s7 + $0x3b0] sm:$0xf0]  ;;  %v6306_v26 = vld [vmem:[%s11477_s7 + $0xb8] sm:$0xf0]  ;;  %v10155_v30 = vpack.c.bf16 %v9695_v43, %v9695_v43  ;;  %v7593_v43 = vld [vmem:[%s11477_s7 + $0x254] sm:$0xf0] }
 0x158   : > { %3337 = vmatpush.bf16.msrb.mxu0 %v6221_v56  ;;  %v2339_v53 = vpop.f32.mrf.mxu0 }
 0x159   : > { %v2340_v56 = vadd.f32 %v2339_v53, %v1617_v45  ;;  %v2352_v2 = vpop.f32.mrf.mxu1  ;;  %v6685_v45 = vor.u32 %v7634_v39, %v6682_v40  ;;  %v7630_v53 = vld [vmem:[%s11477_s7 + $0x384] sm:$0xf]  ;;  %v6309_v39 = vor.u32 %v7539_v25, %v6306_v26 }
 0x15a   : > { %3297 = vmatpush.bf16.msra.mxu1 %v6361_v47  ;;  %3362 = vmatpush.bf16.msrb.mxu2 %v6493_v48 }
 0x15b   : > { %3338 = vmatmul.bf16.vlgmr.msrb.gmra.mxu0 %v9755_v34  ;;  %v2353_v0 = vadd.f32 %v2352_v2, %v2340_v56  ;;  %3324 = vmatpush.bf16.msra.mxu3 %v6601_v11  ;;  %v6666_v11 = vld [vmem:[%s11477_s7 + $0x390] sm:$0xf0]  ;;  %v6338_v56 = vld [vmem:[%s11477_s7 + $0xf8] sm:$0xf0]  ;;  %v6561_v2 = vor.u32 %v7605_v52, %v6560_v50  ;;  %v7554_v50 = vld [vmem:[%s11477_s7 + $0x124] sm:$0xf] }
 0x15c   : > { %3382 = vmatpush.bf16.msra.mxu0 %v6337_v58  ;;  %v7552_v58 = vld [vmem:[%s11477_s7 + $0x10c] sm:$0xf0]  ;;  %v6341_v63 = vor.u32 %v7547_v54, %v6338_v56  ;;  %v6496_v52 = vld [vmem:[%s11477_s7 + $0x228] sm:$0xf]  ;;  %v7589_v56 = vld [vmem:[%s11477_s7 + $0x234] sm:$0xf0] }
 0x15d   : > { %v6345_v38 = vor.u32 %v7552_v58, %v6344_v3  ;;  %v10100_v58 = vpack.c.bf16 %v9399_v6, %v9399_v6  ;;  %v7543_v6 = vld [vmem:[%s11477_s7 + $0xcc] sm:$0xf] }
 0x15e   : > { %3363 = vmatpush.bf16.msrb.mxu2 %v6477_v1  ;;  %v7601_v1 = vld [vmem:[%s11477_s7 + $0x294] sm:$0xf0] }
 0x15f   : > { %3369 = vmatpush.bf16.msrb.mxu3 %v6717_v57  ;;  %3298 = vmatpush.bf16.msra.mxu1 %v6345_v38  ;;  %v6669_v57 = vor.u32 %v7630_v53, %v6666_v11  ;;  %v6544_v38 = vld [vmem:[%s11477_s7 + $0x288] sm:$0xf]  ;;  %v1618_v11 = vperm.slane %v9773_v46, 2 }
 0x160   : > { %3383 = vmatpush.bf16.msra.mxu0 %v6321_v12  ;;  %v7638_v12 = vld [vmem:[%s11477_s7 + $0x3c4] sm:$0xf]  ;;  %v2365_v14 = vpop.f32.mrf.mxu2  ;;  %v2341_v32 = vpop.f32.mrf.mxu0  ;;  %v6545_v7 = vor.u32 %v7601_v1, %v6544_v38  ;;  %v6480_v1 = vld [vmem:[%s11477_s7 + $0x208] sm:$0xf] }
 0x161   : > { %v6701_v18 = vor.u32 %v7638_v12, %v6698_v13  ;;  %v2366_v19 = vadd.f32 %v2365_v14, %v2353_v0  ;;  %v2378_v21 = vpop.f32.mrf.mxu3  ;;  %v2354_v41 = vpop.f32.mrf.mxu1  ;;  %v6413_v0 = vor.u32 %v7566_v61, %v6410_v37  ;;  %v3673_v12 = vunpack.c.l.b16 %v10100_v58  ;;  %v7562_v13 = vld [vmem:[%s11477_s7 + $0x164] sm:$0xf]  ;;  %v6394_v14 = vld [vmem:[%s11477_s7 + $0x170] sm:$0xf0]  ;;  %3364 = vmatmul.bf16.vlgmr.msrb.gmra.mxu2 %v10020_v4  ;;  %v6720_v61 = vld [vmem:[%s11477_s7 + $0x3e8] sm:$0xf] }
 0x162   : > { %3408 = vmatpush.bf16.msra.mxu2 %v6593_v17  ;;  %v6528_v17 = vld [vmem:[%s11477_s7 + $0x268] sm:$0xf]  ;;  %v6378_v32 = vld [vmem:[%s11477_s7 + $0x150] sm:$0xf0]  ;;  %v7618_v41 = vld [vmem:[%s11477_s7 + $0x324] sm:$0xf] }
 0x163   : > { %3343 = vmatpush.bf16.msrb.mxu1 %v6461_v9  ;;  %v2379_v31 = vadd.f32 %v2378_v21, %v2366_v19  ;;  %3370 = vmatpush.bf16.msrb.mxu3 %v6701_v18  ;;  %v6650_v9 = vld [vmem:[%s11477_s7 + $0x370] sm:$0xf0]  ;;  %v6325_v18 = vor.u32 %v7543_v6, %v6322_v5  ;;  %v6397_v19 = vor.u32 %v7562_v13, %v6394_v14  ;;  %v7597_v21 = vld [vmem:[%s11477_s7 + $0x274] sm:$0xf0]  ;;  %v7550_v38 = vld [vmem:[%s11477_s7 + $0x104] sm:$0xf] }
 0x164   : > { %3384 = vmatpush.bf16.msra.mxu0 %v6305_v28  ;;  %v7525_v28 = vld [vmem:[%s11477_s7 + $0x34] sm:$0xf0]  ;;  %v6653_v10 = vor.u32 %v7626_v8, %v6650_v9  ;;  %v6464_v13 = vld [vmem:[%s11477_s7 + $0x1e8] sm:$0xf] }
 0x165   : > { %v10071_v47 = vpack.c.bf16 %v2379_v31, %v2379_v31  ;;  %v6241_v48 = vor.u32 %v7525_v28, %v6240_v27  ;;  %v6529_v27 = vor.u32 %v7597_v21, %v6528_v17  ;;  %v7558_v31 = vld [vmem:[%s11477_s7 + $0x144] sm:$0xf]  ;;  %v7645_v37 = vld [vmem:[%s11477_s7 + $0x3f4] sm:$0xf0]  ;;  %v7611_v17 = vld [vmem:[%s11477_s7 + $0x2ec] sm:$0xf] }
 0x166   : > { %3409 = vmatpush.bf16.msra.mxu2 %v6577_v35  ;;  %v6512_v35 = vld [vmem:[%s11477_s7 + $0x248] sm:$0xf]  ;;  %v6381_v40 = vor.u32 %v7558_v31, %v6378_v32  ;;  %v7585_v5 = vld [vmem:[%s11477_s7 + $0x214] sm:$0xf0] }
 0x167   : > { %3344 = vmatpush.bf16.msrb.mxu1 %v6445_v29  ;;  %v3678_v20 = vunpack.c.l.b16 %v10071_v47  ;;  %3371 = vmatpush.bf16.msrb.mxu3 %v6685_v45  ;;  %v3674_v29 = vpack.c.b16 %v3673_v12, %v3673_v12  ;;  %v6290_v45 = vld [vmem:[%s11477_s7 + $0x98] sm:$0xf0]  ;;  %v6721_v12 = vor.u32 %v7645_v37, %v6720_v61  ;;  %v7581_v14 = vld [vmem:[%s11477_s7 + $0x1f4] sm:$0xf0]  ;;  %v6481_v21 = vor.u32 %v7585_v5, %v6480_v1 }
 0x168   : > { %3385 = vmatpush.bf16.msra.mxu0 %v6289_v49  ;;  %v7570_v49 = vld [vmem:[%s11477_s7 + $0x1a4] sm:$0xf]  ;;  %v2367_v3 = vpop.f32.mrf.mxu2  ;;  %v6293_v53 = vor.u32 %v7535_v44, %v6290_v45  ;;  %v6465_v26 = vor.u32 %v7581_v14, %v6464_v13  ;;  %v7523_v44 = vld [vmem:[%s11477_s7 + $0x2c] sm:$0xf]  ;;  %v6242_v45 = vld [vmem:[%s11477_s7 + $0x38] sm:$0xf0] }
 0x169   : > { %v6429_v51 = vor.u32 %v7570_v49, %v6426_v15  ;;  %v3679_v36 = vpack.c.b16 %v3678_v20, %v3678_v20  ;;  %v6621_v49 = vor.u32 %v7618_v41, %v6618_v42  ;;  %v3925_v15 = vunpack.c.l.b16 %v10155_v30  ;;  %v7531_v20 = vld [vmem:[%s11477_s7 + $0x6c] sm:$0xf]  ;;  %v7614_v3 = vld [vmem:[%s11477_s7 + $0x304] sm:$0xf]  ;;  %v6546_v14 = vld [vmem:[%s11477_s7 + $0x298] sm:$0xf0] }
 0x16a   : > { %3410 = vmatpush.bf16.msra.mxu2 %v6561_v2  ;;  %v6274_v2 = vld [vmem:[%s11477_s7 + $0x78] sm:$0xf0] }
 0x16b   : > { %3345 = vmatpush.bf16.msrb.mxu1 %v6429_v51  ;;  %3680 = vrot.lane.b32.xlu1 %v3679_v36, %s7918_s15  ;;  %v6362_v51 = vld [vmem:[%s11477_s7 + $0x130] sm:$0xf0]  ;;  %v2629_v36 = vunpack.c.h.b16 %v9999_v55 }
 0x16c   : > { %3386 = vmatpush.bf16.msra.mxu0 %v6273_v60  ;;  %v2380_v60 = vpop.f32.mrf.mxu3  ;;  %3372 = vmatpush.bf16.msrb.mxu3 %v6669_v57  ;;  %v6365_v54 = vor.u32 %v7554_v50, %v6362_v51  ;;  %v6497_v57 = vor.u32 %v7589_v56, %v6496_v52  ;;  %v6346_v55 = vld [vmem:[%s11477_s7 + $0x110] sm:$0xf0]  ;;  %v6688_v50 = vld [vmem:[%s11477_s7 + $0x3a8] sm:$0xf]  ;;  %v7637_v51 = vld [vmem:[%s11477_s7 + $0x3b4] sm:$0xf0] }
 0x16d   : > { %v6432_v56 = vld [vmem:[%s11477_s7 + $0x1a8] sm:$0xf] }
 0x16e   : > { %3411 = vmatpush.bf16.msra.mxu2 %v6545_v7  ;;  %v2627_v7 = vunpack.c.h.b16 %v9734_v23  ;;  %v7527_v23 = vld [vmem:[%s11477_s7 + $0x4c] sm:$0xf] }
 0x16f   : > { %3346 = vmatpush.bf16.msrb.mxu1 %v6413_v0  ;;  %v10219_v0 = vpack.c.b16 %v2629_v36, %v2629_v36  ;;  %v6226_v36 = vld [vmem:[%s11477_s7 + $0x18] sm:$0xf0] }
 0x170   : > { %3387 = vmatpush.bf16.msra.mxu0 %v6257_v22  ;;  %v7622_v22 = vld [vmem:[%s11477_s7 + $0x344] sm:$0xf]  ;;  %3373 = vmatpush.bf16.msrb.mxu3 %v6653_v10  ;;  %v6277_v10 = vor.u32 %v7531_v20, %v6274_v2  ;;  %v7573_v2 = vld [vmem:[%s11477_s7 + $0x1b4] sm:$0xf0] }
 0x171   : > { %v6637_v28 = vor.u32 %v7622_v22, %v6634_v24  ;;  %v10247_v22 = vpack.c.b16 %v2627_v7, %v2627_v7  ;;  %v6594_v24 = vld [vmem:[%s11477_s7 + $0x2f8] sm:$0xf0]  ;;  %3325 = vmatmul.bf16.vlgmr.msra.gmra.mxu3 %v10219_v0  ;;  %v6433_v61 = vor.u32 %v7573_v2, %v6432_v56  ;;  %v6416_v7 = vld [vmem:[%s11477_s7 + $0x188] sm:$0xf]  ;;  %v7643_v2 = vld [vmem:[%s11477_s7 + $0x3ec] sm:$0xf] }
 0x172   : > { %3412 = vmatpush.bf16.msra.mxu2 %v6529_v27  ;;  %v6597_v27 = vor.u32 %v7611_v17, %v6594_v24  ;;  %v6656_v17 = vld [vmem:[%s11477_s7 + $0x368] sm:$0xf]  ;;  %v7595_v24 = vld [vmem:[%s11477_s7 + $0x26c] sm:$0xf] }
 0x173   : > { %3347 = vmatpush.bf16.msrb.mxu1 %v6397_v19  ;;  %3675 = vrot.lane.b32.xlu1 %v3674_v29, %s7918_s15  ;;  %v6349_v19 = vor.u32 %v7550_v38, %v6346_v55  ;;  %v7641_v29 = vld [vmem:[%s11477_s7 + $0x3d4] sm:$0xf0]  ;;  %v6672_v38 = vld [vmem:[%s11477_s7 + $0x388] sm:$0xf] }
 0x174   : > { %3388 = vmatpush.bf16.msra.mxu0 %v6241_v48  ;;  %v6513_v48 = vor.u32 %v7593_v43, %v6512_v35  ;;  %3374 = vmatpush.bf16.msrb.mxu3 %v6637_v28  ;;  %v6704_v28 = vld [vmem:[%s11477_s7 + $0x3c8] sm:$0xf]  ;;  %v7607_v43 = vld [vmem:[%s11477_s7 + $0x2cc] sm:$0xf] }
 0x175   : > { %3299 = vmatmul.bf16.vlgmr.msra.gmra.mxu1 %v10247_v22  ;;  %v6705_v35 = vor.u32 %v7641_v29, %v6704_v28 }
 0x176   : > { %3413 = vmatpush.bf16.msra.mxu2 %v6513_v48  ;;  %v6578_v48 = vld [vmem:[%s11477_s7 + $0x2d8] sm:$0xf0] }
 0x177   : > { %3348 = vmatpush.bf16.msrb.mxu1 %v6381_v40  ;;  %v7577_v40 = vld [vmem:[%s11477_s7 + $0x1d4] sm:$0xf0] }
 0x178   : > { %3389 = vmatpush.bf16.msra.mxu0 %v6225_v59  ;;  %v6602_v59 = vld [vmem:[%s11477_s7 + $0x310] sm:$0xf0]  ;;  %3375 = vmatpush.bf16.msrb.mxu3 %v6621_v49  ;;  %v2391_v6 = vpop.f32.mrf.mxu0 }
 0x179   : > { %v6605_v60 = vor.u32 %v7614_v3, %v6602_v59  ;;  %v2392_v8 = vadd.f32 %v2391_v6, %v1618_v11  ;;  %v2404_v9 = vpop.f32.mrf.mxu1  ;;  %v6245_v11 = vor.u32 %v7523_v44, %v6242_v45  ;;  %v7519_v59 = vld [vmem:[%s11477_s7 + $0xc] sm:$0xf]  ;;  %v7621_v44 = vld [vmem:[%s11477_s7 + $0x334] sm:$0xf0] }
 0x17a   : > { %3414 = vmatpush.bf16.msra.mxu2 %v6497_v57  ;;  %v7603_v57 = vld [vmem:[%s11477_s7 + $0x2ac] sm:$0xf]  ;;  %v6229_v55 = vor.u32 %v7519_v59, %v6226_v36  ;;  %v7553_v36 = vld [vmem:[%s11477_s7 + $0x114] sm:$0xf0] }
 0x17b   : > { %3390 = vmatmul.bf16.vlgmr.msra.gmra.mxu0 %v9755_v34  ;;  %3349 = vmatpush.bf16.msrb.mxu1 %v6365_v54  ;;  %v2405_v25 = vadd.f32 %v2404_v9, %v2392_v8  ;;  %v6689_v54 = vor.u32 %v7637_v51, %v6688_v50  ;;  %v7569_v8 = vld [vmem:[%s11477_s7 + $0x194] sm:$0xf0]  ;;  %v7599_v9 = vld [vmem:[%s11477_s7 + $0x28c] sm:$0xf]  ;;  %v6498_v51 = vld [vmem:[%s11477_s7 + $0x238] sm:$0xf0] }
 0x17c   : > { %3434 = vmatpush.bf16.msrb.mxu0 %v6341_v63  ;;  %v3926_v63 = vpack.c.b16 %v3925_v15, %v3925_v15  ;;  %3376 = vmatpush.bf16.msrb.mxu3 %v6605_v60  ;;  %v6581_v15 = vor.u32 %v7607_v43, %v6578_v48  ;;  %v6562_v60 = vld [vmem:[%s11477_s7 + $0x2b8] sm:$0xf0]  ;;  %v7561_v43 = vld [vmem:[%s11477_s7 + $0x154] sm:$0xf0]  ;;  %v7587_v50 = vld [vmem:[%s11477_s7 + $0x22c] sm:$0xf] }
 0x17d   : > { %v6565_v37 = vor.u32 %v7603_v57, %v6562_v60  ;;  %v6501_v56 = vor.u32 %v7587_v50, %v6498_v51  ;;  %v6352_v57 = vld [vmem:[%s11477_s7 + $0x108] sm:$0xf]  ;;  %v7583_v60 = vld [vmem:[%s11477_s7 + $0x20c] sm:$0xf] }
 0x17e   : > { %3927 = vrot.lane.b32.xlu1 %v3926_v63, %s7918_s15  ;;  %3415 = vmatpush.bf16.msra.mxu2 %v6481_v21  ;;  %v7633_v63 = vld [vmem:[%s11477_s7 + $0x394] sm:$0xf0]  ;;  %v7623_v51 = vld [vmem:[%s11477_s7 + $0x34c] sm:$0xf] }
 0x17f   : > { %3350 = vmatpush.bf16.msrb.mxu1 %v6349_v19  ;;  %v6673_v5 = vor.u32 %v7633_v63, %v6672_v38  ;;  %v6549_v19 = vor.u32 %v7599_v9, %v6546_v14  ;;  %v7565_v21 = vld [vmem:[%s11477_s7 + $0x174] sm:$0xf0]  ;;  %v6706_v9 = vld [vmem:[%s11477_s7 + $0x3d8] sm:$0xf0]  ;;  %v7575_v14 = vld [vmem:[%s11477_s7 + $0x1cc] sm:$0xf] }
 0x180   : > { %3435 = vmatpush.bf16.msrb.mxu0 %v6325_v18  ;;  %v6258_v18 = vld [vmem:[%s11477_s7 + $0x58] sm:$0xf0]  ;;  %v2417_v31 = vpop.f32.mrf.mxu2  ;;  %3421 = vmatpush.bf16.msra.mxu3 %v6721_v12 }
 0x181   : > { %v6261_v32 = vor.u32 %v7527_v23, %v6258_v18  ;;  %v2418_v41 = vadd.f32 %v2417_v31, %v2405_v25  ;;  %v2430_v42 = vpop.f32.mrf.mxu3  ;;  %v2406_v20 = vpop.f32.mrf.mxu1  ;;  %3416 = vmatmul.bf16.vlgmr.msra.gmra.mxu2 %v10020_v4  ;;  %v7629_v23 = vld [vmem:[%s11477_s7 + $0x374] sm:$0xf0]  ;;  %v6417_v18 = vor.u32 %v7569_v8, %v6416_v7  ;;  %v6530_v25 = vld [vmem:[%s11477_s7 + $0x278] sm:$0xf0]  ;;  %3377 = vmatmul.bf16.vlgmr.msrb.gmra.mxu3 %v10219_v0  ;;  %v7639_v8 = vld [vmem:[%s11477_s7 + $0x3cc] sm:$0xf] }
 0x182   : > { %3460 = vmatpush.bf16.msrb.mxu2 %v6597_v27  ;;  %v6657_v27 = vor.u32 %v7629_v23, %v6656_v17  ;;  %v6533_v31 = vor.u32 %v7595_v24, %v6530_v25  ;;  %v7617_v20 = vld [vmem:[%s11477_s7 + $0x314] sm:$0xf0]  ;;  %v6450_v17 = vld [vmem:[%s11477_s7 + $0x1d8] sm:$0xf0]  ;;  %v6709_v23 = vor.u32 %v7639_v8, %v6706_v9 }
 0x183   : > { %3395 = vmatpush.bf16.msra.mxu1 %v6465_v26  ;;  %v2431_v52 = vadd.f32 %v2430_v42, %v2418_v41  ;;  %v3494_v26 = vsel %vm3489_vm0, %v9854_v33, 0  ;;  %v3624_v33 = vsel %vm3489_vm0, %v10071_v47, 0  ;;  %v7591_v41 = vld [vmem:[%s11477_s7 + $0x24c] sm:$0xf]  ;;  %v6624_v42 = vld [vmem:[%s11477_s7 + $0x328] sm:$0xf]  ;;  %v6453_v25 = vor.u32 %v7575_v14, %v6450_v17 }
 0x184   : > { %3436 = vmatpush.bf16.msrb.mxu0 %v6309_v39  ;;  %v6448_v39 = vld [vmem:[%s11477_s7 + $0x1c8] sm:$0xf]  ;;  %3422 = vmatpush.bf16.msra.mxu3 %v6705_v35  ;;  %v7625_v35 = vld [vmem:[%s11477_s7 + $0x354] sm:$0xf0] }
 0x185   : > { %v6449_v49 = vor.u32 %v7577_v40, %v6448_v39  ;;  %v10293_v3 = vpack.c.bf16 %v2431_v52, %v2431_v52  ;;  %v6384_v40 = vld [vmem:[%s11477_s7 + $0x148] sm:$0xf]  ;;  %3351 = vmatmul.bf16.vlgmr.msrb.gmra.mxu1 %v10247_v22  ;;  %v1619_v52 = vperm.slane %v9773_v46, 3  ;;  %v6722_v46 = vld [vmem:[%s11477_s7 + $0x3f8] sm:$0xf0] }
 0x186   : > { %3461 = vmatpush.bf16.msrb.mxu2 %v6581_v15  ;;  %v6385_v45 = vor.u32 %v7561_v43, %v6384_v40  ;;  %v7557_v15 = vld [vmem:[%s11477_s7 + $0x134] sm:$0xf0]  ;;  %v7567_v40 = vld [vmem:[%s11477_s7 + $0x18c] sm:$0xf] }
 0x187   : > { %3396 = vmatpush.bf16.msra.mxu1 %v6449_v49  ;;  %v3804_v6 = vunpack.c.l.b16 %v10293_v3  ;;  %v6368_v49 = vld [vmem:[%s11477_s7 + $0x128] sm:$0xf] }
 0x188   : > { %3437 = vmatpush.bf16.msrb.mxu0 %v6293_v53  ;;  %v2393_v53 = vpop.f32.mrf.mxu0  ;;  %v2419_v1 = vpop.f32.mrf.mxu2  ;;  %3423 = vmatpush.bf16.msra.mxu3 %v6689_v54  ;;  %v6369_v54 = vor.u32 %v7557_v15, %v6368_v49  ;;  %v7563_v49 = vld [vmem:[%s11477_s7 + $0x16c] sm:$0xf]  ;;  %v6402_v15 = vld [vmem:[%s11477_s7 + $0x178] sm:$0xf0] }
 0x189   : > { %v3805_v12 = vpack.c.b16 %v3804_v6, %v3804_v6  ;;  %v2432_v13 = vpop.f32.mrf.mxu3  ;;  %v6625_v53 = vor.u32 %v7621_v44, %v6624_v42  ;;  %v7579_v6 = vld [vmem:[%s11477_s7 + $0x1ec] sm:$0xf]  ;;  %v6725_v1 = vor.u32 %v7643_v2, %v6722_v46  ;;  %v6658_v42 = vld [vmem:[%s11477_s7 + $0x378] sm:$0xf0] }
 0x18a   : > { %3462 = vmatpush.bf16.msrb.mxu2 %v6565_v37  ;;  %v7619_v46 = vld [vmem:[%s11477_s7 + $0x32c] sm:$0xf] }
 0x18b   : > { %3397 = vmatpush.bf16.msra.mxu1 %v6433_v61  ;;  %3806 = vrot.lane.b32.xlu2 %v3805_v12, %s7918_s15  ;;  %v6482_v61 = vld [vmem:[%s11477_s7 + $0x218] sm:$0xf0] }
 0x18c   : > { %3438 = vmatpush.bf16.msrb.mxu0 %v6277_v10  ;;  %v10323_v10 = vpack.c.bf16 %v9598_v62, %v9598_v62  ;;  %v6400_v62 = vld [vmem:[%s11477_s7 + $0x168] sm:$0xf]  ;;  %3424 = vmatpush.bf16.msra.mxu3 %v6673_v5  ;;  %v6353_v5 = vor.u32 %v7553_v36, %v6352_v57  ;;  %v6485_v7 = vor.u32 %v7583_v60, %v6482_v61  ;;  %v6626_v57 = vld [vmem:[%s11477_s7 + $0x338] sm:$0xf0]  ;;  %v7615_v60 = vld [vmem:[%s11477_s7 + $0x30c] sm:$0xf] }
 0x18d   : > { %v6401_v29 = vor.u32 %v7565_v21, %v6400_v62  ;;  %v6370_v36 = vld [vmem:[%s11477_s7 + $0x138] sm:$0xf0] }
 0x18e   : > { %v3799_v28 = vunpack.c.l.b16 %v10323_v10  ;;  %3463 = vmatpush.bf16.msrb.mxu2 %v6549_v19  ;;  %v3750_v19 = vsel %vm3489_vm0, %v10293_v3, 0  ;;  %v7571_v3 = vld [vmem:[%s11477_s7 + $0x1ac] sm:$0xf]  ;;  %v6610_v61 = vld [vmem:[%s11477_s7 + $0x318] sm:$0xf0] }
 0x18f   : > { %3398 = vmatpush.bf16.msra.mxu1 %v6417_v18 }
 0x190   : > { %3439 = vmatpush.bf16.msrb.mxu0 %v6261_v32  ;;  %v6640_v32 = vld [vmem:[%s11477_s7 + $0x348] sm:$0xf]  ;;  %3425 = vmatpush.bf16.msra.mxu3 %v6657_v27  ;;  %v3800_v47 = vpack.c.b16 %v3799_v28, %v3799_v28  ;;  %v6690_v27 = vld [vmem:[%s11477_s7 + $0x3b8] sm:$0xf0] }
 0x191   : > { %v6641_v39 = vor.u32 %v7625_v35, %v6640_v32  ;;  %v7631_v32 = vld [vmem:[%s11477_s7 + $0x38c] sm:$0xf]  ;;  %v6674_v35 = vld [vmem:[%s11477_s7 + $0x398] sm:$0xf0] }
 0x192   : > { %3464 = vmatpush.bf16.msrb.mxu2 %v6533_v31 }
 0x193   : > { %3399 = vmatpush.bf16.msra.mxu1 %v6401_v29  ;;  %3801 = vrot.lane.b32.xlu2 %v3800_v47, %s7918_s15 }
 0x194   : > { %3440 = vmatpush.bf16.msrb.mxu0 %v6245_v11  ;;  %3426 = vmatpush.bf16.msra.mxu3 %v6641_v39  ;;  %v6608_v11 = vld [vmem:[%s11477_s7 + $0x308] sm:$0xf] }
 0x195   : > { %v6609_v63 = vor.u32 %v7617_v20, %v6608_v11  ;;  %v7559_v11 = vld [vmem:[%s11477_s7 + $0x14c] sm:$0xf]  ;;  %v6386_v20 = vld [vmem:[%s11477_s7 + $0x158] sm:$0xf0] }
 0x196   : > { %v6389_v2 = vor.u32 %v7559_v11, %v6386_v20 }
 0x197   : > { %3400 = vmatpush.bf16.msra.mxu1 %v6385_v45 }
 0x198   : > { %3441 = vmatpush.bf16.msrb.mxu0 %v6229_v55  ;;  %v2443_v59 = vpop.f32.mrf.mxu0  ;;  %3427 = vmatpush.bf16.msra.mxu3 %v6625_v53  ;;  %v6466_v55 = vld [vmem:[%s11477_s7 + $0x1f8] sm:$0xf0]  ;;  %v6405_v53 = vor.u32 %v7563_v49, %v6402_v15 }
 0x199   : > { %v2444_v37 = vadd.f32 %v2443_v59, %v1619_v52  ;;  %v2456_v38 = vpop.f32.mrf.mxu1  ;;  %v6469_v13 = vor.u32 %v7579_v6, %v6466_v55  ;;  %v6642_v52 = vld [vmem:[%s11477_s7 + $0x358] sm:$0xf0]  ;;  %v7555_v59 = vld [vmem:[%s11477_s7 + $0x12c] sm:$0xf]  ;;  %v6613_v6 = vor.u32 %v7615_v60, %v6610_v61 }
 0x19b   : > { %3442 = vmatmul.bf16.vlgmr.msrb.gmra.mxu0 %v9755_v34  ;;  %v6514_v34 = vld [vmem:[%s11477_s7 + $0x258] sm:$0xf0]  ;;  %3401 = vmatpush.bf16.msra.mxu1 %v6369_v54  ;;  %v2457_v12 = vadd.f32 %v2456_v38, %v2444_v37  ;;  %v6645_v54 = vor.u32 %v7623_v51, %v6642_v52  ;;  %v6373_v37 = vor.u32 %v7555_v59, %v6370_v36  ;;  %v7551_v38 = vld [vmem:[%s11477_s7 + $0x10c] sm:$0xf] }
 0x19c   : > { %3503 = vmatpush.bf16.xpose.msra.mxu0 %v3494_v26  ;;  %v6517_v48 = vor.u32 %v7591_v41, %v6514_v34  ;;  %3428 = vmatpush.bf16.msra.mxu3 %v6609_v63  ;;  %v7635_v26 = vld [vmem:[%s11477_s7 + $0x3ac] sm:$0xf]  ;;  %v6677_v41 = vor.u32 %v7631_v32, %v6674_v35  ;;  %v6354_v63 = vld [vmem:[%s11477_s7 + $0x118] sm:$0xf0] }
 0x19d   : > { %v6693_v31 = vor.u32 %v7635_v26, %v6690_v27  ;;  %v7627_v34 = vld [vmem:[%s11477_s7 + $0x36c] sm:$0xf] }
 0x19e   : > { %3465 = vmatpush.bf16.msrb.mxu2 %v6517_v48  ;;  %v6661_v50 = vor.u32 %v7627_v34, %v6658_v42 }
 0x19f   : > { %3402 = vmatpush.bf16.msra.mxu1 %v6353_v5  ;;  %3429 = vmatmul.bf16.vlgmr.msra.gmra.mxu3 %v10219_v0 }
 0x1a0   : > { %3473 = vmatpush.bf16.msrb.mxu3 %v6725_v1  ;;  %v2469_v18 = vpop.f32.mrf.mxu2  ;;  %v2445_v24 = vpop.f32.mrf.mxu0  ;;  %v6357_v1 = vor.u32 %v7551_v38, %v6354_v63 }
 0x1a1   : > { %v2470_v62 = vadd.f32 %v2469_v18, %v2457_v12  ;;  %v2482_v21 = vpop.f32.mrf.mxu3  ;;  %v2458_v28 = vpop.f32.mrf.mxu1 }
 0x1a2   : > { %3466 = vmatpush.bf16.msrb.mxu2 %v6501_v56  ;;  %3403 = vmatmul.bf16.vlgmr.msra.gmra.mxu1 %v10247_v22 }
 0x1a3   : > { %3447 = vmatpush.bf16.msrb.mxu1 %v6469_v13  ;;  %v2483_v29 = vadd.f32 %v2482_v21, %v2470_v62 }
 0x1a4   : > { %3633 = vmatpush.bf16.xpose.msrb.mxu0 %v3624_v33  ;;  %3474 = vmatpush.bf16.msrb.mxu3 %v6709_v23  ;;  %v2614_v23 = vld [vmem:[%s11478_s8] sm:$0xf] }
 0x1a5   : > { %v3870_v33 = vpack.c.bf16 %v2483_v29, %v2483_v29  ;;  %v2618_v18 = vperm.slane %v2614_v23, 2  ;;  %v2616_v21 = vperm.slane %v2614_v23, 0  ;;  %v2617_v42 = vperm.slane %v2614_v23, 1 }
 0x1a6   : > { %3467 = vmatpush.bf16.msrb.mxu2 %v6485_v7 }
 0x1a7   : > { %3448 = vmatpush.bf16.msrb.mxu1 %v6453_v25  ;;  %v3930_v43 = vunpack.c.l.b16 %v3870_v33  ;;  %v3876_v56 = vsel %vm3489_vm0, %v3870_v33, 0 }
 0x1a8   : > { %3475 = vmatpush.bf16.msrb.mxu3 %v6693_v31  ;;  %v2471_v47 = vpop.f32.mrf.mxu2 }
 0x1a9   : > { %3468 = vmatmul.bf16.vlgmr.msrb.gmra.mxu2 %v10020_v4  ;;  %v6418_v4 = vld [vmem:[%s11477_s7 + $0x198] sm:$0xf0]  ;;  %v3931_v44 = vpack.c.b16 %v3930_v43, %v3930_v43  ;;  %v2484_v45 = vpop.f32.mrf.mxu3  ;;  %v2619_v43 = vperm.slane %v2614_v23, 3 }
 0x1aa   : > { %v6421_v48 = vor.u32 %v7567_v40, %v6418_v4 }
 0x1ab   : > { %6726 = vmatmul.msk.bf16.vlgmr.msra.gmra.mxu0 %vm3489_vm0, %v9889_v16  ;;  %v6434_v16 = vld [vmem:[%s11477_s7 + $0x1b8] sm:$0xf0]  ;;  %3932 = vrot.lane.b32.xlu0 %v3931_v44, %s7918_s15 }
 0x1ac   : > { %3759 = vmatpush.bf16.xpose.msra.mxu0 %v3750_v19  ;;  %v6437_v39 = vor.u32 %v7571_v3, %v6434_v16  ;;  %3476 = vmatpush.bf16.msrb.mxu3 %v6677_v41 }
 0x1ae   : > { %3449 = vmatpush.bf16.msrb.mxu1 %v6437_v39 }
 0x1b0   : > { %3477 = vmatpush.bf16.msrb.mxu3 %v6661_v50 }
 0x1b2   : > { %3450 = vmatpush.bf16.msrb.mxu1 %v6421_v48 }
 0x1b4   : > { %3478 = vmatpush.bf16.msrb.mxu3 %v6645_v54 }
 0x1b6   : > { %3451 = vmatpush.bf16.msrb.mxu1 %v6405_v53 }
 0x1b8   : > { %v3287_v55 = vpop.f32.mrf.mxu0 }
 0x1b9   : > { %v3288_v27 = vadd.f32 %v3287_v55, %v2616_v21 }
 0x1ba   : > { %3452 = vmatpush.bf16.msrb.mxu1 %v6389_v2 }
 0x1bb   : > { %6730 = vmatmul.msk.bf16.vlgmr.msrb.gmra.mxu0 %vm3489_vm0, %v10100_v58  ;;  %v6629_v58 = vor.u32 %v7619_v46, %v6626_v57 }
 0x1bc   : > { %3885 = vmatpush.bf16.xpose.msrb.mxu0 %v3876_v56 }
 0x1bd   : > { %3479 = vmatpush.bf16.msrb.mxu3 %v6629_v58  ;;  %v3554_v7 = vpop.permute.xlu0 %3553 }
 0x1be   : > { %3453 = vmatpush.bf16.msrb.mxu1 %v6373_v37  ;;  %v3559_v8 = vsel %vm3489_vm0, %v3554_v7, 0 }
 0x1bf   : > { %3568 = vmatpush.bf16.xpose.msra.mxu2 %v3559_v8 }
 0x1c0   : > { %v3289_v5 = vpop.f32.mrf.mxu0 }
 0x1c1   : > { %3480 = vmatpush.bf16.msrb.mxu3 %v6613_v6 }
 0x1c2   : > { %3454 = vmatpush.bf16.msrb.mxu1 %v6357_v1 }
 0x1c4   : > { %3481 = vmatmul.bf16.vlgmr.msrb.gmra.mxu3 %v10219_v0 }
 0x1c5   : > { %3455 = vmatmul.bf16.vlgmr.msrb.gmra.mxu1 %v10247_v22  ;;  %v3549_v9 = vpop.permute.xlu0 %3548 }
 0x1c6   : > { %6728 = vmatmul.msk.bf16.vlgmr.msra.gmra.mxu2 %vm3489_vm0, %v3549_v9 }
 0x1cb   : > { %6734 = vmatmul.msk.bf16.vlgmr.msra.gmra.mxu0 %vm3489_vm0, %v10323_v10 }
 0x1cf   : > { %v3313_v19 = vpop.f32.mrf.mxu2 }
 0x1d7   : > { %v3315_v24 = vpop.f32.mrf.mxu2 }
 0x1d8   : > { %v3339_v12 = vpop.f32.mrf.mxu0 }
 0x1d9   : > { %v3340_v48 = vadd.f32 %v3339_v12, %v2617_v42 }
 0x1db   : > { %6738 = vmatmul.msk.bf16.vlgmr.msrb.gmra.mxu0 %vm3489_vm0, %v10155_v30 }
 0x1dd   : > { %v3681_v14 = vpop.permute.xlu1 %3680 }
 0x1de   : > { %v3686_v0 = vsel %vm3489_vm0, %v3681_v14, 0 }
 0x1df   : > { %3695 = vmatpush.bf16.xpose.msrb.mxu2 %v3686_v0 }
 0x1e0   : > { %v3341_v13 = vpop.f32.mrf.mxu0 }
 0x1e4   : > { %v3365_v16 = vpop.f32.mrf.mxu2 }
 0x1e5   : > { %v3807_v22 = vpop.permute.xlu2 %3806  ;;  %v3676_v10 = vpop.permute.xlu1 %3675 }
 0x1e6   : > { %v3812_v17 = vsel %vm3489_vm0, %v3807_v22, 0  ;;  %6732 = vmatmul.msk.bf16.vlgmr.msrb.gmra.mxu2 %vm3489_vm0, %v3676_v10 }
 0x1e7   : > { %3821 = vmatpush.bf16.xpose.msra.mxu2 %v3812_v17 }
 0x1ec   : > { %v3367_v39 = vpop.f32.mrf.mxu2 }
 0x1ed   : > { %v3802_v25 = vpop.permute.xlu2 %3801 }
 0x1f0   : > { %v3928_v36 = vpop.permute.xlu1 %3927 }
 0x1f2   : > { %v3300_v28 = vpop.f32.mrf.mxu1 }
 0x1f3   : > { %v3301_v3 = vadd.f32 %v3300_v28, %v3288_v27 }
 0x1f4   : > { %v3326_v31 = vpop.f32.mrf.mxu3 }
 0x1f5   : > { %v3314_v29 = vadd.f32 %v3313_v19, %v3301_v3 }
 0x1f6   : > { %6736 = vmatmul.msk.bf16.vlgmr.msra.gmra.mxu2 %vm3489_vm0, %v3802_v25 }
 0x1f7   : > { %v3327_v32 = vadd.f32 %v3326_v31, %v3314_v29 }
 0x1f8   : > { %v3391_v30 = vpop.f32.mrf.mxu0 }
 0x1f9   : > { %v3392_v62 = vadd.f32 %v3391_v30, %v2618_v18  ;;  %v3488_v33 = vpack.c.bf16 %v3327_v32, %v3327_v32 }
 0x1fa   : > { %v3302_v35 = vpop.f32.mrf.mxu1 }
 0x1fb   : > { %v3527_v40 = vsel %vm3525_vm1, %v3488_v33, 0  ;;  %v3587_v4 = vunpack.c.l.b16 %v3488_v33 }
 0x1fc   : > { %3536 = vmatpush.bf16.msra.mxu1 %v3527_v40  ;;  %v3328_v47 = vpop.f32.mrf.mxu3 }
 0x1fd   : > { %v3588_v41 = vpack.c.b16 %v3587_v4, %v3587_v4 }
 0x1ff   : > { %3589 = vrot.lane.b32.xlu1 %v3588_v41, %s7918_s15 }
 0x200   : > { %v3393_v26 = vpop.f32.mrf.mxu0 }
 0x202   : > { %v3352_v15 = vpop.f32.mrf.mxu1 }
 0x203   : > { %v3353_v50 = vadd.f32 %v3352_v15, %v3340_v48 }
 0x204   : > { %v3417_v45 = vpop.f32.mrf.mxu2  ;;  %v3378_v52 = vpop.f32.mrf.mxu3 }
 0x205   : > { %v3366_v53 = vadd.f32 %v3365_v16, %v3353_v50 }
 0x207   : > { %v3379_v11 = vadd.f32 %v3378_v52, %v3366_v53 }
 0x209   : > { %v10535_v54 = vpack.c.bf16 %v3379_v11, %v3379_v11 }
 0x20a   : > { %v3354_v46 = vpop.f32.mrf.mxu1 }
 0x20b   : > { %v3655_v57 = vsel %vm3525_vm1, %v10535_v54, 0 }
 0x20c   : > { %v3419_v51 = vpop.f32.mrf.mxu2  ;;  %v3380_v59 = vpop.f32.mrf.mxu3  ;;  %3664 = vmatpush.bf16.msrb.mxu1 %v3655_v57 }
 0x218   : > { %v3443_v34 = vpop.f32.mrf.mxu0 }
 0x219   : > { %v3444_v44 = vadd.f32 %v3443_v34, %v2619_v43  ;;  %v3714_v34 = vunpack.c.l.b16 %v10535_v54 }
 0x21b   : > { %v3715_v42 = vpack.c.b16 %v3714_v34, %v3714_v34 }
 0x21d   : > { %v3933_v20 = vpop.permute.xlu0 %3932 }
 0x21e   : > { %v3938_v56 = vsel %vm3489_vm0, %v3933_v20, 0 }
 0x21f   : > { %3947 = vmatpush.bf16.xpose.msrb.mxu2 %v3938_v56  ;;  %v3404_v61 = vpop.f32.mrf.mxu1 }
 0x220   : > { %v3445_v49 = vpop.f32.mrf.mxu0  ;;  %v3405_v38 = vadd.f32 %v3404_v61, %v3392_v62 }
 0x222   : > { %v3430_v37 = vpop.f32.mrf.mxu3  ;;  %v3418_v63 = vadd.f32 %v3417_v45, %v3405_v38 }
 0x224   : > { %v3431_v6 = vadd.f32 %v3430_v37, %v3418_v63 }
 0x226   : > { %6740 = vmatmul.msk.bf16.vlgmr.msrb.gmra.mxu2 %vm3489_vm0, %v3928_v36  ;;  %v10563_v39 = vpack.c.bf16 %v3431_v6, %v3431_v6 }
 0x227   : > { %v3406_v5 = vpop.f32.mrf.mxu1 }
 0x228   : > { %v10538_v2 = vpop.f32.mrf.mxu0  ;;  %v3840_v40 = vunpack.c.l.b16 %v10563_v39 }
 0x229   : > { %v3510_v24 = vsel %vm3509_vm2, %v10538_v2, -inf }
 0x22a   : > { %v3432_v7 = vpop.f32.mrf.mxu3  ;;  %v3841_v4 = vpack.c.b16 %v3840_v40, %v3840_v40 }
 0x22c   : > { %v3469_v60 = vpop.f32.mrf.mxu2 }
 0x230   : > { %v3507_v58 = vpop.f32.mrf.mxu0 }
 0x234   : > { %v3471_v1 = vpop.f32.mrf.mxu2 }
 0x238   : > { %v10543_v55 = vpop.f32.mrf.mxu0 }
 0x239   : > { %v3639_v25 = vsel %vm3509_vm2, %v10543_v55, -inf }
 0x240   : > { %v3637_v8 = vpop.f32.mrf.mxu0 }
 0x242   : > { %v3456_v9 = vpop.f32.mrf.mxu1 }
 0x243   : > { %v3457_v13 = vadd.f32 %v3456_v9, %v3444_v44 }
 0x245   : > { %v3470_v14 = vadd.f32 %v3469_v60, %v3457_v13 }
 0x247   : > { %v3482_v0 = vpop.f32.mrf.mxu3 }
 0x248   : > { %v10545_v12 = vpop.f32.mrf.mxu0  ;;  %v10547_v22 = vadd.f32 %v3482_v0, %v3470_v14 }
 0x249   : > { %v3570_v19 = vpop.f32.mrf.mxu2  ;;  %v3765_v3 = vsel %vm3509_vm2, %v10545_v12, -inf }
 0x24a   : > { %v3458_v17 = vpop.f32.mrf.mxu1  ;;  %v3574_v30 = vsel %vm3509_vm2, %v3570_v19, -inf  ;;  %v10588_v1 = vpack.c.bf16 %v10547_v22, %v10547_v22 }
 0x24b   : > { %3575 = vmax.xlane.f32.xlu2 %v3574_v30 }
 0x24c   : > { %v3966_v5 = vunpack.c.l.b16 %v10588_v1 }
 0x24e   : > { %v3967_v7 = vpack.c.b16 %v3966_v5, %v3966_v5 }
 0x24f   : > { %v3484_v23 = vpop.f32.mrf.mxu3 }
 0x250   : > { %v3763_v10 = vpop.f32.mrf.mxu0 }
 0x251   : > { %v3572_v21 = vpop.f32.mrf.mxu2 }
 0x253   : > { %3511 = vmax.xlane.f32.xlu2 %v3510_v24 }
 0x258   : > { %v10549_v18 = vpop.f32.mrf.mxu0 }
 0x259   : > { %v3891_v31 = vsel %vm3509_vm2, %v10549_v18, -inf }
 0x25b   : > { %3640 = vmax.xlane.f32.xlu2 %v3639_v25 }
 0x260   : > { %v3889_v62 = vpop.f32.mrf.mxu0 }
 0x269   : > { %v3697_v26 = vpop.f32.mrf.mxu2 }
 0x26a   : > { %v3701_v27 = vsel %vm3509_vm2, %v3697_v26, -inf }
 0x26b   : > { %3702 = vmax.xlane.f32.xlu0 %v3701_v27 }
 0x271   : > { %v3699_v28 = vpop.f32.mrf.mxu2  ;;  %v3590_v32 = vpop.permute.xlu1 %3589 }
 0x272   : > { %v3595_v35 = vsel %vm3525_vm1, %v3590_v32, 0 }
 0x273   : > { %3766 = vmax.xlane.f32.xlu0 %v3765_v3  ;;  %3604 = vmatpush.bf16.msra.mxu3 %v3595_v35 }
 0x279   : > { %v3823_v16 = vpop.f32.mrf.mxu2 }
 0x27a   : > { %v3827_v29 = vsel %vm3509_vm2, %v3823_v16, -inf }
 0x27b   : > { %3828 = vmax.xlane.f32.xlu1 %v3827_v29  ;;  %3892 = vmax.xlane.f32.xlu0 %v3891_v31 }
 0x281   : > { %v3825_v33 = vpop.f32.mrf.mxu2 }
 0x282   : > { %v3781_v33 = vsel %vm3525_vm1, %v10563_v39, 0 }
 0x294   : > { %3842 = vrot.lane.b32.xlu1 %v3841_v4, %s7918_s15 }
 0x2a9   : > { %v3949_v43 = vpop.f32.mrf.mxu2 }
 0x2aa   : > { %v3953_v41 = vsel %vm3509_vm2, %v3949_v43, -inf }
 0x2ab   : > { %3954 = vmax.xlane.f32.xlu2 %v3953_v41 }
 0x2b1   : > { %v3951_v47 = vpop.f32.mrf.mxu2 }
 0x2be   : > { %v3576_v44 = vpop.xlane.xlu2 %3575 }
 0x2bf   : > { %v3577_v45 = vsub.f32 %v3570_v19, %v3576_v44 }
 0x2c1   : > { %v3578_v48 = vmul.f32 1.442695, %v3577_v45 }
 0x2c3   : > { %3716 = vrot.lane.b32.xlu2 %v3715_v42, %s7918_s15  ;;  %7816 = vpow2.f32 %v3578_v48 }
 0x2c6   : > { %v3512_v49 = vpop.xlane.xlu2 %3511 }
 0x2c7   : > { %v3513_v15 = vsub.f32 %v10538_v2, %v3512_v49 }
 0x2c9   : > { %v7817_v50 = vpop.eup %7816  ;;  %v3514_v51 = vmul.f32 1.442695, %v3513_v15 }
 0x2ca   : > { %v3580_v52 = vsel %vm3509_vm2, %v7817_v50, 0.0 }
 0x2cb   : > { %7818 = vpow2.f32 %v3514_v51  ;;  %3581 = vadd.xlane.f32.xlu0 %v3580_v52 }
 0x2ce   : > { %v3641_v8 = vpop.xlane.xlu2 %3640 }
 0x2cf   : > { %v3642_v30 = vsub.f32 %v10543_v55, %v3641_v8 }
 0x2d1   : > { %v10572_v53 = vpop.eup %7818  ;;  %v3643_v21 = vmul.f32 1.442695, %v3642_v30  ;;  %v7672_v30 = vld [vmem:[%s11479_s9 + $0xcc] sm:$0xf0] }
 0x2d2   : > { %v3516_v11 = vsel %vm3509_vm2, %v10572_v53, 0.0 }
 0x2d3   : > { %3517 = vadd.xlane.f32.xlu1 %v3516_v11 }
 0x2de   : > { %v3703_v20 = vpop.xlane.xlu0 %3702 }
 0x2df   : > { %v3704_v54 = vsub.f32 %v3697_v26, %v3703_v20 }
 0x2e1   : > { %v3705_v56 = vmul.f32 1.442695, %v3704_v54  ;;  %v3907_v54 = vsel %vm3525_vm1, %v10588_v1, 0 }
 0x2e3   : > { %7820 = vpow2.f32 %v3705_v56 }
 0x2e6   : > { %v3767_v46 = vpop.xlane.xlu0 %3766 }
 0x2e7   : > { %v3768_v57 = vsub.f32 %v10545_v12, %v3767_v46 }
 0x2e9   : > { %v10577_v2 = vpop.eup %7820  ;;  %v3769_v59 = vmul.f32 1.442695, %v3768_v57 }
 0x2ea   : > { %v3707_v36 = vsel %vm3509_vm2, %v10577_v2, 0.0 }
 0x2eb   : > { %7822 = vpow2.f32 %v3769_v59  ;;  %3708 = vadd.xlane.f32.xlu0 %v3707_v36 }
 0x2ee   : > { %v3829_v58 = vpop.xlane.xlu1 %3828  ;;  %v3893_v9 = vpop.xlane.xlu0 %3892 }
 0x2ef   : > { %v3830_v60 = vsub.f32 %v3823_v16, %v3829_v58  ;;  %v3894_v14 = vsub.f32 %v10549_v18, %v3893_v9 }
 0x2f1   : > { %v10581_v61 = vpop.eup %7822  ;;  %v3831_v37 = vmul.f32 1.442695, %v3830_v60  ;;  %v3895_v17 = vmul.f32 1.442695, %v3894_v14 }
 0x2f2   : > { %v3771_v38 = vsel %vm3509_vm2, %v10581_v61, 0.0 }
 0x2f3   : > { %7824 = vpow2.f32 %v3831_v37  ;;  %3772 = vadd.xlane.f32.xlu1 %v3771_v38 }
 0x2f9   : > { %v7825_v63 = vpop.eup %7824 }
 0x2fa   : > { %v3833_v6 = vsel %vm3509_vm2, %v7825_v63, 0.0 }
 0x2fb   : > { %3834 = vadd.xlane.f32.xlu0 %v3833_v6 }
 0x306   : > { %v3843_v26 = vpop.permute.xlu1 %3842 }
 0x307   : > { %v3848_v29 = vsel %vm3525_vm1, %v3843_v26, 0 }
 0x30f   : > { %3968 = vrot.lane.b32.xlu0 %v3967_v7, %s7918_s15 }
 0x31e   : > { %v3955_v12 = vpop.xlane.xlu2 %3954 }
 0x31f   : > { %v3956_v13 = vsub.f32 %v3949_v43, %v3955_v12 }
 0x321   : > { %v3957_v0 = vmul.f32 1.442695, %v3956_v13 }
 0x323   : > { %7826 = vpow2.f32 %v3957_v0  ;;  %v6856_v0 = vld [vmem:[%s11479_s9 + $0xe0] sm:$0xf] }
 0x324   : > { %7828 = vpow2.f32 %v3895_v17  ;;  %v7676_v17 = vld [vmem:[%s11479_s9 + $0xec] sm:$0xf0] }
 0x325   : > { %7830 = vpow2.f32 %v3643_v21  ;;  %v6968_v21 = vld [vmem:[%s11479_s9 + $0x1c0] sm:$0xf] }
 0x326   : > { %v3717_v10 = vpop.permute.xlu2 %3716 }
 0x327   : > { %v3722_v23 = vsel %vm3525_vm1, %v3717_v10, 0  ;;  %v6984_v10 = vld [vmem:[%s11479_s9 + $0x1e0] sm:$0xf] }
 0x328   : > { %3731 = vmatpush.bf16.msrb.mxu3 %v3722_v23  ;;  %v6857_v23 = vor.u32 %v7676_v17, %v6856_v0  ;;  %v7652_v0 = vld [vmem:[%s11479_s9 + $0x2c] sm:$0xf0] }
 0x329   : > { %v7827_v22 = vpop.eup %7826 }
 0x32a   : > { %v3959_v19 = vsel %vm3509_vm2, %v7827_v22, 0.0  ;;  %v10596_v62 = vpop.eup %7828  ;;  %4789 = vmatpush.bf16.msra.mxu0 %v6857_v23  ;;  %v7684_v23 = vld [vmem:[%s11479_s9 + $0x12c] sm:$0xf0] }
 0x32b   : > { %3960 = vadd.xlane.f32.xlu2 %v3959_v19  ;;  %v3897_v18 = vsel %vm3509_vm2, %v10596_v62, 0.0  ;;  %v7831_v24 = vpop.eup %7830  ;;  %v6840_v19 = vld [vmem:[%s11479_s9 + $0xc0] sm:$0xf] }
 0x32c   : > { %v3645_v25 = vsel %vm3509_vm2, %v7831_v24, 0.0 }
 0x333   : > { %3898 = vadd.xlane.f32.xlu2 %v3897_v18  ;;  %v7704_v18 = vld [vmem:[%s11479_s9 + $0x1cc] sm:$0xf0] }
 0x334   : > { %v6969_v26 = vor.u32 %v7704_v18, %v6968_v21  ;;  %v7176_v21 = vld [vmem:[%s11479_s9 + $0x360] sm:$0xf]  ;;  %v7756_v18 = vld [vmem:[%s11479_s9 + $0x36c] sm:$0xf0] }
 0x339   : > { %3646 = vadd.xlane.f32.xlu0 %v3645_v25 }
 0x33e   : > { %v3582_v27 = vpop.xlane.xlu0 %3581 }
 0x33f   : > { %7832 = vrcp.f32 %v3582_v27 }
 0x345   : > { %v7833_v28 = vpop.eup %7832 }
 0x346   : > { %v3584_v3 = vmul.f32 %v7833_v28, %v7817_v50  ;;  %v3518_v16 = vpop.xlane.xlu1 %3517  ;;  %v6824_v28 = vld [vmem:[%s11479_s9 + $0xa0] sm:$0xf] }
 0x347   : > { %7834 = vrcp.f32 %v3518_v16  ;;  %v6952_v16 = vld [vmem:[%s11479_s9 + $0x1a0] sm:$0xf] }
 0x348   : > { %v3585_v55 = vpack.c.bf16 %v3584_v3, %v3584_v3  ;;  %v7668_v3 = vld [vmem:[%s11479_s9 + $0xac] sm:$0xf0] }
 0x34a   : > { %6729 = vmatmul.msk.bf16.vlgmr.msra.gmra.mxu3 %vm3509_vm2, %v3585_v55 }
 0x34b   : > { %3857 = vmatpush.bf16.msra.mxu3 %v3848_v29  ;;  %v6825_v29 = vor.u32 %v7668_v3, %v6824_v28 }
 0x34d   : > { %v7835_v31 = vpop.eup %7834 }
 0x34e   : > { %v3520_v32 = vmul.f32 %v7835_v31, %v10572_v53  ;;  %v7700_v31 = vld [vmem:[%s11479_s9 + $0x1ac] sm:$0xf0] }
 0x350   : > { %v3521_v35 = vpack.c.bf16 %v3520_v32, %v3520_v32  ;;  %v6953_v32 = vor.u32 %v7700_v31, %v6952_v16  ;;  %v6872_v16 = vld [vmem:[%s11479_s9 + $0x100] sm:$0xf]  ;;  %v7177_v31 = vor.u32 %v7756_v18, %v7176_v21  ;;  %v7734_v21 = vld [vmem:[%s11479_s9 + $0x2c4] sm:$0xf]  ;;  %v7098_v18 = vld [vmem:[%s11479_s9 + $0x2d0] sm:$0xf0] }
 0x352   : > { %6727 = vmatmul.msk.bf16.vlgmr.msra.gmra.mxu1 %vm3509_vm2, %v3521_v35  ;;  %v7112_v35 = vld [vmem:[%s11479_s9 + $0x2e0] sm:$0xf] }
 0x353   : > { %3790 = vmatpush.bf16.msra.mxu1 %v3781_v33  ;;  %v7740_v33 = vld [vmem:[%s11479_s9 + $0x2ec] sm:$0xf0] }
 0x35e   : > { %v3709_v40 = vpop.xlane.xlu0 %3708 }
 0x35f   : > { %7836 = vrcp.f32 %v3709_v40  ;;  %v7240_v40 = vld [vmem:[%s11479_s9 + $0x3e0] sm:$0xf] }
 0x365   : > { %v7837_v4 = vpop.eup %7836 }
 0x366   : > { %v3711_v43 = vmul.f32 %v7837_v4, %v10577_v2  ;;  %v3773_v11 = vpop.xlane.xlu1 %3772  ;;  %v7113_v4 = vor.u32 %v7740_v33, %v7112_v35  ;;  %v7706_v35 = vld [vmem:[%s11479_s9 + $0x1e4] sm:$0xf]  ;;  %v6986_v33 = vld [vmem:[%s11479_s9 + $0x1f0] sm:$0xf0] }
 0x368   : > { %v3712_v41 = vpack.c.bf16 %v3711_v43, %v3711_v43  ;;  %v7772_v43 = vld [vmem:[%s11479_s9 + $0x3ec] sm:$0xf0]  ;;  %4815 = vmatpush.bf16.msra.mxu2 %v7113_v4  ;;  %v7032_v4 = vld [vmem:[%s11479_s9 + $0x240] sm:$0xf] }
 0x36a   : > { %6733 = vmatmul.msk.bf16.vlgmr.msrb.gmra.mxu3 %vm3509_vm2, %v3712_v41  ;;  %v6808_v41 = vld [vmem:[%s11479_s9 + $0x80] sm:$0xf] }
 0x36e   : > { %v3835_v47 = vpop.xlane.xlu0 %3834 }
 0x36f   : > { %7838 = vrcp.f32 %v3835_v47  ;;  %v7241_v47 = vor.u32 %v7772_v43, %v7240_v40  ;;  %v7720_v43 = vld [vmem:[%s11479_s9 + $0x24c] sm:$0xf0] }
 0x375   : > { %v7839_v34 = vpop.eup %7838 }
 0x376   : > { %v3837_v42 = vmul.f32 %v7839_v34, %v7825_v63  ;;  %v7664_v34 = vld [vmem:[%s11479_s9 + $0x8c] sm:$0xf0] }
 0x378   : > { %v3838_v44 = vpack.c.bf16 %v3837_v42, %v3837_v42  ;;  %v6936_v42 = vld [vmem:[%s11479_s9 + $0x180] sm:$0xf] }
 0x37a   : > { %6737 = vmatmul.msk.bf16.vlgmr.msra.gmra.mxu3 %vm3509_vm2, %v3838_v44  ;;  %v7696_v44 = vld [vmem:[%s11479_s9 + $0x18c] sm:$0xf0] }
 0x381   : > { %v3969_v45 = vpop.permute.xlu0 %3968 }
 0x382   : > { %v3974_v39 = vsel %vm3525_vm1, %v3969_v45, 0  ;;  %v6809_v45 = vor.u32 %v7664_v34, %v6808_v41  ;;  %v7160_v34 = vld [vmem:[%s11479_s9 + $0x340] sm:$0xf] }
 0x383   : > { %3983 = vmatpush.bf16.msrb.mxu3 %v3974_v39  ;;  %v6937_v39 = vor.u32 %v7696_v44, %v6936_v42  ;;  %v7752_v42 = vld [vmem:[%s11479_s9 + $0x34c] sm:$0xf0]  ;;  %v6989_v44 = vor.u32 %v7706_v35, %v6986_v33  ;;  %v7082_v35 = vld [vmem:[%s11479_s9 + $0x2b0] sm:$0xf0]  ;;  %v7762_v33 = vld [vmem:[%s11479_s9 + $0x3a4] sm:$0xf] }
 0x387   : > { %4828 = vmatpush.bf16.msra.mxu3 %v7241_v47 }
 0x39e   : > { %v3961_v48 = vpop.xlane.xlu2 %3960 }
 0x39f   : > { %7840 = vrcp.f32 %v3961_v48  ;;  %v7096_v48 = vld [vmem:[%s11479_s9 + $0x2c0] sm:$0xf] }
 0x3a5   : > { %v7841_v49 = vpop.eup %7840 }
 0x3a6   : > { %v3963_v15 = vmul.f32 %v7841_v49, %v7827_v22  ;;  %v3899_v2 = vpop.xlane.xlu2 %3898  ;;  %v7708_v22 = vld [vmem:[%s11479_s9 + $0x1ec] sm:$0xf0] }
 0x3a7   : > { %v7736_v49 = vld [vmem:[%s11479_s9 + $0x2cc] sm:$0xf0] }
 0x3a8   : > { %v3964_v50 = vpack.c.bf16 %v3963_v15, %v3963_v15  ;;  %v7224_v15 = vld [vmem:[%s11479_s9 + $0x3c0] sm:$0xf] }
 0x3aa   : > { %6741 = vmatmul.msk.bf16.vlgmr.msrb.gmra.mxu3 %vm3509_vm2, %v3964_v50  ;;  %v7097_v50 = vor.u32 %v7736_v49, %v7096_v48  ;;  %v6842_v48 = vld [vmem:[%s11479_s9 + $0xd0] sm:$0xf0]  ;;  %v7702_v49 = vld [vmem:[%s11479_s9 + $0x1c4] sm:$0xf] }
 0x3ac   : > { %v3647_v51 = vpop.xlane.xlu0 %3646  ;;  %4816 = vmatpush.bf16.msra.mxu2 %v7097_v50  ;;  %v6970_v50 = vld [vmem:[%s11479_s9 + $0x1d0] sm:$0xf0] }
 0x3ad   : > { %7842 = vrcp.f32 %v3647_v51  ;;  %v7768_v51 = vld [vmem:[%s11479_s9 + $0x3cc] sm:$0xf0] }
 0x3ae   : > { %7844 = vrcp.f32 %v3773_v11  ;;  %v6792_v11 = vld [vmem:[%s11479_s9 + $0x60] sm:$0xf] }
 0x3af   : > { %7846 = vrcp.f32 %v3899_v2  ;;  %v7732_v2 = vld [vmem:[%s11479_s9 + $0x2ac] sm:$0xf0] }
 0x3b3   : > { %v7843_v52 = vpop.eup %7842 }
 0x3b4   : > { %v3649_v53 = vmul.f32 %v7843_v52, %v7831_v24  ;;  %v7845_v56 = vpop.eup %7844  ;;  %v6841_v24 = vor.u32 %v7672_v30, %v6840_v19  ;;  %v7225_v52 = vor.u32 %v7768_v51, %v7224_v15  ;;  %v7161_v15 = vor.u32 %v7752_v42, %v7160_v34  ;;  %v7016_v51 = vld [vmem:[%s11479_s9 + $0x220] sm:$0xf] }
 0x3b5   : > { %v3775_v46 = vmul.f32 %v7845_v56, %v10581_v61  ;;  %v7847_v59 = vpop.eup %7846 }
 0x3b6   : > { %v3650_v20 = vpack.c.bf16 %v3649_v53, %v3649_v53  ;;  %v3901_v37 = vmul.f32 %v7847_v59, %v10596_v62  ;;  %v6985_v62 = vor.u32 %v7708_v22, %v6984_v10  ;;  %4790 = vmatpush.bf16.msra.mxu0 %v6841_v24  ;;  %4829 = vmatpush.bf16.msra.mxu3 %v7225_v52  ;;  %v6888_v10 = vld [vmem:[%s11479_s9 + $0x120] sm:$0xf]  ;;  %v7716_v52 = vld [vmem:[%s11479_s9 + $0x22c] sm:$0xf0] }
 0x3b7   : > { %v3776_v57 = vpack.c.bf16 %v3775_v46, %v3775_v46  ;;  %v7692_v46 = vld [vmem:[%s11479_s9 + $0x16c] sm:$0xf0]  ;;  %v7048_v22 = vld [vmem:[%s11479_s9 + $0x260] sm:$0xf] }
 0x3b8   : > { %6731 = vmatmul.msk.bf16.vlgmr.msrb.gmra.mxu1 %vm3509_vm2, %v3650_v20  ;;  %v3902_v63 = vpack.c.bf16 %v3901_v37, %v3901_v37  ;;  %v7660_v20 = vld [vmem:[%s11479_s9 + $0x6c] sm:$0xf0]  ;;  %v6776_v37 = vld [vmem:[%s11479_s9 + $0x40] sm:$0xf] }
 0x3b9   : > { %3916 = vmatpush.bf16.msrb.mxu1 %v3907_v54  ;;  %v6920_v54 = vld [vmem:[%s11479_s9 + $0x160] sm:$0xf]  ;;  %v6793_v56 = vor.u32 %v7660_v20, %v6792_v11  ;;  %v7748_v11 = vld [vmem:[%s11479_s9 + $0x32c] sm:$0xf0] }
 0x3ba   : > { %4791 = vmatpush.bf16.msra.mxu0 %v6825_v29  ;;  %v6921_v59 = vor.u32 %v7692_v46, %v6920_v54  ;;  %v7674_v29 = vld [vmem:[%s11479_s9 + $0xe4] sm:$0xf]  ;;  %v7017_v46 = vor.u32 %v7716_v52, %v7016_v51 }
 0x3bb   : > { %v7650_v52 = vld [vmem:[%s11479_s9 + $0x24] sm:$0xf] }
 0x3be   : > { %4792 = vmatpush.bf16.msra.mxu0 %v6809_v45  ;;  %v7033_v45 = vor.u32 %v7720_v43, %v7032_v4  ;;  %v7210_v4 = vld [vmem:[%s11479_s9 + $0x3b0] sm:$0xf0]  ;;  %v7654_v43 = vld [vmem:[%s11479_s9 + $0x44] sm:$0xf] }
 0x3bf   : > { %v7213_v34 = vor.u32 %v7762_v33, %v7210_v4  ;;  %v6848_v33 = vld [vmem:[%s11479_s9 + $0xc8] sm:$0xf] }
 0x3c2   : > { %4793 = vmatpush.bf16.msra.mxu0 %v6793_v56  ;;  %v6973_v56 = vor.u32 %v7702_v49, %v6970_v50  ;;  %v7066_v49 = vld [vmem:[%s11479_s9 + $0x290] sm:$0xf0] }
 0x3c3   : > { %v7194_v50 = vld [vmem:[%s11479_s9 + $0x390] sm:$0xf0] }
 0x3c8   : > { %6735 = vmatmul.msk.bf16.vlgmr.msra.gmra.mxu1 %vm3509_vm2, %v3776_v57  ;;  %v7080_v57 = vld [vmem:[%s11479_s9 + $0x2a0] sm:$0xf] }
 0x3c9   : > { %4802 = vmatpush.bf16.msra.mxu1 %v6985_v62  ;;  %v7724_v62 = vld [vmem:[%s11479_s9 + $0x26c] sm:$0xf0] }
 0x3ca   : > { %v7049_v3 = vor.u32 %v7724_v62, %v7048_v22  ;;  %v7694_v22 = vld [vmem:[%s11479_s9 + $0x184] sm:$0xf] }
 0x3cd   : > { %v3606_v36 = vpop.f32.mrf.mxu3  ;;  %4803 = vmatpush.bf16.msra.mxu1 %v6969_v26  ;;  %v6744_v26 = vld [vmem:[%s11479_s9] sm:$0xf] }
 0x3ce   : > { %v3610_v58 = vpack.c.bf16 %v3606_v36, %v3606_v36  ;;  %v7081_v36 = vor.u32 %v7732_v2, %v7080_v57  ;;  %v7666_v57 = vld [vmem:[%s11479_s9 + $0xa4] sm:$0xf]  ;;  %v6826_v2 = vld [vmem:[%s11479_s9 + $0xb0] sm:$0xf0] }
 0x3cf   : > { %v3538_v60 = vpop.f32.mrf.mxu1 }
 0x3d0   : > { %v3542_v38 = vpack.c.bf16 %v3538_v60, %v3538_v60  ;;  %3612 = vrot.lane.b32.xlu0 %v3610_v58, %s7918_s15  ;;  %v7208_v58 = vld [vmem:[%s11479_s9 + $0x3a0] sm:$0xf]  ;;  %v7764_v60 = vld [vmem:[%s11479_s9 + $0x3ac] sm:$0xf0]  ;;  %4817 = vmatpush.bf16.msra.mxu2 %v7081_v36  ;;  %v6829_v36 = vor.u32 %v7666_v57, %v6826_v2  ;;  %v7754_v2 = vld [vmem:[%s11479_s9 + $0x364] sm:$0xf] }
 0x3d1   : > { %4804 = vmatpush.bf16.msra.mxu1 %v6953_v32  ;;  %v6858_v32 = vld [vmem:[%s11479_s9 + $0xf0] sm:$0xf0] }
 0x3d2   : > { %3544 = vst.msk [vmem:[#allocation2] sm:$0xf] %vm3543_vm3, %v3542_v38  ;;  %v7209_v38 = vor.u32 %v7764_v60, %v7208_v58  ;;  %v6861_v47 = vor.u32 %v7674_v29, %v6858_v32  ;;  %v7698_v58 = vld [vmem:[%s11479_s9 + $0x1a4] sm:$0xf]  ;;  %v6954_v60 = vld [vmem:[%s11479_s9 + $0x1b0] sm:$0xf0] }
 0x3d3   : > { %v6922_v29 = vld [vmem:[%s11479_s9 + $0x170] sm:$0xf0]  ;;  %v7730_v32 = vld [vmem:[%s11479_s9 + $0x2a4] sm:$0xf] }
 0x3d4   : > { %4830 = vmatpush.bf16.msra.mxu3 %v7209_v38  ;;  %v7000_v38 = vld [vmem:[%s11479_s9 + $0x200] sm:$0xf] }
 0x3d5   : > { %v3608_v6 = vpop.f32.mrf.mxu3  ;;  %4805 = vmatpush.bf16.msra.mxu1 %v6937_v39  ;;  %v7670_v39 = vld [vmem:[%s11479_s9 + $0xc4] sm:$0xf] }
 0x3d6   : > { %v6904_v6 = vld [vmem:[%s11479_s9 + $0x140] sm:$0xf]  ;;  %v6845_v54 = vor.u32 %v7670_v39, %v6842_v48  ;;  %v7726_v39 = vld [vmem:[%s11479_s9 + $0x284] sm:$0xf] }
 0x3d7   : > { %v3540_v61 = vpop.f32.mrf.mxu1  ;;  %v7069_v51 = vor.u32 %v7726_v39, %v7066_v49  ;;  %v7669_v39 = vld [vmem:[%s11479_s9 + $0xb4] sm:$0xf0] }
 0x3d8   : > { %6739 = vmatmul.msk.bf16.vlgmr.msrb.gmra.mxu1 %vm3509_vm2, %v3902_v63  ;;  %v7656_v63 = vld [vmem:[%s11479_s9 + $0x4c] sm:$0xf0]  ;;  %v7701_v49 = vld [vmem:[%s11479_s9 + $0x1b4] sm:$0xf0] }
 0x3d9   : > { %v7688_v61 = vld [vmem:[%s11479_s9 + $0x14c] sm:$0xf0]  ;;  %4806 = vmatpush.bf16.msra.mxu1 %v6921_v59 }
 0x3ed   : > { %v3733_v1 = vpop.f32.mrf.mxu3 }
 0x3ee   : > { %v3737_v12 = vpack.c.bf16 %v3733_v1, %v3733_v1  ;;  %v6777_v1 = vor.u32 %v7656_v63, %v6776_v37  ;;  %v6957_v37 = vor.u32 %v7698_v58, %v6954_v60  ;;  %v7712_v63 = vld [vmem:[%s11479_s9 + $0x20c] sm:$0xf0] }
 0x3f0   : > { %4794 = vmatpush.bf16.msra.mxu0 %v6777_v1  ;;  %v7744_v1 = vld [vmem:[%s11479_s9 + $0x30c] sm:$0xf0] }
 0x3f5   : > { %v3735_v5 = vpop.f32.mrf.mxu3 }
 0x3f6   : > { %v6905_v5 = vor.u32 %v7688_v61, %v6904_v6  ;;  %v7128_v6 = vld [vmem:[%s11479_s9 + $0x300] sm:$0xf]  ;;  %v7001_v61 = vor.u32 %v7712_v63, %v7000_v38  ;;  %v6746_v38 = vld [vmem:[%s11479_s9 + $0x10] sm:$0xf0]  ;;  %v7678_v63 = vld [vmem:[%s11479_s9 + $0x104] sm:$0xf] }
 0x3f8   : > { %4807 = vmatpush.bf16.msra.mxu1 %v6905_v5  ;;  %v7738_v5 = vld [vmem:[%s11479_s9 + $0x2e4] sm:$0xf] }
 0x3fd   : > { %v3859_v7 = vpop.f32.mrf.mxu3 }
 0x3fe   : > { %v3863_v8 = vpack.c.bf16 %v3859_v7, %v3859_v7  ;;  %v7064_v7 = vld [vmem:[%s11479_s9 + $0x280] sm:$0xf] }
 0x400   : > { %3865 = vrot.lane.b32.xlu1 %v3863_v8, %s7918_s15  ;;  %v7728_v8 = vld [vmem:[%s11479_s9 + $0x28c] sm:$0xf0] }
 0x405   : > { %v3861_v9 = vpop.f32.mrf.mxu3 }
 0x406   : > { %v7192_v9 = vld [vmem:[%s11479_s9 + $0x380] sm:$0xf] }
 0x408   : > { %3739 = vrot.lane.b32.xlu1 %v3737_v12, %s7918_s15  ;;  %v7065_v12 = vor.u32 %v7728_v8, %v7064_v7  ;;  %v7114_v7 = vld [vmem:[%s11479_s9 + $0x2f0] sm:$0xf0] }
 0x40a   : > { %4818 = vmatpush.bf16.msra.mxu2 %v7065_v12  ;;  %v7117_v12 = vor.u32 %v7738_v5, %v7114_v7  ;;  %v7718_v5 = vld [vmem:[%s11479_s9 + $0x244] sm:$0xf]  ;;  %v7034_v7 = vld [vmem:[%s11479_s9 + $0x250] sm:$0xf0] }
 0x40e   : > { %4819 = vmatpush.bf16.msra.mxu2 %v7049_v3  ;;  %v6794_v3 = vld [vmem:[%s11479_s9 + $0x70] sm:$0xf0] }
 0x412   : > { %4820 = vmatpush.bf16.msra.mxu2 %v7033_v45  ;;  %v6906_v45 = vld [vmem:[%s11479_s9 + $0x150] sm:$0xf0] }
 0x416   : > { %4821 = vmatpush.bf16.msra.mxu2 %v7017_v46  ;;  %v7050_v46 = vld [vmem:[%s11479_s9 + $0x270] sm:$0xf0] }
 0x41a   : > { %4822 = vmatpush.bf16.msra.mxu2 %v7001_v61  ;;  %v6874_v61 = vld [vmem:[%s11479_s9 + $0x110] sm:$0xf0] }
 0x41e   : > { %4867 = vmatpush.bf16.msrb.mxu2 %v7117_v12  ;;  %v7037_v12 = vor.u32 %v7718_v5, %v7034_v7  ;;  %v7769_v5 = vld [vmem:[%s11479_s9 + $0x3d4] sm:$0xf0]  ;;  %v6800_v7 = vld [vmem:[%s11479_s9 + $0x68] sm:$0xf] }
 0x42d   : > { %v3985_v13 = vpop.f32.mrf.mxu3 }
 0x42e   : > { %v3989_v14 = vpack.c.bf16 %v3985_v13, %v3985_v13  ;;  %v7760_v13 = vld [vmem:[%s11479_s9 + $0x38c] sm:$0xf0] }
 0x42f   : > { %v7193_v17 = vor.u32 %v7760_v13, %v7192_v9  ;;  %v7129_v9 = vor.u32 %v7744_v1, %v7128_v6  ;;  %v7770_v13 = vld [vmem:[%s11479_s9 + $0x3e4] sm:$0xf]  ;;  %v6877_v1 = vor.u32 %v7678_v63, %v6874_v61 }
 0x430   : > { %3991 = vrot.lane.b32.xlu2 %v3989_v14, %s7918_s15  ;;  %v6760_v14 = vld [vmem:[%s11479_s9 + $0x20] sm:$0xf] }
 0x431   : > { %v6761_v30 = vor.u32 %v7652_v0, %v6760_v14  ;;  %4831 = vmatpush.bf16.msra.mxu3 %v7193_v17  ;;  %v7242_v14 = vld [vmem:[%s11479_s9 + $0x3f0] sm:$0xf0]  ;;  %v7662_v0 = vld [vmem:[%s11479_s9 + $0x84] sm:$0xf] }
 0x433   : > { %4795 = vmatpush.bf16.msra.mxu0 %v6761_v30 }
 0x435   : > { %v3987_v25 = vpop.f32.mrf.mxu3  ;;  %v3666_v27 = vpop.f32.mrf.mxu1  ;;  %4832 = vmatpush.bf16.msra.mxu3 %v7177_v31 }
 0x436   : > { %v3670_v55 = vpack.c.bf16 %v3666_v27, %v3666_v27  ;;  %v6889_v25 = vor.u32 %v7684_v23, %v6888_v10  ;;  %v7648_v27 = vld [vmem:[%s11479_s9 + $0xc] sm:$0xf0]  ;;  %v7245_v10 = vor.u32 %v7770_v13, %v7242_v14  ;;  %v6810_v23 = vld [vmem:[%s11479_s9 + $0x90] sm:$0xf0]  ;;  %v7714_v14 = vld [vmem:[%s11479_s9 + $0x224] sm:$0xf] }
 0x437   : > { %v6745_v40 = vor.u32 %v7648_v27, %v6744_v26  ;;  %v6813_v30 = vor.u32 %v7662_v0, %v6810_v23  ;;  %v7226_v26 = vld [vmem:[%s11479_s9 + $0x3d0] sm:$0xf0]  ;;  %v7658_v27 = vld [vmem:[%s11479_s9 + $0x64] sm:$0xf] }
 0x438   : > { %3671 = vst.msk [vmem:[#allocation2 + $0x4] sm:$0xf] %vm3543_vm3, %v3670_v55  ;;  %v7680_v55 = vld [vmem:[%s11479_s9 + $0x10c] sm:$0xf0]  ;;  %4808 = vmatpush.bf16.msra.mxu1 %v6889_v25  ;;  %v7101_v25 = vor.u32 %v7734_v21, %v7098_v18  ;;  %v7018_v0 = vld [vmem:[%s11479_s9 + $0x230] sm:$0xf0] }
 0x439   : > { %v6873_v41 = vor.u32 %v7680_v55, %v6872_v16  ;;  %4796 = vmatpush.bf16.msra.mxu0 %v6745_v40  ;;  %4833 = vmatpush.bf16.msra.mxu3 %v7161_v15  ;;  %v6797_v16 = vor.u32 %v7658_v27, %v6794_v3  ;;  %v7690_v55 = vld [vmem:[%s11479_s9 + $0x164] sm:$0xf]  ;;  %v7085_v40 = vor.u32 %v7730_v32, %v7082_v35  ;;  %v7146_v23 = vld [vmem:[%s11479_s9 + $0x330] sm:$0xf0]  ;;  %v6864_v27 = vld [vmem:[%s11479_s9 + $0xe8] sm:$0xf] }
 0x43a   : > { %4868 = vmatpush.bf16.msrb.mxu2 %v7101_v25  ;;  %v6925_v31 = vor.u32 %v7690_v55, %v6922_v29  ;;  %v7758_v15 = vld [vmem:[%s11479_s9 + $0x384] sm:$0xf]  ;;  %v7130_v18 = vld [vmem:[%s11479_s9 + $0x310] sm:$0xf0]  ;;  %v6992_v3 = vld [vmem:[%s11479_s9 + $0x1e8] sm:$0xf] }
 0x43c   : > { %4809 = vmatpush.bf16.msra.mxu1 %v6873_v41  ;;  %v6778_v41 = vld [vmem:[%s11479_s9 + $0x50] sm:$0xf0] }
 0x43d   : > { %v3668_v53 = vpop.f32.mrf.mxu1  ;;  %4841 = vmatpush.bf16.msrb.mxu0 %v6861_v47  ;;  %v6781_v42 = vor.u32 %v7654_v43, %v6778_v41  ;;  %v7673_v43 = vld [vmem:[%s11479_s9 + $0xd4] sm:$0xf0]  ;;  %v6976_v41 = vld [vmem:[%s11479_s9 + $0x1c8] sm:$0xf] }
 0x43e   : > { %v7144_v53 = vld [vmem:[%s11479_s9 + $0x320] sm:$0xf]  ;;  %4869 = vmatpush.bf16.msrb.mxu2 %v7085_v40 }
 0x43f   : > { %v7145_v59 = vor.u32 %v7748_v11, %v7144_v53  ;;  %v6762_v53 = vld [vmem:[%s11479_s9 + $0x30] sm:$0xf0]  ;;  %v7682_v11 = vld [vmem:[%s11479_s9 + $0x124] sm:$0xf] }
 0x440   : > { %4854 = vmatpush.bf16.msrb.mxu1 %v6989_v44  ;;  %v7686_v44 = vld [vmem:[%s11479_s9 + $0x144] sm:$0xf]  ;;  %v6765_v57 = vor.u32 %v7650_v52, %v6762_v53  ;;  %v7741_v52 = vld [vmem:[%s11479_s9 + $0x2f4] sm:$0xf0]  ;;  %v7248_v53 = vld [vmem:[%s11479_s9 + $0x3e8] sm:$0xf] }
 0x441   : > { %4842 = vmatpush.bf16.msrb.mxu0 %v6845_v54  ;;  %4834 = vmatpush.bf16.msra.mxu3 %v7145_v59  ;;  %v6909_v48 = vor.u32 %v7686_v44, %v6906_v45  ;;  %v6890_v54 = vld [vmem:[%s11479_s9 + $0x130] sm:$0xf0]  ;;  %v6832_v45 = vld [vmem:[%s11479_s9 + $0xa8] sm:$0xf] }
 0x442   : > { %v3613_v19 = vpop.permute.xlu0 %3612  ;;  %v7178_v59 = vld [vmem:[%s11479_s9 + $0x370] sm:$0xf0]  ;;  %4870 = vmatpush.bf16.msrb.mxu2 %v7069_v51  ;;  %v7120_v51 = vld [vmem:[%s11479_s9 + $0x2e8] sm:$0xf] }
 0x443   : > { %3616 = vst.msk [vmem:[#allocation2] sm:$0xf] %vm3615_vm4, %v3613_v19  ;;  %v6938_v19 = vld [vmem:[%s11479_s9 + $0x190] sm:$0xf0]  ;;  %v7181_v60 = vor.u32 %v7754_v2, %v7178_v59 }
 0x444   : > { %4855 = vmatpush.bf16.msrb.mxu1 %v6973_v56  ;;  %v6941_v62 = vor.u32 %v7694_v22, %v6938_v19  ;;  %v7722_v56 = vld [vmem:[%s11479_s9 + $0x264] sm:$0xf] }
 0x445   : > { %v3792_v24 = vpop.f32.mrf.mxu1  ;;  %4843 = vmatpush.bf16.msrb.mxu0 %v6829_v36  ;;  %4835 = vmatpush.bf16.msra.mxu3 %v7129_v9  ;;  %v6893_v36 = vor.u32 %v7682_v11, %v6890_v54  ;;  %v7053_v58 = vor.u32 %v7722_v56, %v7050_v46  ;;  %v7162_v9 = vld [vmem:[%s11479_s9 + $0x350] sm:$0xf0]  ;;  %v7710_v19 = vld [vmem:[%s11479_s9 + $0x204] sm:$0xf]  ;;  %v7773_v11 = vld [vmem:[%s11479_s9 + $0x3f4] sm:$0xf0] }
 0x446   : > { %v3796_v28 = vpack.c.bf16 %v3792_v24, %v3792_v24  ;;  %v7766_v24 = vld [vmem:[%s11479_s9 + $0x3c4] sm:$0xf]  ;;  %v7665_v54 = vld [vmem:[%s11479_s9 + $0x94] sm:$0xf0]  ;;  %v6944_v46 = vld [vmem:[%s11479_s9 + $0x188] sm:$0xf] }
 0x447   : > { %4871 = vmatpush.bf16.msrb.mxu2 %v7053_v58  ;;  %v7249_v58 = vor.u32 %v7773_v11, %v7248_v53  ;;  %v6994_v53 = vld [vmem:[%s11479_s9 + $0x1f8] sm:$0xf0] }
 0x448   : > { %3797 = vst.msk [vmem:[#allocation2 + $0x8] sm:$0xf] %vm3543_vm3, %v3796_v28  ;;  %4856 = vmatpush.bf16.msrb.mxu1 %v6957_v37  ;;  %v7229_v28 = vor.u32 %v7766_v24, %v7226_v26  ;;  %v7646_v37 = vld [vmem:[%s11479_s9 + $0x4] sm:$0xf] }
 0x449   : > { %4880 = vmatpush.bf16.msrb.mxu3 %v7245_v10  ;;  %4844 = vmatpush.bf16.msrb.mxu0 %v6813_v30  ;;  %v6749_v6 = vor.u32 %v7646_v37, %v6746_v38  ;;  %v7021_v10 = vor.u32 %v7714_v14, %v7018_v0  ;;  %v7002_v30 = vld [vmem:[%s11479_s9 + $0x210] sm:$0xf0]  ;;  %v7737_v37 = vld [vmem:[%s11479_s9 + $0x2d4] sm:$0xf0]  ;;  %v7088_v0 = vld [vmem:[%s11479_s9 + $0x2a8] sm:$0xf] }
 0x44a   : > { %v7005_v21 = vor.u32 %v7710_v19, %v7002_v30  ;;  %v7765_v19 = vld [vmem:[%s11479_s9 + $0x3b4] sm:$0xf0]  ;;  %v6784_v30 = vld [vmem:[%s11479_s9 + $0x48] sm:$0xf] }
 0x44b   : > { %4872 = vmatpush.bf16.msrb.mxu2 %v7037_v12  ;;  %v7693_v12 = vld [vmem:[%s11479_s9 + $0x174] sm:$0xf0] }
 0x44c   : > { %4857 = vmatpush.bf16.msrb.mxu1 %v6941_v62  ;;  %v7742_v62 = vld [vmem:[%s11479_s9 + $0x304] sm:$0xf] }
 0x44d   : > { %v3794_v20 = vpop.f32.mrf.mxu1  ;;  %4881 = vmatpush.bf16.msrb.mxu3 %v7229_v28  ;;  %4845 = vmatpush.bf16.msrb.mxu0 %v6797_v16  ;;  %v7133_v25 = vor.u32 %v7742_v62, %v7130_v18  ;;  %v7677_v28 = vld [vmem:[%s11479_s9 + $0xf4] sm:$0xf0] }
 0x44e   : > { %v7197_v20 = vor.u32 %v7758_v15, %v7194_v50  ;;  %v7709_v16 = vld [vmem:[%s11479_s9 + $0x1f4] sm:$0xf0]  ;;  %v6865_v32 = vor.u32 %v7677_v28, %v6864_v27  ;;  %v6833_v15 = vor.u32 %v7669_v39, %v6832_v45  ;;  %v6752_v39 = vld [vmem:[%s11479_s9 + $0x8] sm:$0xf] }
 0x44f   : > { %4873 = vmatpush.bf16.msrb.mxu2 %v7021_v10  ;;  %v6993_v35 = vor.u32 %v7709_v16, %v6992_v3  ;;  %v7657_v62 = vld [vmem:[%s11479_s9 + $0x54] sm:$0xf0]  ;;  %v7200_v16 = vld [vmem:[%s11479_s9 + $0x388] sm:$0xf] }
 0x450   : > { %4858 = vmatpush.bf16.msrb.mxu1 %v6925_v31  ;;  %v7689_v18 = vld [vmem:[%s11479_s9 + $0x154] sm:$0xf0]  ;;  %v6785_v28 = vor.u32 %v7657_v62, %v6784_v30  ;;  %v7008_v30 = vld [vmem:[%s11479_s9 + $0x208] sm:$0xf] }
 0x451   : > { %4882 = vmatpush.bf16.msrb.mxu3 %v7213_v34  ;;  %4846 = vmatpush.bf16.msrb.mxu0 %v6781_v42  ;;  %v6849_v42 = vor.u32 %v7673_v43, %v6848_v33  ;;  %v7729_v27 = vld [vmem:[%s11479_s9 + $0x294] sm:$0xf0] }
 0x452   : > { %v7757_v45 = vld [vmem:[%s11479_s9 + $0x374] sm:$0xf0] }
 0x453   : > { %4874 = vmatpush.bf16.msrb.mxu2 %v7005_v21  ;;  %v6912_v21 = vld [vmem:[%s11479_s9 + $0x148] sm:$0xf]  ;;  %v7713_v62 = vld [vmem:[%s11479_s9 + $0x214] sm:$0xf0] }
 0x454   : > { %4859 = vmatpush.bf16.msrb.mxu1 %v6909_v48  ;;  %v6960_v48 = vld [vmem:[%s11479_s9 + $0x1a8] sm:$0xf]  ;;  %v6913_v3 = vor.u32 %v7689_v18, %v6912_v21  ;;  %v7745_v18 = vld [vmem:[%s11479_s9 + $0x314] sm:$0xf0] }
 0x455   : > { %v3918_v8 = vpop.f32.mrf.mxu1  ;;  %4883 = vmatpush.bf16.msrb.mxu3 %v7197_v20  ;;  %4847 = vmatpush.bf16.msrb.mxu0 %v6765_v57  ;;  %v6961_v50 = vor.u32 %v7701_v49, %v6960_v48  ;;  %v6816_v20 = vld [vmem:[%s11479_s9 + $0x88] sm:$0xf]  ;;  %v7697_v57 = vld [vmem:[%s11479_s9 + $0x194] sm:$0xf0] }
 0x456   : > { %v3922_v17 = vpack.c.bf16 %v3918_v8, %v3918_v8  ;;  %v7750_v8 = vld [vmem:[%s11479_s9 + $0x344] sm:$0xf]  ;;  %v6945_v61 = vor.u32 %v7697_v57, %v6944_v46  ;;  %v7649_v48 = vld [vmem:[%s11479_s9 + $0x14] sm:$0xf0]  ;;  %v6880_v49 = vld [vmem:[%s11479_s9 + $0x108] sm:$0xf] }
 0x457   : > { %v7165_v13 = vor.u32 %v7750_v8, %v7162_v9  ;;  %v7661_v8 = vld [vmem:[%s11479_s9 + $0x74] sm:$0xf0]  ;;  %v6928_v9 = vld [vmem:[%s11479_s9 + $0x168] sm:$0xf] }
 0x458   : > { %3923 = vst.msk [vmem:[#allocation2 + $0xc] sm:$0xf] %vm3543_vm3, %v3922_v17  ;;  %4860 = vmatpush.bf16.msrb.mxu1 %v6893_v36  ;;  %v7746_v17 = vld [vmem:[%s11479_s9 + $0x324] sm:$0xf]  ;;  %v7121_v36 = vor.u32 %v7741_v52, %v7120_v51  ;;  %v6801_v10 = vor.u32 %v7661_v8, %v6800_v7  ;;  %v6866_v51 = vld [vmem:[%s11479_s9 + $0xf8] sm:$0xf0] }
 0x459   : > { %4884 = vmatpush.bf16.msrb.mxu3 %v7181_v60  ;;  %4848 = vmatpush.bf16.msrb.mxu0 %v6749_v6  ;;  %v7149_v22 = vor.u32 %v7746_v17, %v7146_v23  ;;  %v7104_v60 = vld [vmem:[%s11479_s9 + $0x2c8] sm:$0xf]  ;;  %v6817_v6 = vor.u32 %v7665_v54, %v6816_v20  ;;  %v7733_v17 = vld [vmem:[%s11479_s9 + $0x2b4] sm:$0xf0]  ;;  %v6929_v23 = vor.u32 %v7693_v12, %v6928_v9  ;;  %v7707_v52 = vld [vmem:[%s11479_s9 + $0x1ec] sm:$0xf] }
 0x45a   : > { %v7040_v54 = vld [vmem:[%s11479_s9 + $0x248] sm:$0xf]  ;;  %v7721_v57 = vld [vmem:[%s11479_s9 + $0x254] sm:$0xf0] }
 0x45b   : > { %v7024_v7 = vld [vmem:[%s11479_s9 + $0x228] sm:$0xf]  ;;  %v7717_v8 = vld [vmem:[%s11479_s9 + $0x234] sm:$0xf0] }
 0x45c   : > { %4861 = vmatpush.bf16.msrb.mxu1 %v6877_v1  ;;  %v7232_v1 = vld [vmem:[%s11479_s9 + $0x3c8] sm:$0xf]  ;;  %v7749_v12 = vld [vmem:[%s11479_s9 + $0x334] sm:$0xf0] }
 0x45d   : > { %v3920_v47 = vpop.f32.mrf.mxu1  ;;  %4885 = vmatpush.bf16.msrb.mxu3 %v7165_v13  ;;  %v7105_v13 = vor.u32 %v7737_v37, %v7104_v60  ;;  %v7233_v14 = vor.u32 %v7769_v5, %v7232_v1  ;;  %v7671_v60 = vld [vmem:[%s11479_s9 + $0xcc] sm:$0xf]  ;;  %v6850_v37 = vld [vmem:[%s11479_s9 + $0xd8] sm:$0xf0]  ;;  %v7041_v1 = vor.u32 %v7721_v57, %v7040_v54  ;;  %v7152_v9 = vld [vmem:[%s11479_s9 + $0x328] sm:$0xf] }
 0x45e   : > { %v7705_v47 = vld [vmem:[%s11479_s9 + $0x1d4] sm:$0xf0]  ;;  %v7136_v21 = vld [vmem:[%s11479_s9 + $0x308] sm:$0xf]  ;;  %v7763_v54 = vld [vmem:[%s11479_s9 + $0x3ac] sm:$0xf] }
 0x45f   : > { %v6977_v44 = vor.u32 %v7705_v47, %v6976_v41  ;;  %v7056_v41 = vld [vmem:[%s11479_s9 + $0x268] sm:$0xf]  ;;  %v7725_v47 = vld [vmem:[%s11479_s9 + $0x274] sm:$0xf0]  ;;  %v6786_v57 = vld [vmem:[%s11479_s9 + $0x58] sm:$0xf0] }
 0x460   : > { %v7057_v11 = vor.u32 %v7725_v47, %v7056_v41  ;;  %v7735_v41 = vld [vmem:[%s11479_s9 + $0x2cc] sm:$0xf]  ;;  %v7106_v47 = vld [vmem:[%s11479_s9 + $0x2d8] sm:$0xf0] }
 0x461   : > { %4886 = vmatpush.bf16.msrb.mxu3 %v7149_v22  ;;  %v7216_v22 = vld [vmem:[%s11479_s9 + $0x3a8] sm:$0xf] }
 0x465   : > { %4887 = vmatpush.bf16.msrb.mxu3 %v7133_v25  ;;  %v7217_v25 = vor.u32 %v7765_v19, %v7216_v22  ;;  %v7025_v22 = vor.u32 %v7717_v8, %v7024_v7  ;;  %v7153_v19 = vor.u32 %v7749_v12, %v7152_v9  ;;  %v7651_v7 = vld [vmem:[%s11479_s9 + $0x2c] sm:$0xf]  ;;  %v6770_v8 = vld [vmem:[%s11479_s9 + $0x38] sm:$0xf0] }
 0x466   : > { %v7683_v9 = vld [vmem:[%s11479_s9 + $0x12c] sm:$0xf]  ;;  %v6898_v12 = vld [vmem:[%s11479_s9 + $0x138] sm:$0xf0] }
 0x472   : > { %v3866_v24 = vpop.permute.xlu1 %3865 }
 0x473   : > { %3868 = vst.msk [vmem:[#allocation2 + $0x8] sm:$0xf] %vm3615_vm4, %v3866_v24  ;;  %v7089_v24 = vor.u32 %v7733_v17, %v7088_v0  ;;  %v7667_v0 = vld [vmem:[%s11479_s9 + $0xac] sm:$0xf]  ;;  %v6834_v17 = vld [vmem:[%s11479_s9 + $0xb8] sm:$0xf0] }
 0x47a   : > { %v3740_v26 = vpop.permute.xlu1 %3739 }
 0x47b   : > { %3742 = vst.msk [vmem:[#allocation2 + $0x4] sm:$0xf] %vm3615_vm4, %v3740_v26  ;;  %v7072_v26 = vld [vmem:[%s11479_s9 + $0x288] sm:$0xf] }
 0x47c   : > { %v7073_v33 = vor.u32 %v7729_v27, %v7072_v26  ;;  %v6837_v26 = vor.u32 %v7667_v0, %v6834_v17  ;;  %v7723_v0 = vld [vmem:[%s11479_s9 + $0x26c] sm:$0xf]  ;;  %v7058_v17 = vld [vmem:[%s11479_s9 + $0x278] sm:$0xf0] }
 0x482   : > { %v3995_v55 = vld [vmem:[#allocation2] sm:$0xff] }
 0x483   : > { %v4137_v29 = vunpack.c.l.b16 %v3995_v55  ;;  %v4138_v31 = vunpack.c.h.b16 %v3995_v55  ;;  %v7761_v55 = vld [vmem:[%s11479_s9 + $0x394] sm:$0xf0] }
 0x484   : > { %v7201_v43 = vor.u32 %v7761_v55, %v7200_v16  ;;  %v7663_v16 = vld [vmem:[%s11479_s9 + $0x8c] sm:$0xf]  ;;  %v6818_v55 = vld [vmem:[%s11479_s9 + $0x98] sm:$0xf0] }
 0x485   : > { %v11029_v40 = vpack.c.b16 %v4137_v29, %v4137_v29  ;;  %v11031_v4 = vpack.c.b16 %v4138_v31, %v4138_v31  ;;  %v6768_v29 = vld [vmem:[%s11479_s9 + $0x28] sm:$0xf]  ;;  %v7653_v31 = vld [vmem:[%s11479_s9 + $0x34] sm:$0xf0] }
 0x487   : > { %4797 = vmatmul.bf16.vlgmr.msra.gmra.mxu0 %v11029_v40  ;;  %4810 = vmatmul.bf16.vlgmr.msra.gmra.mxu1 %v11031_v4 }
 0x488   : > { %4893 = vmatpush.bf16.msra.mxu0 %v6865_v32  ;;  %4906 = vmatpush.bf16.msra.mxu1 %v6993_v35  ;;  %v6896_v32 = vld [vmem:[%s11479_s9 + $0x128] sm:$0xf]  ;;  %v7685_v35 = vld [vmem:[%s11479_s9 + $0x134] sm:$0xf0] }
 0x48a   : > { %v3992_v34 = vpop.permute.xlu2 %3991 }
 0x48b   : > { %3994 = vst.msk [vmem:[#allocation2 + $0xc] sm:$0xf] %vm3615_vm4, %v3992_v34  ;;  %v7184_v34 = vld [vmem:[%s11479_s9 + $0x368] sm:$0xf] }
 0x48c   : > { %4894 = vmatpush.bf16.msra.mxu0 %v6849_v42  ;;  %4907 = vmatpush.bf16.msra.mxu1 %v6977_v44  ;;  %v6769_v42 = vor.u32 %v7653_v31, %v6768_v29  ;;  %v6897_v44 = vor.u32 %v7685_v35, %v6896_v32  ;;  %v7185_v20 = vor.u32 %v7757_v45, %v7184_v34  ;;  %v7695_v29 = vld [vmem:[%s11479_s9 + $0x18c] sm:$0xf]  ;;  %v6946_v31 = vld [vmem:[%s11479_s9 + $0x198] sm:$0xf0] }
 0x48d   : > { %v7009_v32 = vor.u32 %v7713_v62, %v7008_v30  ;;  %v7137_v35 = vor.u32 %v7745_v18, %v7136_v21  ;;  %v6821_v34 = vor.u32 %v7663_v16, %v6818_v55  ;;  %v7234_v45 = vld [vmem:[%s11479_s9 + $0x3d8] sm:$0xf0]  ;;  %v7647_v30 = vld [vmem:[%s11479_s9 + $0xc] sm:$0xf] }
 0x48e   : > { %v6754_v62 = vld [vmem:[%s11479_s9 + $0x18] sm:$0xf0]  ;;  %v7679_v21 = vld [vmem:[%s11479_s9 + $0x10c] sm:$0xf] }
 0x48f   : > { %v6882_v18 = vld [vmem:[%s11479_s9 + $0x118] sm:$0xf0]  ;;  %v7751_v16 = vld [vmem:[%s11479_s9 + $0x34c] sm:$0xf] }
 0x490   : > { %4895 = vmatpush.bf16.msra.mxu0 %v6833_v15  ;;  %4908 = vmatpush.bf16.msra.mxu1 %v6961_v50  ;;  %v7681_v15 = vld [vmem:[%s11479_s9 + $0x114] sm:$0xf0]  ;;  %v7675_v50 = vld [vmem:[%s11479_s9 + $0xec] sm:$0xf]  ;;  %v7170_v55 = vld [vmem:[%s11479_s9 + $0x358] sm:$0xf0] }
 0x491   : > { %v6881_v46 = vor.u32 %v7681_v15, %v6880_v49  ;;  %v7691_v49 = vld [vmem:[%s11479_s9 + $0x16c] sm:$0xf]  ;;  %v6930_v15 = vld [vmem:[%s11479_s9 + $0x178] sm:$0xf0] }
 0x492   : > { %v3996_v56 = vld [vmem:[#allocation2 + $0x8] sm:$0xff] }
 0x493   : > { %v4139_v2 = vunpack.c.l.b16 %v3996_v56  ;;  %v4140_v59 = vunpack.c.h.b16 %v3996_v56  ;;  %v6753_v56 = vor.u32 %v7649_v48, %v6752_v39  ;;  %v7659_v39 = vld [vmem:[%s11479_s9 + $0x6c] sm:$0xf]  ;;  %v6802_v48 = vld [vmem:[%s11479_s9 + $0x78] sm:$0xf0] }
 0x494   : > { %4896 = vmatpush.bf16.msra.mxu0 %v6817_v6  ;;  %4909 = vmatpush.bf16.msra.mxu1 %v6945_v61  ;;  %v7703_v6 = vld [vmem:[%s11479_s9 + $0x1cc] sm:$0xf]  ;;  %v6978_v61 = vld [vmem:[%s11479_s9 + $0x1d8] sm:$0xf0] }
 0x495   : > { %v11087_v38 = vpack.c.b16 %v4139_v2, %v4139_v2  ;;  %v11089_v63 = vpack.c.b16 %v4140_v59, %v4140_v59  ;;  %v7168_v2 = vld [vmem:[%s11479_s9 + $0x348] sm:$0xf]  ;;  %v7753_v59 = vld [vmem:[%s11479_s9 + $0x354] sm:$0xf0] }
 0x496   : > { %v7169_v5 = vor.u32 %v7753_v59, %v7168_v2  ;;  %v7687_v2 = vld [vmem:[%s11479_s9 + $0x14c] sm:$0xf]  ;;  %v6914_v59 = vld [vmem:[%s11479_s9 + $0x158] sm:$0xf0] }
 0x497   : > { %4823 = vmatmul.bf16.vlgmr.msra.gmra.mxu2 %v11087_v38  ;;  %4836 = vmatmul.bf16.vlgmr.msra.gmra.mxu3 %v11089_v63 }
 0x498   : > { %4919 = vmatpush.bf16.msra.mxu2 %v7121_v36  ;;  %4932 = vmatpush.bf16.msra.mxu3 %v7249_v58  ;;  %v6869_v36 = vor.u32 %v7675_v50, %v6866_v51  ;;  %v6997_v58 = vor.u32 %v7707_v52, %v6994_v53  ;;  %v7109_v50 = vor.u32 %v7735_v41, %v7106_v47  ;;  %v7731_v52 = vld [vmem:[%s11479_s9 + $0x2ac] sm:$0xf]  ;;  %v7090_v53 = vld [vmem:[%s11479_s9 + $0x2b8] sm:$0xf0] }
 0x499   : > { %4849 = vmatmul.bf16.vlgmr.msrb.gmra.mxu0 %v11029_v40  ;;  %4862 = vmatmul.bf16.vlgmr.msrb.gmra.mxu1 %v11031_v4 }
 0x49a   : > { %4897 = vmatpush.bf16.msra.mxu0 %v6801_v10  ;;  %4910 = vmatpush.bf16.msra.mxu1 %v6929_v23  ;;  %v7699_v10 = vld [vmem:[%s11479_s9 + $0x1ac] sm:$0xf]  ;;  %v6962_v23 = vld [vmem:[%s11479_s9 + $0x1b8] sm:$0xf0] }
 0x49b   : > { %v6965_v27 = vor.u32 %v7699_v10, %v6962_v23  ;;  %v6773_v10 = vor.u32 %v7651_v7, %v6770_v8  ;;  %v6901_v23 = vor.u32 %v7683_v9, %v6898_v12 }
 0x49c   : > { %4920 = vmatpush.bf16.msra.mxu2 %v7105_v13  ;;  %4933 = vmatpush.bf16.msra.mxu3 %v7233_v14  ;;  %v6853_v13 = vor.u32 %v7671_v60, %v6850_v37  ;;  %v6981_v14 = vor.u32 %v7703_v6, %v6978_v61  ;;  %v7727_v60 = vld [vmem:[%s11479_s9 + $0x28c] sm:$0xf]  ;;  %v7074_v37 = vld [vmem:[%s11479_s9 + $0x298] sm:$0xf0]  ;;  %v6917_v61 = vor.u32 %v7687_v2, %v6914_v59 }
 0x49e   : > { %4898 = vmatpush.bf16.msra.mxu0 %v6785_v28  ;;  %4911 = vmatpush.bf16.msra.mxu1 %v6913_v3  ;;  %v7771_v28 = vld [vmem:[%s11479_s9 + $0x3ec] sm:$0xf]  ;;  %v7250_v3 = vld [vmem:[%s11479_s9 + $0x3f8] sm:$0xf0] }
 0x4a0   : > { %4921 = vmatpush.bf16.msra.mxu2 %v7089_v24  ;;  %4934 = vmatpush.bf16.msra.mxu3 %v7217_v25  ;;  %v7739_v24 = vld [vmem:[%s11479_s9 + $0x2ec] sm:$0xf]  ;;  %v7122_v25 = vld [vmem:[%s11479_s9 + $0x2f8] sm:$0xf0] }
 0x4a2   : > { %4899 = vmatpush.bf16.msra.mxu0 %v6769_v42  ;;  %4912 = vmatpush.bf16.msra.mxu1 %v6897_v44  ;;  %v6949_v42 = vor.u32 %v7695_v29, %v6946_v31  ;;  %v7767_v44 = vld [vmem:[%s11479_s9 + $0x3cc] sm:$0xf]  ;;  %v7173_v31 = vor.u32 %v7751_v16, %v7170_v55 }
 0x4a3   : > { %v7237_v51 = vor.u32 %v7767_v44, %v7234_v45  ;;  %v7743_v44 = vld [vmem:[%s11479_s9 + $0x30c] sm:$0xf]  ;;  %v7138_v45 = vld [vmem:[%s11479_s9 + $0x318] sm:$0xf0] }
 0x4a4   : > { %4922 = vmatpush.bf16.msra.mxu2 %v7073_v33  ;;  %4935 = vmatpush.bf16.msra.mxu3 %v7201_v43  ;;  %v7125_v33 = vor.u32 %v7739_v24, %v7122_v25  ;;  %v7253_v43 = vor.u32 %v7771_v28, %v7250_v3  ;;  %v7061_v24 = vor.u32 %v7723_v0, %v7058_v17  ;;  %v7042_v3 = vld [vmem:[%s11479_s9 + $0x258] sm:$0xf0]  ;;  %v7853_v55 = vld [vmem:[%s8352_s23 + $0x8] sm:$0xff] }
 0x4a5   : > { %v6885_v28 = vor.u32 %v7679_v21, %v6882_v18 }
 0x4a6   : > { %4900 = vmatpush.bf16.msra.mxu0 %v6753_v56  ;;  %4913 = vmatpush.bf16.msra.mxu1 %v6881_v46  ;;  %v7218_v56 = vld [vmem:[%s11479_s9 + $0x3b8] sm:$0xf0]  ;;  %v7655_v46 = vld [vmem:[%s11479_s9 + $0x4c] sm:$0xf] }
 0x4a7   : > { %4875 = vmatmul.bf16.vlgmr.msrb.gmra.mxu2 %v11087_v38  ;;  %4888 = vmatmul.bf16.vlgmr.msrb.gmra.mxu3 %v11089_v63  ;;  %v6789_v6 = vor.u32 %v7655_v46, %v6786_v57 }
 0x4a8   : > { %4923 = vmatpush.bf16.msra.mxu2 %v7057_v11  ;;  %4936 = vmatpush.bf16.msra.mxu3 %v7185_v20  ;;  %v6805_v11 = vor.u32 %v7659_v39, %v6802_v48  ;;  %v6933_v20 = vor.u32 %v7691_v49, %v6930_v15  ;;  %v7141_v48 = vor.u32 %v7743_v44, %v7138_v45 }
 0x4a9   : > { %4901 = vmatmul.bf16.vlgmr.msra.gmra.mxu0 %v11029_v40  ;;  %4914 = vmatmul.bf16.vlgmr.msra.gmra.mxu1 %v11031_v4 }
 0x4aa   : > { %4945 = vmatpush.bf16.msrb.mxu0 %v6869_v36  ;;  %4958 = vmatpush.bf16.msrb.mxu1 %v6997_v58  ;;  %v7093_v36 = vor.u32 %v7731_v52, %v7090_v53  ;;  %v7221_v58 = vor.u32 %v7763_v54, %v7218_v56 }
 0x4ac   : > { %4924 = vmatpush.bf16.msra.mxu2 %v7041_v1  ;;  %4937 = vmatpush.bf16.msra.mxu3 %v7169_v5  ;;  %v7759_v1 = vld [vmem:[%s11479_s9 + $0x38c] sm:$0xf]  ;;  %v7202_v5 = vld [vmem:[%s11479_s9 + $0x398] sm:$0xf0] }
 0x4ae   : > { %4946 = vmatpush.bf16.msrb.mxu0 %v6853_v13  ;;  %4959 = vmatpush.bf16.msrb.mxu1 %v6981_v14  ;;  %v7077_v13 = vor.u32 %v7727_v60, %v7074_v37  ;;  %v7205_v14 = vor.u32 %v7759_v1, %v7202_v5 }
 0x4b0   : > { %4925 = vmatpush.bf16.msra.mxu2 %v7025_v22  ;;  %4938 = vmatpush.bf16.msra.mxu3 %v7153_v19  ;;  %v7755_v22 = vld [vmem:[%s11479_s9 + $0x36c] sm:$0xf]  ;;  %v7186_v19 = vld [vmem:[%s11479_s9 + $0x378] sm:$0xf0] }
 0x4b1   : > { %v7189_v25 = vor.u32 %v7755_v22, %v7186_v19 }
 0x4b2   : > { %4947 = vmatpush.bf16.msrb.mxu0 %v6837_v26  ;;  %4960 = vmatpush.bf16.msrb.mxu1 %v6965_v27  ;;  %v7719_v26 = vld [vmem:[%s11479_s9 + $0x24c] sm:$0xf]  ;;  %v6757_v27 = vor.u32 %v7647_v30, %v6754_v62 }
 0x4b3   : > { %v7045_v29 = vor.u32 %v7719_v26, %v7042_v3 }
 0x4b4   : > { %4926 = vmatpush.bf16.msra.mxu2 %v7009_v32  ;;  %4939 = vmatpush.bf16.msra.mxu3 %v7137_v35  ;;  %v7715_v32 = vld [vmem:[%s11479_s9 + $0x22c] sm:$0xf]  ;;  %v7026_v35 = vld [vmem:[%s11479_s9 + $0x238] sm:$0xf0] }
 0x4b5   : > { %v7029_v41 = vor.u32 %v7715_v32, %v7026_v35 }
 0x4b6   : > { %4948 = vmatpush.bf16.msrb.mxu0 %v6821_v34  ;;  %4961 = vmatpush.bf16.msrb.mxu1 %v6949_v42  ;;  %v7711_v34 = vld [vmem:[%s11479_s9 + $0x20c] sm:$0xf]  ;;  %v7010_v42 = vld [vmem:[%s11479_s9 + $0x218] sm:$0xf0] }
 0x4b7   : > { %4927 = vmatmul.bf16.vlgmr.msra.gmra.mxu2 %v11087_v38  ;;  %4940 = vmatmul.bf16.vlgmr.msra.gmra.mxu3 %v11089_v63  ;;  %v7013_v39 = vor.u32 %v7711_v34, %v7010_v42  ;;  %v5000_v34 = vunpack.c.h.bf16 %v7853_v55 }
 0x4b8   : > { %4971 = vmatpush.bf16.msrb.mxu2 %v7125_v33  ;;  %4984 = vmatpush.bf16.msrb.mxu3 %v7253_v43  ;;  %v7747_v33 = vld [vmem:[%s11479_s9 + $0x32c] sm:$0xf]  ;;  %v7154_v43 = vld [vmem:[%s11479_s9 + $0x338] sm:$0xf0] }
 0x4b9   : > { %v7157_v47 = vor.u32 %v7747_v33, %v7154_v43 }
 0x4ba   : > { %4949 = vmatpush.bf16.msrb.mxu0 %v6805_v11  ;;  %4962 = vmatpush.bf16.msrb.mxu1 %v6933_v20 }
 0x4bc   : > { %4972 = vmatpush.bf16.msrb.mxu2 %v7109_v50  ;;  %4985 = vmatpush.bf16.msrb.mxu3 %v7237_v51 }
 0x4be   : > { %4950 = vmatpush.bf16.msrb.mxu0 %v6789_v6  ;;  %4963 = vmatpush.bf16.msrb.mxu1 %v6917_v61 }
 0x4c0   : > { %4973 = vmatpush.bf16.msrb.mxu2 %v7093_v36  ;;  %4986 = vmatpush.bf16.msrb.mxu3 %v7221_v58 }
 0x4c2   : > { %4951 = vmatpush.bf16.msrb.mxu0 %v6773_v10  ;;  %4964 = vmatpush.bf16.msrb.mxu1 %v6901_v23 }
 0x4c4   : > { %4974 = vmatpush.bf16.msrb.mxu2 %v7077_v13  ;;  %4987 = vmatpush.bf16.msrb.mxu3 %v7205_v14 }
 0x4c6   : > { %4952 = vmatpush.bf16.msrb.mxu0 %v6757_v27  ;;  %4965 = vmatpush.bf16.msrb.mxu1 %v6885_v28 }
 0x4c8   : > { %4975 = vmatpush.bf16.msrb.mxu2 %v7061_v24  ;;  %4988 = vmatpush.bf16.msrb.mxu3 %v7189_v25  ;;  %v7852_v25 = vld [vmem:[%s8352_s23] sm:$0xff] }
 0x4c9   : > { %4953 = vmatmul.bf16.vlgmr.msrb.gmra.mxu0 %v11029_v40  ;;  %4966 = vmatmul.bf16.vlgmr.msrb.gmra.mxu1 %v11031_v4  ;;  %v4125_v40 = vld [vmem:[%s11480_s10] sm:$0xf]  ;;  %v4998_v26 = vunpack.c.h.bf16 %v7852_v25  ;;  %v4997_v3 = vunpack.c.l.bf16 %v7852_v25 }
 0x4ca   : > { %v4127_v4 = vperm.slane %v4125_v40, 0  ;;  %v4128_v9 = vperm.slane %v4125_v40, 1  ;;  %v4129_v12 = vperm.slane %v4125_v40, 2  ;;  %v4130_v19 = vperm.slane %v4125_v40, 3 }
 0x4cc   : > { %4976 = vmatpush.bf16.msrb.mxu2 %v7045_v29  ;;  %4989 = vmatpush.bf16.msrb.mxu3 %v7173_v31  ;;  %v4999_v29 = vunpack.c.l.bf16 %v7853_v55 }
 0x4d0   : > { %4977 = vmatpush.bf16.msrb.mxu2 %v7029_v41  ;;  %4990 = vmatpush.bf16.msrb.mxu3 %v7157_v47 }
 0x4d4   : > { %4978 = vmatpush.bf16.msrb.mxu2 %v7013_v39  ;;  %4991 = vmatpush.bf16.msrb.mxu3 %v7141_v48 }
 0x4d7   : > { %4979 = vmatmul.bf16.vlgmr.msrb.gmra.mxu2 %v11087_v38  ;;  %4992 = vmatmul.bf16.vlgmr.msrb.gmra.mxu3 %v11089_v63 }
 0x504   : > { %v4798_v49 = vpop.f32.mrf.mxu0  ;;  %v4811_v15 = vpop.f32.mrf.mxu1 }
 0x505   : > { %v4799_v50 = vadd.f32 %v4798_v49, %v4127_v4  ;;  %v7919_v49 = vmov 512.0  }
 0x506   : > { %7848 = vrcp.f32 %v7919_v49 }
 0x507   : > { %v4812_v51 = vadd.f32 %v4811_v15, %v4799_v50 }
 0x50c   : > { %v4800_v52 = vpop.f32.mrf.mxu0  ;;  %v4813_v53 = vpop.f32.mrf.mxu1 }
 0x50d   : > { %v7849_v15 = vpop.eup %7848 }
 0x50e   : > { %v5011_v50 = vmul.f32 512.0, %v7849_v15  ;;  %vm5015_vm5 = vweird.f32 %v7849_v15 }
 0x516   : > { %v4850_v11 = vpop.f32.mrf.mxu0  ;;  %v4863_v20 = vpop.f32.mrf.mxu1 }
 0x517   : > { %v4851_v0 = vadd.f32 %v4850_v11, %v4128_v9 }
 0x519   : > { %v4864_v10 = vadd.f32 %v4863_v20, %v4851_v0 }
 0x51a   : > { %v4824_v54 = vpop.f32.mrf.mxu2  ;;  %v4837_v56 = vpop.f32.mrf.mxu3 }
 0x51b   : > { %v4825_v21 = vadd.f32 %v4824_v54, %v4812_v51  ;;  %v5012_v51 = vsub.f32 1.0, %v5011_v50 }
 0x51d   : > { %v4838_v28 = vadd.f32 %v4837_v56, %v4825_v21  ;;  %v5013_v52 = vmul.f32 %v7849_v15, %v5012_v51 }
 0x51e   : > { %v4852_v46 = vpop.f32.mrf.mxu0  ;;  %v4865_v57 = vpop.f32.mrf.mxu1 }
 0x51f   : > { %v5001_v43 = vadd.f32 %v4997_v3, %v4838_v28  ;;  %v5014_v53 = vadd.f32 %v7849_v15, %v5013_v52 }
 0x521   : > { %v5016_v11 = vsel %vm5015_vm5, %v7849_v15, %v5014_v53 }
 0x522   : > { %v4826_v38 = vpop.f32.mrf.mxu2  ;;  %v4839_v2 = vpop.f32.mrf.mxu3 }
 0x526   : > { %v4902_v36 = vpop.f32.mrf.mxu0  ;;  %v4915_v58 = vpop.f32.mrf.mxu1 }
 0x527   : > { %v4903_v17 = vadd.f32 %v4902_v36, %v4129_v12  ;;  %v5047_v12 = vld [vmem:[%s11481_s11] sm:$0xf] }
 0x529   : > { %v4916_v22 = vadd.f32 %v4915_v58, %v4903_v17  ;;  %v5049_v17 = vperm.slane %v5047_v12, 0 }
 0x52a   : > { %v4876_v63 = vpop.f32.mrf.mxu2  ;;  %v4889_v59 = vpop.f32.mrf.mxu3 }
 0x52b   : > { %v4877_v23 = vadd.f32 %v4876_v63, %v4864_v10  ;;  %v5050_v10 = vperm.slane %v5047_v12, 1 }
 0x52d   : > { %v4890_v24 = vadd.f32 %v4889_v59, %v4877_v23  ;;  %v5051_v23 = vperm.slane %v5047_v12, 2 }
 0x52e   : > { %v4904_v6 = vpop.f32.mrf.mxu0  ;;  %v4917_v61 = vpop.f32.mrf.mxu1 }
 0x52f   : > { %v5002_v31 = vadd.f32 %v4998_v26, %v4890_v24 }
 0x531   : > { %v5005_v42 = vadd.f32 %v5002_v31, %v5001_v43 }
 0x532   : > { %v4878_v60 = vpop.f32.mrf.mxu2  ;;  %v4891_v37 = vpop.f32.mrf.mxu3 }
 0x53a   : > { %v4928_v1 = vpop.f32.mrf.mxu2  ;;  %v4941_v5 = vpop.f32.mrf.mxu3 }
 0x53b   : > { %v4929_v18 = vadd.f32 %v4928_v1, %v4916_v22  ;;  %v5052_v22 = vperm.slane %v5047_v12, 3 }
 0x53d   : > { %v4942_v16 = vadd.f32 %v4941_v5, %v4929_v18 }
 0x53f   : > { %v5003_v41 = vadd.f32 %v4999_v29, %v4942_v16 }
 0x541   : > { %v5006_v39 = vadd.f32 %v5005_v42, %v5003_v41 }
 0x542   : > { %v4930_v7 = vpop.f32.mrf.mxu2  ;;  %v4943_v8 = vpop.f32.mrf.mxu3 }
 0x546   : > { %v4954_v13 = vpop.f32.mrf.mxu0  ;;  %v4967_v14 = vpop.f32.mrf.mxu1 }
 0x547   : > { %v4955_v27 = vadd.f32 %v4954_v13, %v4130_v19 }
 0x549   : > { %v4968_v32 = vadd.f32 %v4967_v14, %v4955_v27  ;;  %v5061_v14 = vld [vmem:[%s11482_s12] sm:$0xf] }
 0x54a   : > { %v5065_v21 = vperm.slane %v5061_v14, 2  ;;  %v5066_v27 = vperm.slane %v5061_v14, 3 }
 0x54e   : > { %v4956_v30 = vpop.f32.mrf.mxu0  ;;  %v4969_v62 = vpop.f32.mrf.mxu1 }
 0x54f   : > { %v5063_v30 = vperm.slane %v5061_v14, 0  ;;  %v5064_v62 = vperm.slane %v5061_v14, 1 }
 0x55a   : > { %v4980_v35 = vpop.f32.mrf.mxu2  ;;  %v4993_v33 = vpop.f32.mrf.mxu3 }
 0x55b   : > { %v4981_v47 = vadd.f32 %v4980_v35, %v4968_v32 }
 0x55d   : > { %v4994_v44 = vadd.f32 %v4993_v33, %v4981_v47 }
 0x55f   : > { %v5004_v45 = vadd.f32 %v5000_v34, %v4994_v44 }
 0x561   : > { %v5007_v48 = vadd.f32 %v5006_v39, %v5004_v45 }
 0x562   : > { %v4982_v40 = vpop.f32.mrf.mxu2  ;;  %v4995_v4 = vpop.f32.mrf.mxu3 }
 0x563   : > { %5008 = vadd.xlane.f32.xlu2 %v5007_v48 }
 0x5d6   : > { %v5009_v20 = vpop.xlane.xlu2 %5008 }
 0x5d7   : > { %v5017_v54 = vmul.f32 %v5016_v11, %v5009_v20 }
 0x5d9   : > { %v5018_v56 = vsub.f32 %v5001_v43, %v5017_v54  ;;  %v5019_v46 = vsub.f32 %v5002_v31, %v5017_v54  ;;  %v5020_v57 = vsub.f32 %v5003_v41, %v5017_v54  ;;  %v5021_v38 = vsub.f32 %v5004_v45, %v5017_v54 }
 0x5db   : > { %v5022_v2 = vmul.f32 %v5018_v56, %v5018_v56  ;;  %v5023_v63 = vmul.f32 %v5019_v46, %v5019_v46  ;;  %v5024_v59 = vmul.f32 %v5020_v57, %v5020_v57  ;;  %v5025_v58 = vmul.f32 %v5021_v38, %v5021_v38 }
 0x5dd   : > { %v5026_v36 = vadd.f32 %v5023_v63, %v5022_v2 }
 0x5df   : > { %v5027_v60 = vadd.f32 %v5026_v36, %v5024_v59 }
 0x5e1   : > { %v5028_v37 = vadd.f32 %v5027_v60, %v5025_v58 }
 0x5e3   : > { %5029 = vadd.xlane.f32.xlu1 %v5028_v37 }
 0x656   : > { %v5030_v6 = vpop.xlane.xlu1 %5029 }
 0x657   : > { %v5031_v61 = vmul.f32 %v5030_v6, %v5016_v11 }
 0x659   : > { %v5032_v1 = vadd.f32 1e-05, %v5031_v61 }
 0x65b   : > { %7850 = vrsqrt.f32 %v5032_v1  ;;  %vm5039_vm7 = vweird.f32 %v5032_v1 }
 0x661   : > { %v7851_v5 = vpop.eup %7850 }
 0x662   : > { %v5034_v7 = vmul.f32 %v7851_v5, %v5032_v1  ;;  %vm5040_vm6 = vweird.f32 %v7851_v5 }
 0x663   : > { %vm5041_vm8 = vmor %vm5039_vm7, %vm5040_vm6 }
 0x664   : > { %v5035_v8 = vmul.f32 %v7851_v5, %v5034_v7 }
 0x666   : > { %v5036_v9 = vmul.f32 0.5, %v5035_v8 }
 0x668   : > { %v5037_v13 = vsub.f32 1.5, %v5036_v9 }
 0x66a   : > { %v5038_v0 = vmul.f32 %v7851_v5, %v5037_v13 }
 0x66c   : > { %v5042_v19 = vsel %vm5041_vm8, %v7851_v5, %v5038_v0 }
 0x66d   : > { %v5043_v18 = vmul.f32 %v5042_v19, %v5018_v56  ;;  %v5044_v24 = vmul.f32 %v5042_v19, %v5019_v46  ;;  %v5045_v25 = vmul.f32 %v5042_v19, %v5020_v57  ;;  %v5046_v26 = vmul.f32 %v5042_v19, %v5021_v38 }
 0x66f   : > { %v5057_v28 = vmul.f32 %v5049_v17, %v5043_v18  ;;  %v5058_v3 = vmul.f32 %v5050_v10, %v5044_v24  ;;  %v5059_v16 = vmul.f32 %v5051_v23, %v5045_v25  ;;  %v5060_v55 = vmul.f32 %v5052_v22, %v5046_v26 }
 0x671   : > { %v5071_v29 = vadd.f32 %v5063_v30, %v5057_v28  ;;  %v5072_v31 = vadd.f32 %v5064_v62, %v5058_v3  ;;  %v5073_v32 = vadd.f32 %v5065_v21, %v5059_v16  ;;  %v5074_v35 = vadd.f32 %v5066_v27, %v5060_v55 }
 0x673   : > { %5075 = vst [vmem:[%s463_s29] sm:$0xff] %v5071_v29 }
 0x674   : > { %5076 = vst [vmem:[%s463_s29 + $0x8] sm:$0xff] %v5072_v31 }
 0x675   : > { %5077 = vst [vmem:[%s463_s29 + $0x10] sm:$0xff] %v5073_v32 }
 0x676   : > { %5078 = vst [vmem:[%s463_s29 + $0x18] sm:$0xff] %v5074_v35 }
 0x677   : > { %7881 = shalt.err (!%p7878_p3)
}
 0x678   : > { %7775 = dma.vmem_to_hbm [thread:$0]  (%p8028_p5), %s5094_s21, 512, %s5096_s22, %s5080_s19  }
 0x679 PF: > { %s11500_s0 = sld [smem:[#allocation6_spill]]  ;;  %p7781_p4 = scmp.ge.s32.totalorder %s7916_s28, 2 }
 0x67b   : > { %p7778_p7 = pnand %p7781_p4, %p8032_p6 }
 0x67d   : > { %p7779_p8 = pneg %p7778_p7 }
 0x67f   : > { %s5107_s14 = sand.u32 1, %s11500_s0  }
 0x680   : > { %s5108_s16 = scalar_lea.sflag [#allocation4], %s5107_s14 }
 0x681   : > { %7899 = dma.done.wait (%p7779_p8), %s5108_s16, 512  }
 0x682   : > { %7901 = vsyncadd (%p7779_p8), %s5108_s16, 4294966784  ;;  %s11502_s28 = sld [smem:[#allocation8_spill]]  ;;  %s11505_s25 = smov %s7908_s26 }
 0x683   : > { %s11503_s3 = sld [smem:[#allocation7_spill]] }
 0x684   : > { %s11504_s27 = sld [smem:[#allocation9_spill]] }
 0x688   : > { %p23_p9 = scmp.ge.s32.totalorder %s11502_s28, 4  }
 0x689   : > { %s11506_s26 = smov %s11503_s3 }
 0x68a   :  { %25 = sbr.rel (!%p23_p9) target bundleno = 6 (0x6), region = 113 }
 0x68f   :  { %5114 = vsyncpa [#allocation4], 1 }
 0x690   :  { %5116 = vsyncpa [#allocation4 + $0x1], 1 }

</bundles_post_ra>
